<compile_context>
chip_gen: v7x
topology: tpu7x:2x2x1
jax: 0.10.0
libtpu: 0.0.40
codegen_flags: <defaults>
</compile_context>

<pallas_src>
import functools

import jax
import jax.numpy as jnp
from jax import lax
from jax.experimental import pallas as pl
from jax.experimental.pallas import tpu as pltpu

EPS = 1e-5


# ---------------------------------------------------------------------------
# In-kernel math helpers (pure jnp; also reused by the pure-JAX reference path).
# ---------------------------------------------------------------------------
def _apply_act(y, act):
    if act == "relu":
        return jnp.maximum(y, 0.0)
    if act == "lrelu":
        return jnp.where(y >= 0.0, y, 0.2 * y)
    if act == "tanh":
        return jnp.tanh(y)
    return y


def _batchnorm(y, gamma, beta, pool, pool_t):
    """Training-mode BatchNorm2d on a [N, C*H*W] slab (channel-major features).

    pool:   [F, C] 0/1 f32 -- sums features of the same channel   (exact f32 matmul)
    pool_t: [C, F] 0/1 f32 -- broadcasts per-channel scale/shift  (exact f32 matmul)
    One pass: sum & sum-of-squares; var = E[x^2] - mean^2; all statistics in f32.
    """
    n, f = y.shape
    c = pool.shape[1]
    count = float(n * (f // c))
    ch_sum = jnp.sum(jnp.dot(y, pool, preferred_element_type=jnp.float32),
                     axis=0, keepdims=True)                                  # [1, C]
    ch_sumsq = jnp.sum(jnp.dot(y * y, pool, preferred_element_type=jnp.float32),
                       axis=0, keepdims=True)                                # [1, C]
    mean = ch_sum / count
    var = jnp.maximum(ch_sumsq / count - mean * mean, 0.0)
    scale = gamma * jax.lax.rsqrt(var + EPS)                                 # [1, C]
    shift = beta - mean * scale                                              # [1, C]
    scale_f = jnp.dot(scale, pool_t, preferred_element_type=jnp.float32)     # [1, F]
    shift_f = jnp.dot(shift, pool_t, preferred_element_type=jnp.float32)     # [1, F]
    return y * scale_f + shift_f


# ---------------------------------------------------------------------------
# The fused whole-network kernel (single invocation, everything VMEM-resident).
# ---------------------------------------------------------------------------
def _netg_kernel(*refs, layer_meta, n_outputs):
    in_it = iter(refs[: len(refs) - n_outputs])
    out_it = iter(refs[len(refs) - n_outputs:])

    a = next(in_it)[...].astype(jnp.float32)           # [N, nc*isize*isize]
    for has_bn, act, emit in layer_meta:
        mat = next(in_it)[...]                          # [F_in, F_out] bf16 conv operator
        y = jnp.dot(a.astype(jnp.bfloat16), mat, preferred_element_type=jnp.float32)
        if has_bn:
            gamma = next(in_it)[...]
            beta = next(in_it)[...]
            pool = next(in_it)[...]
            pool_t = next(in_it)[...]
            y = _batchnorm(y, gamma, beta, pool, pool_t)
        a = _apply_act(y, act)
        if emit:                                        # end of enc1 / dec / enc2
            next(out_it)[...] = a


# ---------------------------------------------------------------------------
# Init-time pre-packing: PyTorch-style layer params -> dense bf16 operators.
# ---------------------------------------------------------------------------
def _layer_operator(layer, in_c, in_hw):
    """Dense [F_in, F_out] operator (channel-major flatten f = c*H*W + h*W + w) for one
    Conv2d / ConvTranspose2d (bias=False), built exactly by pushing a one-hot basis
    through lax.conv_general_dilated (every nonzero entry is a single weight value)."""
    w = layer["w"]
    stride, pad = layer["stride"], layer["pad"]
    if layer["kind"] == "conv":
        oc, ic, kh, kw = w.shape
        w_oihw = w
        strides, lhs_dil = (stride, stride), (1, 1)
        padding = ((pad, pad), (pad, pad))
    else:
        # PyTorch ConvTranspose2d(w: [IC, OC, KH, KW], stride, pad) == fractionally
        # strided conv with spatially flipped, IO-transposed weight and pad = k-1-pad.
        ic, oc, kh, kw = w.shape
        w_oihw = jnp.flip(w, axis=(2, 3)).transpose(1, 0, 2, 3)
        strides, lhs_dil = (1, 1), (stride, stride)
        padding = ((kh - 1 - pad, kh - 1 - pad), (kw - 1 - pad, kw - 1 - pad))
    ih, iw = in_hw
    assert ic == in_c, (ic, in_c)
    f_in = ic * ih * iw
    basis = jnp.eye(f_in, dtype=jnp.float32).reshape(f_in, ic, ih, iw)
    resp = lax.conv_general_dilated(
        basis, w_oihw, window_strides=strides, padding=padding,
        lhs_dilation=lhs_dil, dimension_numbers=("NCHW", "OIHW", "NCHW"))
    _, oc2, oh, ow = resp.shape
    mat = resp.reshape(f_in, oc2 * oh * ow).astype(jnp.bfloat16)
    return mat, oc2, (oh, ow)


def pack_netg(enc1_layers, dec_layers, enc2_layers, *, nc, nz, isize):
    """Pre-pack all weights once (outside the hot path): dense bf16 conv operators plus
    f32 BN params / pooling matrices, in the exact order the fused kernel consumes them."""
    stages = ((enc1_layers, nc, (isize, isize)),   # encoder1: x        -> latent_i
              (dec_layers, nz, (1, 1)),            # decoder : latent_i -> gen image
              (enc2_layers, nc, (isize, isize)))   # encoder2: gen      -> latent_o
    operands, layer_meta, stage_out = [], [], []
    for layers, c, hw in stages:
        for li, layer in enumerate(layers):
            mat, c, hw = _layer_operator(layer, c, hw)
            operands.append(mat)
            has_bn = layer["bn"] is not None
            if has_bn:
                gamma, beta = layer["bn"]
                hw_total = hw[0] * hw[1]
                pool = jnp.repeat(jnp.eye(c, dtype=jnp.float32), hw_total, axis=0)  # [F, C]
                operands.append(jnp.asarray(gamma, jnp.float32).reshape(1, c))
                operands.append(jnp.asarray(beta, jnp.float32).reshape(1, c))
                operands.append(pool)
                operands.append(pool.T)
            layer_meta.append((has_bn, layer["act"], li == len(layers) - 1))
        stage_out.append((c, hw))
    return tuple(operands), tuple(layer_meta), tuple(stage_out)


def make_netg_forward(packed):
    operands, layer_meta, stage_out = packed
    (c_li, hw_li), (c_g, hw_g), (c_lo, hw_lo) = stage_out

    def forward(x_nchw):
        n, cin, h, w = x_nchw.shape
        x_flat = x_nchw.reshape(n, cin * h * w)         # channel-major flatten, no transpose
        out_shape = (
            jax.ShapeDtypeStruct((n, c_li * hw_li[0] * hw_li[1]), jnp.float32),  # latent_i
            jax.ShapeDtypeStruct((n, c_g * hw_g[0] * hw_g[1]), jnp.float32),     # gen image
            jax.ShapeDtypeStruct((n, c_lo * hw_lo[0] * hw_lo[1]), jnp.float32),  # latent_o
        )
        kern = functools.partial(_netg_kernel, layer_meta=layer_meta, n_outputs=3)
        lat_i_f, gen_f, lat_o_f = pl.pallas_call(
            kern,
            out_shape=out_shape,
            compiler_params=pltpu.CompilerParams(vmem_limit_bytes=32 * 1024 * 1024),
        )(x_flat, *operands)
        gen = gen_f.reshape(n, c_g, hw_g[0], hw_g[1])
        lat_i = lat_i_f.reshape(n, c_li, hw_li[0], hw_li[1])
        lat_o = lat_o_f.reshape(n, c_lo, hw_lo[0], hw_lo[1])
        return gen, lat_i, lat_o

    return forward


# ---------------------------------------------------------------------------
# Pure-JAX reference mirror (same bf16 rounding of MXU operands) for a sanity check.
# ---------------------------------------------------------------------------
def reference_forward(x_nchw, packed):
    operands, layer_meta, stage_out = packed
    it = iter(operands)
    n = x_nchw.shape[0]
    a = x_nchw.reshape(n, -1).astype(jnp.float32)
    outs = []
    for has_bn, act, emit in layer_meta:
        mat = next(it)
        y = jnp.dot(a.astype(jnp.bfloat16).astype(jnp.float32), mat.astype(jnp.float32))
        if has_bn:
            gamma = next(it); beta = next(it); pool = next(it); _ = next(it)
            c = pool.shape[1]
            f = y.shape[1]
            y3 = y.reshape(n, c, f // c)
            mean = jnp.mean(y3, axis=(0, 2), keepdims=True)
            var = jnp.maximum(jnp.mean(y3 * y3, axis=(0, 2), keepdims=True) - mean * mean, 0.0)
            scale = gamma.reshape(1, c, 1) * jax.lax.rsqrt(var + EPS)
            shift = beta.reshape(1, c, 1) - mean * scale
            y = (y3 * scale + shift).reshape(n, f)
        a = _apply_act(y, act)
        if emit:
            outs.append(a)
    (c_li, hw_li), (c_g, hw_g), (c_lo, hw_lo) = stage_out
    lat_i = outs[0].reshape(n, c_li, hw_li[0], hw_li[1])
    gen = outs[1].reshape(n, c_g, hw_g[0], hw_g[1])
    lat_o = outs[2].reshape(n, c_lo, hw_lo[0], hw_lo[1])
    return gen, lat_i, lat_o


# ---------------------------------------------------------------------------
# Parameter construction mirroring Encoder / Decoder __init__ (bias=False everywhere).
# ---------------------------------------------------------------------------
def _ones(c):
    return jnp.ones((c,), jnp.float32)


def _zeros(c):
    return jnp.zeros((c,), jnp.float32)


def init_encoder_params(key, isize, nz, nc, ndf, n_extra=0):
    assert isize % 16 == 0
    keys = iter(jax.random.split(key, 64))

    def cw(oc, ic, k):
        return jax.random.normal(next(keys), (oc, ic, k, k), jnp.float32) * 0.05

    layers = [dict(kind="conv", w=cw(ndf, nc, 4), stride=2, pad=1, bn=None, act="lrelu")]
    csize, cndf = isize // 2, ndf
    for _ in range(n_extra):
        layers.append(dict(kind="conv", w=cw(cndf, cndf, 3), stride=1, pad=1,
                           bn=(_ones(cndf), _zeros(cndf)), act="lrelu"))
    while csize > 4:
        layers.append(dict(kind="conv", w=cw(cndf * 2, cndf, 4), stride=2, pad=1,
                           bn=(_ones(cndf * 2), _zeros(cndf * 2)), act="lrelu"))
        cndf *= 2
        csize //= 2
    layers.append(dict(kind="conv", w=cw(nz, cndf, 4), stride=1, pad=0, bn=None, act="none"))
    return layers


def init_decoder_params(key, isize, nz, nc, ngf, n_extra=0):
    assert isize % 16 == 0
    keys = iter(jax.random.split(key, 64))

    def ctw(ic, oc, k):   # ConvTranspose2d weight layout: (IC, OC, k, k)
        return jax.random.normal(next(keys), (ic, oc, k, k), jnp.float32) * 0.05

    def cw(oc, ic, k):
        return jax.random.normal(next(keys), (oc, ic, k, k), jnp.float32) * 0.05

    cngf, tisize = ngf // 2, 4
    while tisize != isize:
        cngf *= 2
        tisize *= 2
    layers = [dict(kind="convt", w=ctw(nz, cngf, 4), stride=1, pad=0,
                   bn=(_ones(cngf), _zeros(cngf)), act="relu")]
    csize = 4
    while csize < isize // 2:
        layers.append(dict(kind="convt", w=ctw(cngf, cngf // 2, 4), stride=2, pad=1,
                           bn=(_ones(cngf // 2), _zeros(cngf // 2)), act="relu"))
        cngf //= 2
        csize *= 2
    for _ in range(n_extra):
        layers.append(dict(kind="conv", w=cw(cngf, cngf, 3), stride=1, pad=1,
                           bn=(_ones(cngf), _zeros(cngf)), act="relu"))
    layers.append(dict(kind="convt", w=ctw(cngf, nc, 4), stride=2, pad=1, bn=None, act="tanh"))
    return layers


# ---------------------------------------------------------------------------
if __name__ == "__main__":
    # opt: isize=16, nz=32, nc=4, ngf=8, ngpu=1, extralayers=0  (small reference config)
    isize, nz, nc, ngf, n_extra = 16, 32, 4, 8, 0
    batch = 2

    key = jax.random.PRNGKey(0)
    kx, k1, k2, k3 = jax.random.split(key, 4)
    x = jax.random.normal(kx, (batch, nc, isize, isize), jnp.float32)

    enc1 = init_encoder_params(k1, isize, nz, nc, ngf, n_extra)
    dec = init_decoder_params(k2, isize, nz, nc, ngf, n_extra)
    enc2 = init_encoder_params(k3, isize, nz, nc, ngf, n_extra)

    packed = pack_netg(enc1, dec, enc2, nc=nc, nz=nz, isize=isize)
    fwd = jax.jit(make_netg_forward(packed))

    gen_imag, latent_i, latent_o = fwd(x)
    jax.block_until_ready((gen_imag, latent_i, latent_o))

    assert gen_imag.shape == (batch, nc, isize, isize)
    assert latent_i.shape == (batch, nz, 1, 1)
    assert latent_o.shape == (batch, nz, 1, 1)

    # Numerical sanity check vs. a pure-JAX mirror (same bf16 rounding of MXU operands;
    # training-mode BatchNorm batch statistics in both paths).
    ref_gen, ref_lat_i, ref_lat_o = reference_forward(x, packed)
    for got, want in ((gen_imag, ref_gen), (latent_i, ref_lat_i), (latent_o, ref_lat_o)):
        assert bool(jnp.isfinite(got).all())
        assert bool(jnp.allclose(got, want, rtol=3e-2, atol=3e-2)), \
            float(jnp.max(jnp.abs(got - want)))

    print("KERNEL_OK")
</pallas_src>

<mosaic_0001>
module attributes {stable_mosaic.version = 11 : i64} {
  func.func @_netg_kernel(%arg0: memref<2x1024xf32, #tpu.memory_space<vmem>>, %arg1: memref<1024x512xbf16, #tpu.memory_space<vmem>>, %arg2: memref<512x256xbf16, #tpu.memory_space<vmem>>, %arg3: memref<1x16xf32, #tpu.memory_space<vmem>>, %arg4: memref<1x16xf32, #tpu.memory_space<vmem>>, %arg5: memref<256x16xf32, #tpu.memory_space<vmem>>, %arg6: memref<16x256xf32, #tpu.memory_space<vmem>>, %arg7: memref<256x32xbf16, #tpu.memory_space<vmem>>, %arg8: memref<32x256xbf16, #tpu.memory_space<vmem>>, %arg9: memref<1x16xf32, #tpu.memory_space<vmem>>, %arg10: memref<1x16xf32, #tpu.memory_space<vmem>>, %arg11: memref<256x16xf32, #tpu.memory_space<vmem>>, %arg12: memref<16x256xf32, #tpu.memory_space<vmem>>, %arg13: memref<256x512xbf16, #tpu.memory_space<vmem>>, %arg14: memref<1x8xf32, #tpu.memory_space<vmem>>, %arg15: memref<1x8xf32, #tpu.memory_space<vmem>>, %arg16: memref<512x8xf32, #tpu.memory_space<vmem>>, %arg17: memref<8x512xf32, #tpu.memory_space<vmem>>, %arg18: memref<512x1024xbf16, #tpu.memory_space<vmem>>, %arg19: memref<1024x512xbf16, #tpu.memory_space<vmem>>, %arg20: memref<512x256xbf16, #tpu.memory_space<vmem>>, %arg21: memref<1x16xf32, #tpu.memory_space<vmem>>, %arg22: memref<1x16xf32, #tpu.memory_space<vmem>>, %arg23: memref<256x16xf32, #tpu.memory_space<vmem>>, %arg24: memref<16x256xf32, #tpu.memory_space<vmem>>, %arg25: memref<256x32xbf16, #tpu.memory_space<vmem>>, %arg26: memref<2x32xf32, #tpu.memory_space<vmem>>, %arg27: memref<2x1024xf32, #tpu.memory_space<vmem>>, %arg28: memref<2x32xf32, #tpu.memory_space<vmem>>) attributes {dimension_semantics = [], scalar_prefetch = 0 : i64, scratch_operands = 0 : i64, tpu.core_type = #tpu.core_type<tc>} {
    %c0 = arith.constant 0 : index
    %c0_0 = arith.constant 0 : index
    %0 = vector.load %arg0[%c0, %c0_0] : memref<2x1024xf32, #tpu.memory_space<vmem>>, vector<2x1024xf32>
    %c0_1 = arith.constant 0 : index
    %c0_2 = arith.constant 0 : index
    %1 = vector.load %arg1[%c0_1, %c0_2] : memref<1024x512xbf16, #tpu.memory_space<vmem>>, vector<1024x512xbf16>
    %2 = arith.truncf %0 : vector<2x1024xf32> to vector<2x1024xbf16>
    %cst = arith.constant dense<0.000000e+00> : vector<2x512xf32>
    %3 = tpu.matmul %2, %1, %cst {dimension_numbers = #tpu.dot_dimension_numbers<[1], [0], [0], [1], [0, 0, 1, 1], [], []>} : vector<2x1024xbf16>, vector<1024x512xbf16>, vector<2x512xf32> -> vector<2x512xf32>
    %cst_3 = arith.constant 0.000000e+00 : f32
    %4 = vector.broadcast %cst_3 : f32 to vector<2x512xf32>
    %5 = arith.cmpf oge, %3, %4 : vector<2x512xf32>
    %cst_4 = arith.constant 2.000000e-01 : f32
    %6 = vector.broadcast %cst_4 : f32 to vector<2x512xf32>
    %7 = arith.mulf %6, %3 : vector<2x512xf32>
    %8 = arith.select %5, %3, %7 : vector<2x512xi1>, vector<2x512xf32>
    %c0_5 = arith.constant 0 : index
    %c0_6 = arith.constant 0 : index
    %9 = vector.load %arg2[%c0_5, %c0_6] : memref<512x256xbf16, #tpu.memory_space<vmem>>, vector<512x256xbf16>
    %10 = arith.truncf %8 : vector<2x512xf32> to vector<2x512xbf16>
    %cst_7 = arith.constant dense<0.000000e+00> : vector<2x256xf32>
    %11 = tpu.matmul %10, %9, %cst_7 {dimension_numbers = #tpu.dot_dimension_numbers<[1], [0], [0], [1], [0, 0, 1, 1], [], []>} : vector<2x512xbf16>, vector<512x256xbf16>, vector<2x256xf32> -> vector<2x256xf32>
    %c0_8 = arith.constant 0 : index
    %c0_9 = arith.constant 0 : index
    %12 = vector.load %arg3[%c0_8, %c0_9] : memref<1x16xf32, #tpu.memory_space<vmem>>, vector<1x16xf32>
    %c0_10 = arith.constant 0 : index
    %c0_11 = arith.constant 0 : index
    %13 = vector.load %arg4[%c0_10, %c0_11] : memref<1x16xf32, #tpu.memory_space<vmem>>, vector<1x16xf32>
    %c0_12 = arith.constant 0 : index
    %c0_13 = arith.constant 0 : index
    %14 = vector.load %arg5[%c0_12, %c0_13] : memref<256x16xf32, #tpu.memory_space<vmem>>, vector<256x16xf32>
    %c0_14 = arith.constant 0 : index
    %c0_15 = arith.constant 0 : index
    %15 = vector.load %arg6[%c0_14, %c0_15] : memref<16x256xf32, #tpu.memory_space<vmem>>, vector<16x256xf32>
    %cst_16 = arith.constant dense<0.000000e+00> : vector<2x16xf32>
    %16 = tpu.matmul %11, %14, %cst_16 {dimension_numbers = #tpu.dot_dimension_numbers<[1], [0], [0], [1], [0, 0, 1, 1], [], []>} : vector<2x256xf32>, vector<256x16xf32>, vector<2x16xf32> -> vector<2x16xf32>
    %cst_17 = arith.constant dense<0.000000e+00> : vector<16xf32>
    %17 = vector.multi_reduction <add>, %16, %cst_17 [0] : vector<2x16xf32> to vector<16xf32>
    %18 = vector.shape_cast %17 : vector<16xf32> to vector<1x16xf32>
    %19 = arith.mulf %11, %11 : vector<2x256xf32>
    %cst_18 = arith.constant dense<0.000000e+00> : vector<2x16xf32>
    %20 = tpu.matmul %19, %14, %cst_18 {dimension_numbers = #tpu.dot_dimension_numbers<[1], [0], [0], [1], [0, 0, 1, 1], [], []>} : vector<2x256xf32>, vector<256x16xf32>, vector<2x16xf32> -> vector<2x16xf32>
    %cst_19 = arith.constant dense<0.000000e+00> : vector<16xf32>
    %21 = vector.multi_reduction <add>, %20, %cst_19 [0] : vector<2x16xf32> to vector<16xf32>
    %22 = vector.shape_cast %21 : vector<16xf32> to vector<1x16xf32>
    %cst_20 = arith.constant 3.200000e+01 : f32
    %23 = vector.broadcast %cst_20 : f32 to vector<1x16xf32>
    %24 = arith.divf %18, %23 : vector<1x16xf32>
    %cst_21 = arith.constant 3.200000e+01 : f32
    %25 = vector.broadcast %cst_21 : f32 to vector<1x16xf32>
    %26 = arith.divf %22, %25 : vector<1x16xf32>
    %27 = arith.mulf %24, %24 : vector<1x16xf32>
    %28 = arith.subf %26, %27 : vector<1x16xf32>
    %cst_22 = arith.constant 0.000000e+00 : f32
    %29 = vector.broadcast %cst_22 : f32 to vector<1x16xf32>
    %30 = arith.maximumf %28, %29 : vector<1x16xf32>
    %cst_23 = arith.constant 9.99999974E-6 : f32
    %31 = vector.broadcast %cst_23 : f32 to vector<1x16xf32>
    %32 = arith.addf %30, %31 : vector<1x16xf32>
    %33 = math.rsqrt %32 : vector<1x16xf32>
    %34 = arith.mulf %12, %33 : vector<1x16xf32>
    %35 = arith.mulf %24, %34 : vector<1x16xf32>
    %36 = arith.subf %13, %35 : vector<1x16xf32>
    %cst_24 = arith.constant dense<0.000000e+00> : vector<1x256xf32>
    %37 = tpu.matmul %34, %15, %cst_24 {dimension_numbers = #tpu.dot_dimension_numbers<[1], [0], [0], [1], [0, 0, 1, 1], [], []>} : vector<1x16xf32>, vector<16x256xf32>, vector<1x256xf32> -> vector<1x256xf32>
    %cst_25 = arith.constant dense<0.000000e+00> : vector<1x256xf32>
    %38 = tpu.matmul %36, %15, %cst_25 {dimension_numbers = #tpu.dot_dimension_numbers<[1], [0], [0], [1], [0, 0, 1, 1], [], []>} : vector<1x16xf32>, vector<16x256xf32>, vector<1x256xf32> -> vector<1x256xf32>
    %39 = vector.broadcast %37 : vector<1x256xf32> to vector<2x256xf32>
    %40 = arith.mulf %11, %39 : vector<2x256xf32>
    %41 = vector.broadcast %38 : vector<1x256xf32> to vector<2x256xf32>
    %42 = arith.addf %40, %41 : vector<2x256xf32>
    %cst_26 = arith.constant 0.000000e+00 : f32
    %43 = vector.broadcast %cst_26 : f32 to vector<2x256xf32>
    %44 = arith.cmpf oge, %42, %43 : vector<2x256xf32>
    %cst_27 = arith.constant 2.000000e-01 : f32
    %45 = vector.broadcast %cst_27 : f32 to vector<2x256xf32>
    %46 = arith.mulf %45, %42 : vector<2x256xf32>
    %47 = arith.select %44, %42, %46 : vector<2x256xi1>, vector<2x256xf32>
    %c0_28 = arith.constant 0 : index
    %c0_29 = arith.constant 0 : index
    %48 = vector.load %arg7[%c0_28, %c0_29] : memref<256x32xbf16, #tpu.memory_space<vmem>>, vector<256x32xbf16>
    %49 = arith.truncf %47 : vector<2x256xf32> to vector<2x256xbf16>
    %cst_30 = arith.constant dense<0.000000e+00> : vector<2x32xf32>
    %50 = tpu.matmul %49, %48, %cst_30 {dimension_numbers = #tpu.dot_dimension_numbers<[1], [0], [0], [1], [0, 0, 1, 1], [], []>} : vector<2x256xbf16>, vector<256x32xbf16>, vector<2x32xf32> -> vector<2x32xf32>
    %c0_31 = arith.constant 0 : index
    %c0_32 = arith.constant 0 : index
    %51 = vector.load %arg26[%c0_31, %c0_32] : memref<2x32xf32, #tpu.memory_space<vmem>>, vector<2x32xf32>
    tpu.vector_store %arg26[%c0_31, %c0_32], %50 {strides = array<i32>} : memref<2x32xf32, #tpu.memory_space<vmem>>, vector<2x32xf32>,
    %c0_33 = arith.constant 0 : index
    %c0_34 = arith.constant 0 : index
    %52 = vector.load %arg8[%c0_33, %c0_34] : memref<32x256xbf16, #tpu.memory_space<vmem>>, vector<32x256xbf16>
    %53 = arith.truncf %50 : vector<2x32xf32> to vector<2x32xbf16>
    %cst_35 = arith.constant dense<0.000000e+00> : vector<2x256xf32>
    %54 = tpu.matmul %53, %52, %cst_35 {dimension_numbers = #tpu.dot_dimension_numbers<[1], [0], [0], [1], [0, 0, 1, 1], [], []>} : vector<2x32xbf16>, vector<32x256xbf16>, vector<2x256xf32> -> vector<2x256xf32>
    %c0_36 = arith.constant 0 : index
    %c0_37 = arith.constant 0 : index
    %55 = vector.load %arg9[%c0_36, %c0_37] : memref<1x16xf32, #tpu.memory_space<vmem>>, vector<1x16xf32>
    %c0_38 = arith.constant 0 : index
    %c0_39 = arith.constant 0 : index
    %56 = vector.load %arg10[%c0_38, %c0_39] : memref<1x16xf32, #tpu.memory_space<vmem>>, vector<1x16xf32>
    %c0_40 = arith.constant 0 : index
    %c0_41 = arith.constant 0 : index
    %57 = vector.load %arg11[%c0_40, %c0_41] : memref<256x16xf32, #tpu.memory_space<vmem>>, vector<256x16xf32>
    %c0_42 = arith.constant 0 : index
    %c0_43 = arith.constant 0 : index
    %58 = vector.load %arg12[%c0_42, %c0_43] : memref<16x256xf32, #tpu.memory_space<vmem>>, vector<16x256xf32>
    %cst_44 = arith.constant dense<0.000000e+00> : vector<2x16xf32>
    %59 = tpu.matmul %54, %57, %cst_44 {dimension_numbers = #tpu.dot_dimension_numbers<[1], [0], [0], [1], [0, 0, 1, 1], [], []>} : vector<2x256xf32>, vector<256x16xf32>, vector<2x16xf32> -> vector<2x16xf32>
    %cst_45 = arith.constant dense<0.000000e+00> : vector<16xf32>
    %60 = vector.multi_reduction <add>, %59, %cst_45 [0] : vector<2x16xf32> to vector<16xf32>
    %61 = vector.shape_cast %60 : vector<16xf32> to vector<1x16xf32>
    %62 = arith.mulf %54, %54 : vector<2x256xf32>
    %cst_46 = arith.constant dense<0.000000e+00> : vector<2x16xf32>
    %63 = tpu.matmul %62, %57, %cst_46 {dimension_numbers = #tpu.dot_dimension_numbers<[1], [0], [0], [1], [0, 0, 1, 1], [], []>} : vector<2x256xf32>, vector<256x16xf32>, vector<2x16xf32> -> vector<2x16xf32>
    %cst_47 = arith.constant dense<0.000000e+00> : vector<16xf32>
    %64 = vector.multi_reduction <add>, %63, %cst_47 [0] : vector<2x16xf32> to vector<16xf32>
    %65 = vector.shape_cast %64 : vector<16xf32> to vector<1x16xf32>
    %cst_48 = arith.constant 3.200000e+01 : f32
    %66 = vector.broadcast %cst_48 : f32 to vector<1x16xf32>
    %67 = arith.divf %61, %66 : vector<1x16xf32>
    %cst_49 = arith.constant 3.200000e+01 : f32
    %68 = vector.broadcast %cst_49 : f32 to vector<1x16xf32>
    %69 = arith.divf %65, %68 : vector<1x16xf32>
    %70 = arith.mulf %67, %67 : vector<1x16xf32>
    %71 = arith.subf %69, %70 : vector<1x16xf32>
    %cst_50 = arith.constant 0.000000e+00 : f32
    %72 = vector.broadcast %cst_50 : f32 to vector<1x16xf32>
    %73 = arith.maximumf %71, %72 : vector<1x16xf32>
    %cst_51 = arith.constant 9.99999974E-6 : f32
    %74 = vector.broadcast %cst_51 : f32 to vector<1x16xf32>
    %75 = arith.addf %73, %74 : vector<1x16xf32>
    %76 = math.rsqrt %75 : vector<1x16xf32>
    %77 = arith.mulf %55, %76 : vector<1x16xf32>
    %78 = arith.mulf %67, %77 : vector<1x16xf32>
    %79 = arith.subf %56, %78 : vector<1x16xf32>
    %cst_52 = arith.constant dense<0.000000e+00> : vector<1x256xf32>
    %80 = tpu.matmul %77, %58, %cst_52 {dimension_numbers = #tpu.dot_dimension_numbers<[1], [0], [0], [1], [0, 0, 1, 1], [], []>} : vector<1x16xf32>, vector<16x256xf32>, vector<1x256xf32> -> vector<1x256xf32>
    %cst_53 = arith.constant dense<0.000000e+00> : vector<1x256xf32>
    %81 = tpu.matmul %79, %58, %cst_53 {dimension_numbers = #tpu.dot_dimension_numbers<[1], [0], [0], [1], [0, 0, 1, 1], [], []>} : vector<1x16xf32>, vector<16x256xf32>, vector<1x256xf32> -> vector<1x256xf32>
    %82 = vector.broadcast %80 : vector<1x256xf32> to vector<2x256xf32>
    %83 = arith.mulf %54, %82 : vector<2x256xf32>
    %84 = vector.broadcast %81 : vector<1x256xf32> to vector<2x256xf32>
    %85 = arith.addf %83, %84 : vector<2x256xf32>
    %cst_54 = arith.constant 0.000000e+00 : f32
    %86 = vector.broadcast %cst_54 : f32 to vector<2x256xf32>
    %87 = arith.maximumf %85, %86 : vector<2x256xf32>
    %c0_55 = arith.constant 0 : index
    %c0_56 = arith.constant 0 : index
    %88 = vector.load %arg13[%c0_55, %c0_56] : memref<256x512xbf16, #tpu.memory_space<vmem>>, vector<256x512xbf16>
    %89 = arith.truncf %87 : vector<2x256xf32> to vector<2x256xbf16>
    %cst_57 = arith.constant dense<0.000000e+00> : vector<2x512xf32>
    %90 = tpu.matmul %89, %88, %cst_57 {dimension_numbers = #tpu.dot_dimension_numbers<[1], [0], [0], [1], [0, 0, 1, 1], [], []>} : vector<2x256xbf16>, vector<256x512xbf16>, vector<2x512xf32> -> vector<2x512xf32>
    %c0_58 = arith.constant 0 : index
    %c0_59 = arith.constant 0 : index
    %91 = vector.load %arg14[%c0_58, %c0_59] : memref<1x8xf32, #tpu.memory_space<vmem>>, vector<1x8xf32>
    %c0_60 = arith.constant 0 : index
    %c0_61 = arith.constant 0 : index
    %92 = vector.load %arg15[%c0_60, %c0_61] : memref<1x8xf32, #tpu.memory_space<vmem>>, vector<1x8xf32>
    %c0_62 = arith.constant 0 : index
    %c0_63 = arith.constant 0 : index
    %93 = vector.load %arg16[%c0_62, %c0_63] : memref<512x8xf32, #tpu.memory_space<vmem>>, vector<512x8xf32>
    %c0_64 = arith.constant 0 : index
    %c0_65 = arith.constant 0 : index
    %94 = vector.load %arg17[%c0_64, %c0_65] : memref<8x512xf32, #tpu.memory_space<vmem>>, vector<8x512xf32>
    %cst_66 = arith.constant dense<0.000000e+00> : vector<2x8xf32>
    %95 = tpu.matmul %90, %93, %cst_66 {dimension_numbers = #tpu.dot_dimension_numbers<[1], [0], [0], [1], [0, 0, 1, 1], [], []>} : vector<2x512xf32>, vector<512x8xf32>, vector<2x8xf32> -> vector<2x8xf32>
    %cst_67 = arith.constant dense<0.000000e+00> : vector<8xf32>
    %96 = vector.multi_reduction <add>, %95, %cst_67 [0] : vector<2x8xf32> to vector<8xf32>
    %97 = vector.shape_cast %96 : vector<8xf32> to vector<1x8xf32>
    %98 = arith.mulf %90, %90 : vector<2x512xf32>
    %cst_68 = arith.constant dense<0.000000e+00> : vector<2x8xf32>
    %99 = tpu.matmul %98, %93, %cst_68 {dimension_numbers = #tpu.dot_dimension_numbers<[1], [0], [0], [1], [0, 0, 1, 1], [], []>} : vector<2x512xf32>, vector<512x8xf32>, vector<2x8xf32> -> vector<2x8xf32>
    %cst_69 = arith.constant dense<0.000000e+00> : vector<8xf32>
    %100 = vector.multi_reduction <add>, %99, %cst_69 [0] : vector<2x8xf32> to vector<8xf32>
    %101 = vector.shape_cast %100 : vector<8xf32> to vector<1x8xf32>
    %cst_70 = arith.constant 1.280000e+02 : f32
    %102 = vector.broadcast %cst_70 : f32 to vector<1x8xf32>
    %103 = arith.divf %97, %102 : vector<1x8xf32>
    %cst_71 = arith.constant 1.280000e+02 : f32
    %104 = vector.broadcast %cst_71 : f32 to vector<1x8xf32>
    %105 = arith.divf %101, %104 : vector<1x8xf32>
    %106 = arith.mulf %103, %103 : vector<1x8xf32>
    %107 = arith.subf %105, %106 : vector<1x8xf32>
    %cst_72 = arith.constant 0.000000e+00 : f32
    %108 = vector.broadcast %cst_72 : f32 to vector<1x8xf32>
    %109 = arith.maximumf %107, %108 : vector<1x8xf32>
    %cst_73 = arith.constant 9.99999974E-6 : f32
    %110 = vector.broadcast %cst_73 : f32 to vector<1x8xf32>
    %111 = arith.addf %109, %110 : vector<1x8xf32>
    %112 = math.rsqrt %111 : vector<1x8xf32>
    %113 = arith.mulf %91, %112 : vector<1x8xf32>
    %114 = arith.mulf %103, %113 : vector<1x8xf32>
    %115 = arith.subf %92, %114 : vector<1x8xf32>
    %cst_74 = arith.constant dense<0.000000e+00> : vector<1x512xf32>
    %116 = tpu.matmul %113, %94, %cst_74 {dimension_numbers = #tpu.dot_dimension_numbers<[1], [0], [0], [1], [0, 0, 1, 1], [], []>} : vector<1x8xf32>, vector<8x512xf32>, vector<1x512xf32> -> vector<1x512xf32>
    %cst_75 = arith.constant dense<0.000000e+00> : vector<1x512xf32>
    %117 = tpu.matmul %115, %94, %cst_75 {dimension_numbers = #tpu.dot_dimension_numbers<[1], [0], [0], [1], [0, 0, 1, 1], [], []>} : vector<1x8xf32>, vector<8x512xf32>, vector<1x512xf32> -> vector<1x512xf32>
    %118 = vector.broadcast %116 : vector<1x512xf32> to vector<2x512xf32>
    %119 = arith.mulf %90, %118 : vector<2x512xf32>
    %120 = vector.broadcast %117 : vector<1x512xf32> to vector<2x512xf32>
    %121 = arith.addf %119, %120 : vector<2x512xf32>
    %cst_76 = arith.constant 0.000000e+00 : f32
    %122 = vector.broadcast %cst_76 : f32 to vector<2x512xf32>
    %123 = arith.maximumf %121, %122 : vector<2x512xf32>
    %c0_77 = arith.constant 0 : index
    %c0_78 = arith.constant 0 : index
    %124 = vector.load %arg18[%c0_77, %c0_78] : memref<512x1024xbf16, #tpu.memory_space<vmem>>, vector<512x1024xbf16>
    %125 = arith.truncf %123 : vector<2x512xf32> to vector<2x512xbf16>
    %cst_79 = arith.constant dense<0.000000e+00> : vector<2x1024xf32>
    %126 = tpu.matmul %125, %124, %cst_79 {dimension_numbers = #tpu.dot_dimension_numbers<[1], [0], [0], [1], [0, 0, 1, 1], [], []>} : vector<2x512xbf16>, vector<512x1024xbf16>, vector<2x1024xf32> -> vector<2x1024xf32>
    %127 = math.tanh %126 : vector<2x1024xf32>
    %c0_80 = arith.constant 0 : index
    %c0_81 = arith.constant 0 : index
    %128 = vector.load %arg27[%c0_80, %c0_81] : memref<2x1024xf32, #tpu.memory_space<vmem>>, vector<2x1024xf32>
    tpu.vector_store %arg27[%c0_80, %c0_81], %127 {strides = array<i32>} : memref<2x1024xf32, #tpu.memory_space<vmem>>, vector<2x1024xf32>,
    %c0_82 = arith.constant 0 : index
    %c0_83 = arith.constant 0 : index
    %129 = vector.load %arg19[%c0_82, %c0_83] : memref<1024x512xbf16, #tpu.memory_space<vmem>>, vector<1024x512xbf16>
    %130 = arith.truncf %127 : vector<2x1024xf32> to vector<2x1024xbf16>
    %cst_84 = arith.constant dense<0.000000e+00> : vector<2x512xf32>
    %131 = tpu.matmul %130, %129, %cst_84 {dimension_numbers = #tpu.dot_dimension_numbers<[1], [0], [0], [1], [0, 0, 1, 1], [], []>} : vector<2x1024xbf16>, vector<1024x512xbf16>, vector<2x512xf32> -> vector<2x512xf32>
    %cst_85 = arith.constant 0.000000e+00 : f32
    %132 = vector.broadcast %cst_85 : f32 to vector<2x512xf32>
    %133 = arith.cmpf oge, %131, %132 : vector<2x512xf32>
    %cst_86 = arith.constant 2.000000e-01 : f32
    %134 = vector.broadcast %cst_86 : f32 to vector<2x512xf32>
    %135 = arith.mulf %134, %131 : vector<2x512xf32>
    %136 = arith.select %133, %131, %135 : vector<2x512xi1>, vector<2x512xf32>
    %c0_87 = arith.constant 0 : index
    %c0_88 = arith.constant 0 : index
    %137 = vector.load %arg20[%c0_87, %c0_88] : memref<512x256xbf16, #tpu.memory_space<vmem>>, vector<512x256xbf16>
    %138 = arith.truncf %136 : vector<2x512xf32> to vector<2x512xbf16>
    %cst_89 = arith.constant dense<0.000000e+00> : vector<2x256xf32>
    %139 = tpu.matmul %138, %137, %cst_89 {dimension_numbers = #tpu.dot_dimension_numbers<[1], [0], [0], [1], [0, 0, 1, 1], [], []>} : vector<2x512xbf16>, vector<512x256xbf16>, vector<2x256xf32> -> vector<2x256xf32>
    %c0_90 = arith.constant 0 : index
    %c0_91 = arith.constant 0 : index
    %140 = vector.load %arg21[%c0_90, %c0_91] : memref<1x16xf32, #tpu.memory_space<vmem>>, vector<1x16xf32>
    %c0_92 = arith.constant 0 : index
    %c0_93 = arith.constant 0 : index
    %141 = vector.load %arg22[%c0_92, %c0_93] : memref<1x16xf32, #tpu.memory_space<vmem>>, vector<1x16xf32>
    %c0_94 = arith.constant 0 : index
    %c0_95 = arith.constant 0 : index
    %142 = vector.load %arg23[%c0_94, %c0_95] : memref<256x16xf32, #tpu.memory_space<vmem>>, vector<256x16xf32>
    %c0_96 = arith.constant 0 : index
    %c0_97 = arith.constant 0 : index
    %143 = vector.load %arg24[%c0_96, %c0_97] : memref<16x256xf32, #tpu.memory_space<vmem>>, vector<16x256xf32>
    %cst_98 = arith.constant dense<0.000000e+00> : vector<2x16xf32>
    %144 = tpu.matmul %139, %142, %cst_98 {dimension_numbers = #tpu.dot_dimension_numbers<[1], [0], [0], [1], [0, 0, 1, 1], [], []>} : vector<2x256xf32>, vector<256x16xf32>, vector<2x16xf32> -> vector<2x16xf32>
    %cst_99 = arith.constant dense<0.000000e+00> : vector<16xf32>
    %145 = vector.multi_reduction <add>, %144, %cst_99 [0] : vector<2x16xf32> to vector<16xf32>
    %146 = vector.shape_cast %145 : vector<16xf32> to vector<1x16xf32>
    %147 = arith.mulf %139, %139 : vector<2x256xf32>
    %cst_100 = arith.constant dense<0.000000e+00> : vector<2x16xf32>
    %148 = tpu.matmul %147, %142, %cst_100 {dimension_numbers = #tpu.dot_dimension_numbers<[1], [0], [0], [1], [0, 0, 1, 1], [], []>} : vector<2x256xf32>, vector<256x16xf32>, vector<2x16xf32> -> vector<2x16xf32>
    %cst_101 = arith.constant dense<0.000000e+00> : vector<16xf32>
    %149 = vector.multi_reduction <add>, %148, %cst_101 [0] : vector<2x16xf32> to vector<16xf32>
    %150 = vector.shape_cast %149 : vector<16xf32> to vector<1x16xf32>
    %cst_102 = arith.constant 3.200000e+01 : f32
    %151 = vector.broadcast %cst_102 : f32 to vector<1x16xf32>
    %152 = arith.divf %146, %151 : vector<1x16xf32>
    %cst_103 = arith.constant 3.200000e+01 : f32
    %153 = vector.broadcast %cst_103 : f32 to vector<1x16xf32>
    %154 = arith.divf %150, %153 : vector<1x16xf32>
    %155 = arith.mulf %152, %152 : vector<1x16xf32>
    %156 = arith.subf %154, %155 : vector<1x16xf32>
    %cst_104 = arith.constant 0.000000e+00 : f32
    %157 = vector.broadcast %cst_104 : f32 to vector<1x16xf32>
    %158 = arith.maximumf %156, %157 : vector<1x16xf32>
    %cst_105 = arith.constant 9.99999974E-6 : f32
    %159 = vector.broadcast %cst_105 : f32 to vector<1x16xf32>
    %160 = arith.addf %158, %159 : vector<1x16xf32>
    %161 = math.rsqrt %160 : vector<1x16xf32>
    %162 = arith.mulf %140, %161 : vector<1x16xf32>
    %163 = arith.mulf %152, %162 : vector<1x16xf32>
    %164 = arith.subf %141, %163 : vector<1x16xf32>
    %cst_106 = arith.constant dense<0.000000e+00> : vector<1x256xf32>
    %165 = tpu.matmul %162, %143, %cst_106 {dimension_numbers = #tpu.dot_dimension_numbers<[1], [0], [0], [1], [0, 0, 1, 1], [], []>} : vector<1x16xf32>, vector<16x256xf32>, vector<1x256xf32> -> vector<1x256xf32>
    %cst_107 = arith.constant dense<0.000000e+00> : vector<1x256xf32>
    %166 = tpu.matmul %164, %143, %cst_107 {dimension_numbers = #tpu.dot_dimension_numbers<[1], [0], [0], [1], [0, 0, 1, 1], [], []>} : vector<1x16xf32>, vector<16x256xf32>, vector<1x256xf32> -> vector<1x256xf32>
    %167 = vector.broadcast %165 : vector<1x256xf32> to vector<2x256xf32>
    %168 = arith.mulf %139, %167 : vector<2x256xf32>
    %169 = vector.broadcast %166 : vector<1x256xf32> to vector<2x256xf32>
    %170 = arith.addf %168, %169 : vector<2x256xf32>
    %cst_108 = arith.constant 0.000000e+00 : f32
    %171 = vector.broadcast %cst_108 : f32 to vector<2x256xf32>
    %172 = arith.cmpf oge, %170, %171 : vector<2x256xf32>
    %cst_109 = arith.constant 2.000000e-01 : f32
    %173 = vector.broadcast %cst_109 : f32 to vector<2x256xf32>
    %174 = arith.mulf %173, %170 : vector<2x256xf32>
    %175 = arith.select %172, %170, %174 : vector<2x256xi1>, vector<2x256xf32>
    %c0_110 = arith.constant 0 : index
    %c0_111 = arith.constant 0 : index
    %176 = vector.load %arg25[%c0_110, %c0_111] : memref<256x32xbf16, #tpu.memory_space<vmem>>, vector<256x32xbf16>
    %177 = arith.truncf %175 : vector<2x256xf32> to vector<2x256xbf16>
    %cst_112 = arith.constant dense<0.000000e+00> : vector<2x32xf32>
    %178 = tpu.matmul %177, %176, %cst_112 {dimension_numbers = #tpu.dot_dimension_numbers<[1], [0], [0], [1], [0, 0, 1, 1], [], []>} : vector<2x256xbf16>, vector<256x32xbf16>, vector<2x32xf32> -> vector<2x32xf32>
    %c0_113 = arith.constant 0 : index
    %c0_114 = arith.constant 0 : index
    %179 = vector.load %arg28[%c0_113, %c0_114] : memref<2x32xf32, #tpu.memory_space<vmem>>, vector<2x32xf32>
    tpu.vector_store %arg28[%c0_113, %c0_114], %178 {strides = array<i32>} : memref<2x32xf32, #tpu.memory_space<vmem>>, vector<2x32xf32>,
    return
  }
}

</mosaic_0001>

<bundles_post_ra>
// kernel: forward.1
= control target key start
LH: loop header
LB: loop body
LE: loop exit
PB: predicated region body
PF: predicated region fallthrough
CT: control target
= control target key end

     0   :  { %s16680_s0 = inlined_call_operand.vmem [shape: f32[2,1024], index: 0, kind: input, shape index: {}]   ;;  %s16681_s1 = inlined_call_operand.vmem [shape: bf16[1024,512], index: 1, kind: input, shape index: {}]   ;;  %s16682_s2 = inlined_call_operand.vmem [shape: bf16[512,256], index: 2, kind: input, shape index: {}]   ;;  %s16683_s3 = inlined_call_operand.vmem [shape: f32[1,16], index: 3, kind: input, shape index: {}, may-alias: {3,9,21}]   ;;  %s16684_s4 = inlined_call_operand.vmem [shape: f32[1,16], index: 4, kind: input, shape index: {}, may-alias: {4,10,22}]   ;;  %s16685_s5 = inlined_call_operand.vmem [shape: f32[256,16], index: 5, kind: input, shape index: {}, may-alias: {5,11,23}]   ;;  %s16686_s6 = inlined_call_operand.vmem [shape: f32[16,256], index: 6, kind: input, shape index: {}, may-alias: {6,12,24}]   ;;  %s16687_s7 = inlined_call_operand.vmem [shape: bf16[256,32], index: 7, kind: input, shape index: {}]   ;;  %s16688_s8 = inlined_call_operand.vmem [shape: bf16[32,256], index: 8, kind: input, shape index: {}]   ;;  %s16689_s9 = inlined_call_operand.vmem [shape: f32[1,16], index: 9, kind: input, shape index: {}, may-alias: {3,9,21}]   ;;  %s16690_s10 = inlined_call_operand.vmem [shape: f32[1,16], index: 10, kind: input, shape index: {}, may-alias: {4,10,22}]   ;;  %s16691_s11 = inlined_call_operand.vmem [shape: f32[256,16], index: 11, kind: input, shape index: {}, may-alias: {5,11,23}]   ;;  %s16692_s12 = inlined_call_operand.vmem [shape: f32[16,256], index: 12, kind: input, shape index: {}, may-alias: {6,12,24}]   ;;  %s16693_s13 = inlined_call_operand.vmem [shape: bf16[256,512], index: 13, kind: input, shape index: {}]   ;;  %s16694_s14 = inlined_call_operand.vmem [shape: f32[1,8], index: 14, kind: input, shape index: {}]   ;;  %s16695_s15 = inlined_call_operand.vmem [shape: f32[1,8], index: 15, kind: input, shape index: {}]   ;;  %s16696_s16 = inlined_call_operand.vmem [shape: f32[512,8], index: 16, kind: input, shape index: {}]   ;;  %s16697_s17 = inlined_call_operand.vmem [shape: f32[8,512], index: 17, kind: input, shape index: {}]   ;;  %s16698_s18 = inlined_call_operand.vmem [shape: bf16[512,1024], index: 18, kind: input, shape index: {}]   ;;  %s16699_s19 = inlined_call_operand.vmem [shape: bf16[1024,512], index: 19, kind: input, shape index: {}]   ;;  %s16700_s20 = inlined_call_operand.vmem [shape: bf16[512,256], index: 20, kind: input, shape index: {}]   ;;  %s16701_s21 = inlined_call_operand.vmem [shape: f32[1,16], index: 21, kind: input, shape index: {}, may-alias: {3,9,21}]   ;;  %s16702_s22 = inlined_call_operand.vmem [shape: f32[1,16], index: 22, kind: input, shape index: {}, may-alias: {4,10,22}]   ;;  %s16703_s23 = inlined_call_operand.vmem [shape: f32[256,16], index: 23, kind: input, shape index: {}, may-alias: {5,11,23}]   ;;  %s16704_s24 = inlined_call_operand.vmem [shape: f32[16,256], index: 24, kind: input, shape index: {}, may-alias: {6,12,24}]   ;;  %s16705_s25 = inlined_call_operand.vmem [shape: bf16[256,32], index: 25, kind: input, shape index: {}]   ;;  %s16706_s26 = inlined_call_operand.hbm [shape: f32[2,32], index: 26, kind: output, shape index: {0}]   ;;  %s16707_s27 = inlined_call_operand.vmem [shape: f32[2,1024], index: 27, kind: output, shape index: {1}]   ;;  %s16708_s28 = inlined_call_operand.hbm [shape: f32[2,32], index: 28, kind: output, shape index: {2}]  }
   0x1   :  { %16718 = sst [smem:[#allocation8_spill]] %s16680_s0 }
   0x2   :  { %16719 = sst [smem:[#allocation9_spill]] %s16681_s1 }
   0x3   :  { %16720 = sst [smem:[#allocation10_spill]] %s16682_s2 }
   0x4   :  { %16721 = sst [smem:[#allocation11_spill]] %s16683_s3 }
   0x5   :  { %16722 = sst [smem:[#allocation12_spill]] %s16684_s4 }
   0x6   :  { %16723 = sst [smem:[#allocation13_spill]] %s16685_s5 }
   0x7   :  { %16724 = sst [smem:[#allocation14_spill]] %s16686_s6 }
   0x8   :  { %16725 = sst [smem:[#allocation15_spill]] %s16687_s7 }
   0x9   :  { %16726 = sst [smem:[#allocation16_spill]] %s16688_s8 }
   0xa   :  { %16727 = sst [smem:[#allocation17_spill]] %s16689_s9 }
   0xb   :  { %16728 = sst [smem:[#allocation18_spill]] %s16690_s10 }
   0xc   :  { %16729 = sst [smem:[#allocation19_spill]] %s16691_s11 }
   0xd   :  { %16730 = sst [smem:[#allocation20_spill]] %s16692_s12 }
   0xe   :  { %34 = vsyncpa [#allocation3], 0  ;;  %s16731_s9 = sld [smem:[#allocation9_spill]]  ;;  %v12516_v36 = vmov 1983009808   ;;  %v353_v38 = vlaneseq  ;;  %s16732_s7 = sld [smem:[#allocation8_spill]] }
   0xf   :  { %v351_v37 = vunpack.c.l.s4 %v12516_v36  ;;  %s16733_s8 = sld [smem:[#allocation10_spill]] }
  0x10   :  { %v12783_v43 = vshrl.u32 %v353_v38, 7 }
  0x11   :  { %v352_v42 = vunpack.c.0.s8 %v351_v37 }
  0x13   :  { %v12801_v49 = vsub.s32 %v352_v42, %v12783_v43 }
  0x14   :  { %v11348_v0 = vld [vmem:[%s16731_s9 + $0x4] ss:$16 sps:$4 sm:$0xff]   ;;  %v11350_v1 = vld [vmem:[%s16731_s9 + $0xc] ss:$16 sps:$4 sm:$0xff]   ;;  %v11352_v2 = vld [vmem:[%s16731_s9] ss:$16 sps:$4 sm:$0xff]  }
  0x15   :  { %1679 = vmatprep.subr.bf16.mxu0 %v11348_v0  ;;  %v11353_v3 = vld [vmem:[%s16731_s9 + $0x8] ss:$16 sps:$4 sm:$0xff]   ;;  %1843 = vmatprep.subr.bf16.mxu1 %v11350_v1  ;;  %v11354_v4 = vld [vmem:[%s16731_s9 + $0x24] ss:$16 sps:$4 sm:$0xff]   ;;  %v11356_v5 = vld [vmem:[%s16731_s9 + $0x2c] ss:$16 sps:$4 sm:$0xff]  }
  0x16   :  { %1680 = vmatpush1.bf16.msra.mxu0 %v11352_v2  ;;  %1844 = vmatpush1.bf16.msra.mxu1 %v11353_v3  ;;  %v11358_v6 = vld [vmem:[%s16731_s9 + $0x20] ss:$16 sps:$4 sm:$0xff]   ;;  %v11359_v7 = vld [vmem:[%s16731_s9 + $0x28] ss:$16 sps:$4 sm:$0xff]   ;;  %v11360_v8 = vld [vmem:[%s16731_s9 + $0x44] ss:$16 sps:$4 sm:$0xff]  }
  0x17   :  { %1681 = vmatprep.subr.bf16.mxu0 %v11354_v4  ;;  %1845 = vmatprep.subr.bf16.mxu1 %v11356_v5  ;;  %v11362_v9 = vld [vmem:[%s16731_s9 + $0x4c] ss:$16 sps:$4 sm:$0xff]   ;;  %v11364_v10 = vld [vmem:[%s16731_s9 + $0x40] ss:$16 sps:$4 sm:$0xff]   ;;  %v11365_v11 = vld [vmem:[%s16731_s9 + $0x48] ss:$16 sps:$4 sm:$0xff]  }
  0x18   :  { %v11366_v12 = vld [vmem:[%s16731_s9 + $0x64] ss:$16 sps:$4 sm:$0xff]   ;;  %v11368_v13 = vld [vmem:[%s16731_s9 + $0x6c] ss:$16 sps:$4 sm:$0xff]   ;;  %v11370_v14 = vld [vmem:[%s16731_s9 + $0x60] ss:$16 sps:$4 sm:$0xff]  }
  0x19   :  { %v11371_v15 = vld [vmem:[%s16731_s9 + $0x68] ss:$16 sps:$4 sm:$0xff]   ;;  %v11372_v16 = vld [vmem:[%s16731_s9 + $0x84] ss:$16 sps:$4 sm:$0xff]   ;;  %v11374_v17 = vld [vmem:[%s16731_s9 + $0x8c] ss:$16 sps:$4 sm:$0xff]  }
  0x1a   :  { %1682 = vmatpush1.bf16.msra.mxu0 %v11358_v6  ;;  %1846 = vmatpush1.bf16.msra.mxu1 %v11359_v7  ;;  %v11376_v18 = vld [vmem:[%s16731_s9 + $0x80] ss:$16 sps:$4 sm:$0xff]   ;;  %v11377_v19 = vld [vmem:[%s16731_s9 + $0x88] ss:$16 sps:$4 sm:$0xff]   ;;  %v11378_v20 = vld [vmem:[%s16731_s9 + $0xa4] ss:$16 sps:$4 sm:$0xff]  }
  0x1b   :  { %1683 = vmatprep.subr.bf16.mxu0 %v11360_v8  ;;  %1847 = vmatprep.subr.bf16.mxu1 %v11362_v9  ;;  %v11380_v21 = vld [vmem:[%s16731_s9 + $0xac] ss:$16 sps:$4 sm:$0xff]   ;;  %v11382_v22 = vld [vmem:[%s16731_s9 + $0xa0] ss:$16 sps:$4 sm:$0xff]   ;;  %v11383_v23 = vld [vmem:[%s16731_s9 + $0xa8] ss:$16 sps:$4 sm:$0xff]  }
  0x1c   :  { %v11384_v24 = vld [vmem:[%s16731_s9 + $0xc4] ss:$16 sps:$4 sm:$0xff]   ;;  %v11386_v25 = vld [vmem:[%s16731_s9 + $0xcc] ss:$16 sps:$4 sm:$0xff]   ;;  %v11388_v26 = vld [vmem:[%s16731_s9 + $0xc0] ss:$16 sps:$4 sm:$0xff]  }
  0x1d   :  { %v11389_v27 = vld [vmem:[%s16731_s9 + $0xc8] ss:$16 sps:$4 sm:$0xff]   ;;  %v11390_v28 = vld [vmem:[%s16731_s9 + $0xe4] ss:$16 sps:$4 sm:$0xff]   ;;  %v11392_v29 = vld [vmem:[%s16731_s9 + $0xec] ss:$16 sps:$4 sm:$0xff]  }
  0x1e   :  { %1684 = vmatpush1.bf16.msra.mxu0 %v11364_v10  ;;  %1848 = vmatpush1.bf16.msra.mxu1 %v11365_v11  ;;  %v11394_v30 = vld [vmem:[%s16731_s9 + $0xe0] ss:$16 sps:$4 sm:$0xff]   ;;  %v11395_v31 = vld [vmem:[%s16731_s9 + $0xe8] ss:$16 sps:$4 sm:$0xff]   ;;  %v11396_v32 = vld [vmem:[%s16731_s9 + $0x104] ss:$16 sps:$4 sm:$0xff]  }
  0x1f   :  { %1685 = vmatprep.subr.bf16.mxu0 %v11366_v12  ;;  %1849 = vmatprep.subr.bf16.mxu1 %v11368_v13  ;;  %v11398_v33 = vld [vmem:[%s16731_s9 + $0x10c] ss:$16 sps:$4 sm:$0xff]   ;;  %v11400_v34 = vld [vmem:[%s16731_s9 + $0x100] ss:$16 sps:$4 sm:$0xff]   ;;  %v11401_v35 = vld [vmem:[%s16731_s9 + $0x108] ss:$16 sps:$4 sm:$0xff]  }
  0x20   :  { %v11402_v39 = vld [vmem:[%s16731_s9 + $0x124] ss:$16 sps:$4 sm:$0xff]   ;;  %v11404_v40 = vld [vmem:[%s16731_s9 + $0x12c] ss:$16 sps:$4 sm:$0xff]   ;;  %v11406_v41 = vld [vmem:[%s16731_s9 + $0x120] ss:$16 sps:$4 sm:$0xff]  }
  0x21   :  { %v11407_v44 = vld [vmem:[%s16731_s9 + $0x128] ss:$16 sps:$4 sm:$0xff]   ;;  %v11408_v45 = vld [vmem:[%s16731_s9 + $0x144] ss:$16 sps:$4 sm:$0xff]   ;;  %v11410_v46 = vld [vmem:[%s16731_s9 + $0x14c] ss:$16 sps:$4 sm:$0xff]  }
  0x22   :  { %1686 = vmatpush1.bf16.msra.mxu0 %v11370_v14  ;;  %1850 = vmatpush1.bf16.msra.mxu1 %v11371_v15  ;;  %v11412_v47 = vld [vmem:[%s16731_s9 + $0x140] ss:$16 sps:$4 sm:$0xff]   ;;  %v11413_v48 = vld [vmem:[%s16731_s9 + $0x148] ss:$16 sps:$4 sm:$0xff]   ;;  %v11414_v50 = vld [vmem:[%s16731_s9 + $0x164] ss:$16 sps:$4 sm:$0xff]  }
  0x23   :  { %1687 = vmatprep.subr.bf16.mxu0 %v11372_v16  ;;  %1851 = vmatprep.subr.bf16.mxu1 %v11374_v17  ;;  %v11416_v51 = vld [vmem:[%s16731_s9 + $0x16c] ss:$16 sps:$4 sm:$0xff]   ;;  %v89_v52 = vld [vmem:[%s16732_s7] sm:$0xff]  ;;  %v11419_v55 = vld [vmem:[%s16731_s9 + $0x168] ss:$16 sps:$4 sm:$0xff]  }
  0x24   :  { %v11418_v53 = vld [vmem:[%s16731_s9 + $0x160] ss:$16 sps:$4 sm:$0xff]   ;;  %v356_v54 = vrot.slane %v89_v52, %v12801_v49  ;;  %v11420_v56 = vld [vmem:[%s16731_s9 + $0x184] ss:$16 sps:$4 sm:$0xff]   ;;  %v11422_v57 = vld [vmem:[%s16731_s9 + $0x18c] ss:$16 sps:$4 sm:$0xff]   ;;  %v349_v4 = vcombine.high %v89_v52, %v89_v52 }
  0x25   :  { %v11424_v59 = vld [vmem:[%s16731_s9 + $0x180] ss:$16 sps:$4 sm:$0xff]   ;;  %v11425_v61 = vld [vmem:[%s16731_s9 + $0x188] ss:$16 sps:$4 sm:$0xff]   ;;  %v11426_v62 = vld [vmem:[%s16731_s9 + $0x1a4] ss:$16 sps:$4 sm:$0xff]  }
  0x26   :  { %1688 = vmatpush1.bf16.msra.mxu0 %v11376_v18  ;;  %1852 = vmatpush1.bf16.msra.mxu1 %v11377_v19  ;;  %v364_v58 = vcombine.high %v356_v54, %v356_v54  ;;  %v11428_v63 = vld [vmem:[%s16731_s9 + $0x1ac] ss:$16 sps:$4 sm:$0xff]   ;;  %v11430_v0 = vld [vmem:[%s16731_s9 + $0x1a0] ss:$16 sps:$4 sm:$0xff]   ;;  %v11431_v1 = vld [vmem:[%s16731_s9 + $0x1a8] ss:$16 sps:$4 sm:$0xff]   ;;  %v12862_v9 = vrot.slane %v349_v4, %v12801_v49  ;;  %v391_v16 = vpack.c.bf16 %v356_v54, %v356_v54 }
  0x27   :  { %1689 = vmatprep.subr.bf16.mxu0 %v11378_v20  ;;  %1853 = vmatprep.subr.bf16.mxu1 %v11380_v21  ;;  %v11432_v2 = vld [vmem:[%s16731_s9 + $0x1c4] ss:$16 sps:$4 sm:$0xff]   ;;  %v11434_v3 = vld [vmem:[%s16731_s9 + $0x1cc] ss:$16 sps:$4 sm:$0xff]   ;;  %v11436_v5 = vld [vmem:[%s16731_s9 + $0x1c0] ss:$16 sps:$4 sm:$0xff]  }
  0x28   :  { %v392_v60 = vpack.c.bf16 %v364_v58, %v364_v58  ;;  %v11437_v6 = vld [vmem:[%s16731_s9 + $0x1c8] ss:$16 sps:$4 sm:$0xff]   ;;  %v11438_v7 = vld [vmem:[%s16731_s9 + $0x1e4] ss:$16 sps:$4 sm:$0xff]   ;;  %v11440_v8 = vld [vmem:[%s16731_s9 + $0x1ec] ss:$16 sps:$4 sm:$0xff]   ;;  %v365_v14 = vcombine.high %v12862_v9, %v12862_v9 }
  0x29   :  { %v11442_v10 = vld [vmem:[%s16731_s9 + $0x1e0] ss:$16 sps:$4 sm:$0xff]   ;;  %v11443_v11 = vld [vmem:[%s16731_s9 + $0x1e8] ss:$16 sps:$4 sm:$0xff]   ;;  %v11447_v12 = vld [vmem:[%s16731_s9 + $0x204] ss:$16 sps:$4 sm:$0xff]  }
  0x2a   :  { %1690 = vmatpush1.bf16.msra.mxu0 %v11382_v22  ;;  %1854 = vmatpush1.bf16.msra.mxu1 %v11383_v23  ;;  %v11450_v13 = vld [vmem:[%s16731_s9 + $0x20c] ss:$16 sps:$4 sm:$0xff]   ;;  %v11445_v15 = vld [vmem:[%s16731_s9 + $0x200] ss:$16 sps:$4 sm:$0xff]   ;;  %v11448_v17 = vld [vmem:[%s16731_s9 + $0x208] ss:$16 sps:$4 sm:$0xff]   ;;  %v394_v20 = vpack.c.bf16 %v365_v14, %v365_v14 }
  0x2b   :  { %1691 = vmatprep.subr.bf16.mxu0 %v11384_v24  ;;  %1855 = vmatprep.subr.bf16.mxu1 %v11386_v25  ;;  %v11453_v18 = vld [vmem:[%s16731_s9 + $0x224] ss:$16 sps:$4 sm:$0xff]   ;;  %v11456_v19 = vld [vmem:[%s16731_s9 + $0x22c] ss:$16 sps:$4 sm:$0xff]   ;;  %v11451_v21 = vld [vmem:[%s16731_s9 + $0x220] ss:$16 sps:$4 sm:$0xff]  }
  0x2c   :  { %1711 = vmatprep.mubr.bf16.mxu0 %v392_v60  ;;  %1875 = vmatprep.mubr.bf16.mxu1 %v392_v60  ;;  %v11454_v22 = vld [vmem:[%s16731_s9 + $0x228] ss:$16 sps:$4 sm:$0xff]   ;;  %v11459_v23 = vld [vmem:[%s16731_s9 + $0x244] ss:$16 sps:$4 sm:$0xff]   ;;  %v11462_v24 = vld [vmem:[%s16731_s9 + $0x24c] ss:$16 sps:$4 sm:$0xff]  }
  0x2d   :  { %v11457_v25 = vld [vmem:[%s16731_s9 + $0x240] ss:$16 sps:$4 sm:$0xff]   ;;  %v11480_v36 = vld [vmem:[%s16731_s9 + $0x2ac] ss:$16 sps:$4 sm:$0xff]   ;;  %v11478_v38 = vld [vmem:[%s16731_s9 + $0x2a8] ss:$16 sps:$4 sm:$0xff]  }
  0x2e   :  { %1692 = vmatpush1.bf16.msra.mxu0 %v11388_v26  ;;  %1856 = vmatpush1.bf16.msra.mxu1 %v11389_v27  ;;  %v11460_v26 = vld [vmem:[%s16731_s9 + $0x248] ss:$16 sps:$4 sm:$0xff]   ;;  %v11465_v27 = vld [vmem:[%s16731_s9 + $0x264] ss:$16 sps:$4 sm:$0xff]   ;;  %v11475_v37 = vld [vmem:[%s16731_s9 + $0x2a0] ss:$16 sps:$4 sm:$0xff]  }
  0x2f   :  { %1693 = vmatprep.subr.bf16.mxu0 %v11390_v28  ;;  %1857 = vmatprep.subr.bf16.mxu1 %v11392_v29  ;;  %v11468_v28 = vld [vmem:[%s16731_s9 + $0x26c] ss:$16 sps:$4 sm:$0xff]   ;;  %v11463_v29 = vld [vmem:[%s16731_s9 + $0x260] ss:$16 sps:$4 sm:$0xff]   ;;  %v11484_v42 = vld [vmem:[%s16731_s9 + $0x2c8] ss:$16 sps:$4 sm:$0xff]  }
  0x30   :  { %v11496_v52 = vld [vmem:[%s16731_s9 + $0x308] ss:$16 sps:$4 sm:$0xff]   ;;  %v11504_v54 = vld [vmem:[%s16731_s9 + $0x32c] ss:$16 sps:$4 sm:$0xff]   ;;  %v11537_v14 = vld [vmem:[%s16731_s9 + $0x3e4] ss:$16 sps:$4 sm:$0xff]  }
  0x31   :  { %v11510_v58 = vld [vmem:[%s16731_s9 + $0x34c] ss:$16 sps:$4 sm:$0xff]   ;;  %v11508_v60 = vld [vmem:[%s16731_s9 + $0x348] ss:$16 sps:$4 sm:$0xff]  }
  0x32   :  { %1694 = vmatpush1.bf16.msra.mxu0 %v11394_v30  ;;  %1858 = vmatpush1.bf16.msra.mxu1 %v11395_v31  ;;  %v11466_v30 = vld [vmem:[%s16731_s9 + $0x268] ss:$16 sps:$4 sm:$0xff]   ;;  %v11471_v31 = vld [vmem:[%s16731_s9 + $0x284] ss:$16 sps:$4 sm:$0xff]  }
  0x33   :  { %1695 = vmatprep.subr.bf16.mxu0 %v11396_v32  ;;  %1859 = vmatprep.subr.bf16.mxu1 %v11398_v33  ;;  %v11474_v32 = vld [vmem:[%s16731_s9 + $0x28c] ss:$16 sps:$4 sm:$0xff]   ;;  %v11469_v33 = vld [vmem:[%s16731_s9 + $0x280] ss:$16 sps:$4 sm:$0xff]   ;;  %v11520_v4 = vld [vmem:[%s16731_s9 + $0x388] ss:$16 sps:$4 sm:$0xff]  }
  0x36   :  { %1696 = vmatpush1.bf16.msra.mxu0 %v11400_v34  ;;  %1860 = vmatpush1.bf16.msra.mxu1 %v11401_v35  ;;  %v11472_v34 = vld [vmem:[%s16731_s9 + $0x288] ss:$16 sps:$4 sm:$0xff]   ;;  %v11477_v35 = vld [vmem:[%s16731_s9 + $0x2a4] ss:$16 sps:$4 sm:$0xff]  }
  0x37   :  { %1697 = vmatprep.subr.bf16.mxu0 %v11402_v39  ;;  %1861 = vmatprep.subr.bf16.mxu1 %v11404_v40  ;;  %v11483_v39 = vld [vmem:[%s16731_s9 + $0x2c4] ss:$16 sps:$4 sm:$0xff]   ;;  %v11486_v40 = vld [vmem:[%s16731_s9 + $0x2cc] ss:$16 sps:$4 sm:$0xff]  }
  0x3a   :  { %1698 = vmatpush1.bf16.msra.mxu0 %v11406_v41  ;;  %1862 = vmatpush1.bf16.msra.mxu1 %v11407_v44  ;;  %v11481_v41 = vld [vmem:[%s16731_s9 + $0x2c0] ss:$16 sps:$4 sm:$0xff]   ;;  %v11489_v44 = vld [vmem:[%s16731_s9 + $0x2e4] ss:$16 sps:$4 sm:$0xff]  }
  0x3b   :  { %1699 = vmatprep.subr.bf16.mxu0 %v11408_v45  ;;  %1863 = vmatprep.subr.bf16.mxu1 %v11410_v46  ;;  %v11492_v45 = vld [vmem:[%s16731_s9 + $0x2ec] ss:$16 sps:$4 sm:$0xff]   ;;  %v11487_v46 = vld [vmem:[%s16731_s9 + $0x2e0] ss:$16 sps:$4 sm:$0xff]  }
  0x3e   :  { %1700 = vmatpush1.bf16.msra.mxu0 %v11412_v47  ;;  %1864 = vmatpush1.bf16.msra.mxu1 %v11413_v48  ;;  %v11490_v47 = vld [vmem:[%s16731_s9 + $0x2e8] ss:$16 sps:$4 sm:$0xff]   ;;  %v11495_v48 = vld [vmem:[%s16731_s9 + $0x304] ss:$16 sps:$4 sm:$0xff]  }
  0x3f   :  { %1701 = vmatprep.subr.bf16.mxu0 %v11414_v50  ;;  %1865 = vmatprep.subr.bf16.mxu1 %v11416_v51  ;;  %v11498_v50 = vld [vmem:[%s16731_s9 + $0x30c] ss:$16 sps:$4 sm:$0xff]   ;;  %v11493_v51 = vld [vmem:[%s16731_s9 + $0x300] ss:$16 sps:$4 sm:$0xff]  }
  0x42   :  { %1702 = vmatpush1.bf16.msra.mxu0 %v11418_v53  ;;  %1866 = vmatpush1.bf16.msra.mxu1 %v11419_v55  ;;  %v11501_v53 = vld [vmem:[%s16731_s9 + $0x324] ss:$16 sps:$4 sm:$0xff]   ;;  %v11499_v55 = vld [vmem:[%s16731_s9 + $0x320] ss:$16 sps:$4 sm:$0xff]  }
  0x43   :  { %1703 = vmatprep.subr.bf16.mxu0 %v11420_v56  ;;  %1867 = vmatprep.subr.bf16.mxu1 %v11422_v57  ;;  %v11502_v56 = vld [vmem:[%s16731_s9 + $0x328] ss:$16 sps:$4 sm:$0xff]   ;;  %v11507_v57 = vld [vmem:[%s16731_s9 + $0x344] ss:$16 sps:$4 sm:$0xff]  }
  0x46   :  { %1704 = vmatpush1.bf16.msra.mxu0 %v11424_v59  ;;  %1868 = vmatpush1.bf16.msra.mxu1 %v11425_v61  ;;  %v11505_v59 = vld [vmem:[%s16731_s9 + $0x340] ss:$16 sps:$4 sm:$0xff]   ;;  %v11513_v61 = vld [vmem:[%s16731_s9 + $0x364] ss:$16 sps:$4 sm:$0xff]  }
  0x47   :  { %1705 = vmatprep.subr.bf16.mxu0 %v11426_v62  ;;  %1869 = vmatprep.subr.bf16.mxu1 %v11428_v63  ;;  %v11516_v62 = vld [vmem:[%s16731_s9 + $0x36c] ss:$16 sps:$4 sm:$0xff]   ;;  %v11511_v63 = vld [vmem:[%s16731_s9 + $0x360] ss:$16 sps:$4 sm:$0xff]  }
  0x4a   :  { %1706 = vmatpush1.bf16.msra.mxu0 %v11430_v0  ;;  %1870 = vmatpush1.bf16.msra.mxu1 %v11431_v1  ;;  %v11514_v0 = vld [vmem:[%s16731_s9 + $0x368] ss:$16 sps:$4 sm:$0xff]   ;;  %v11519_v1 = vld [vmem:[%s16731_s9 + $0x384] ss:$16 sps:$4 sm:$0xff]  }
  0x4b   :  { %1707 = vmatprep.subr.bf16.mxu0 %v11432_v2  ;;  %1871 = vmatprep.subr.bf16.mxu1 %v11434_v3  ;;  %v11522_v2 = vld [vmem:[%s16731_s9 + $0x38c] ss:$16 sps:$4 sm:$0xff]   ;;  %v11517_v3 = vld [vmem:[%s16731_s9 + $0x380] ss:$16 sps:$4 sm:$0xff]  }
  0x4e   :  { %1708 = vmatpush1.bf16.msra.mxu0 %v11436_v5  ;;  %1872 = vmatpush1.bf16.msra.mxu1 %v11437_v6  ;;  %v11525_v5 = vld [vmem:[%s16731_s9 + $0x3a4] ss:$16 sps:$4 sm:$0xff]   ;;  %v11528_v6 = vld [vmem:[%s16731_s9 + $0x3ac] ss:$16 sps:$4 sm:$0xff]  }
  0x4f   :  { %1709 = vmatprep.subr.bf16.mxu0 %v11438_v7  ;;  %1873 = vmatprep.subr.bf16.mxu1 %v11440_v8  ;;  %v11523_v7 = vld [vmem:[%s16731_s9 + $0x3a0] ss:$16 sps:$4 sm:$0xff]   ;;  %v11526_v8 = vld [vmem:[%s16731_s9 + $0x3a8] ss:$16 sps:$4 sm:$0xff]  }
  0x52   :  { %1710 = vmatpush1.bf16.msra.mxu0 %v11442_v10  ;;  %1874 = vmatpush1.bf16.msra.mxu1 %v11443_v11  ;;  %v11531_v10 = vld [vmem:[%s16731_s9 + $0x3c4] ss:$16 sps:$4 sm:$0xff]   ;;  %v11534_v11 = vld [vmem:[%s16731_s9 + $0x3cc] ss:$16 sps:$4 sm:$0xff]  }
  0x53   :  { %1720 = vmatprep.subr.bf16.mxu0 %v11447_v12  ;;  %1884 = vmatprep.subr.bf16.mxu1 %v11450_v13  ;;  %v11529_v12 = vld [vmem:[%s16731_s9 + $0x3c0] ss:$16 sps:$4 sm:$0xff]   ;;  %v11532_v13 = vld [vmem:[%s16731_s9 + $0x3c8] ss:$16 sps:$4 sm:$0xff]  }
  0x55   :  { %1712 = vmatmul.mubr.bf16.vlgmr.msra.gmra.mrb[0].mxu0 %v391_v16  ;;  %1876 = vmatmul.mubr.bf16.vlgmr.msra.gmra.mrb[0].mxu1 %v391_v16  ;;  %v11535_v16 = vld [vmem:[%s16731_s9 + $0x3e0] ss:$16 sps:$4 sm:$0xff]  }
  0x56   :  { %1721 = vmatpush1.bf16.msra.mxu0 %v11445_v15  ;;  %1885 = vmatpush1.bf16.msra.mxu1 %v11448_v17  ;;  %v11540_v15 = vld [vmem:[%s16731_s9 + $0x3ec] ss:$16 sps:$4 sm:$0xff]   ;;  %v11538_v17 = vld [vmem:[%s16731_s9 + $0x3e8] ss:$16 sps:$4 sm:$0xff]  }
  0x57   :  { %1722 = vmatprep.subr.bf16.mxu0 %v11453_v18  ;;  %1886 = vmatprep.subr.bf16.mxu1 %v11456_v19  ;;  %v11543_v18 = vld [vmem:[%s16731_s9 + $0x404] ss:$16 sps:$4 sm:$0xff]   ;;  %v11546_v19 = vld [vmem:[%s16731_s9 + $0x40c] ss:$16 sps:$4 sm:$0xff]  }
  0x58   :  { %1752 = vmatprep.mubr.bf16.mxu0 %v394_v20  ;;  %1916 = vmatprep.mubr.bf16.mxu1 %v394_v20  ;;  %v11541_v20 = vld [vmem:[%s16731_s9 + $0x400] ss:$16 sps:$4 sm:$0xff]  }
  0x5a   :  { %1723 = vmatpush1.bf16.msra.mxu0 %v11451_v21  ;;  %1887 = vmatpush1.bf16.msra.mxu1 %v11454_v22  ;;  %v393_v21 = vpack.c.bf16 %v12862_v9, %v12862_v9  ;;  %v11544_v22 = vld [vmem:[%s16731_s9 + $0x408] ss:$16 sps:$4 sm:$0xff]   ;;  %v11552_v9 = vld [vmem:[%s16731_s9 + $0x42c] ss:$16 sps:$4 sm:$0xff]  }
  0x5b   :  { %1724 = vmatprep.subr.bf16.mxu0 %v11459_v23  ;;  %1888 = vmatprep.subr.bf16.mxu1 %v11462_v24  ;;  %v13081_v23 = vld [vmem:[%s16732_s7 + $0x8] sm:$0xff]  ;;  %v11549_v24 = vld [vmem:[%s16731_s9 + $0x424] ss:$16 sps:$4 sm:$0xff]  }
  0x5e   :  { %1725 = vmatpush1.bf16.msra.mxu0 %v11457_v25  ;;  %1889 = vmatpush1.bf16.msra.mxu1 %v11460_v26  ;;  %v13091_v25 = vrot.slane %v13081_v23, %v12801_v49 }
  0x5f   :  { %1726 = vmatprep.subr.bf16.mxu0 %v11465_v27  ;;  %1890 = vmatprep.subr.bf16.mxu1 %v11468_v28  ;;  %v11547_v27 = vld [vmem:[%s16731_s9 + $0x420] ss:$16 sps:$4 sm:$0xff]   ;;  %v11550_v28 = vld [vmem:[%s16731_s9 + $0x428] ss:$16 sps:$4 sm:$0xff]  }
  0x60   :  { %v381_v26 = vcombine.high %v13091_v25, %v13091_v25 }
  0x62   :  { %1727 = vmatpush1.bf16.msra.mxu0 %v11463_v29  ;;  %1891 = vmatpush1.bf16.msra.mxu1 %v11466_v30  ;;  %v11555_v29 = vld [vmem:[%s16731_s9 + $0x444] ss:$16 sps:$4 sm:$0xff]   ;;  %v11558_v30 = vld [vmem:[%s16731_s9 + $0x44c] ss:$16 sps:$4 sm:$0xff]  }
  0x63   :  { %1728 = vmatprep.subr.bf16.mxu0 %v11471_v31  ;;  %1892 = vmatprep.subr.bf16.mxu1 %v11474_v32  ;;  %v396_v31 = vpack.c.bf16 %v381_v26, %v381_v26  ;;  %v11553_v32 = vld [vmem:[%s16731_s9 + $0x440] ss:$16 sps:$4 sm:$0xff]   ;;  %v11634_v26 = vld [vmem:[%s16731_s9 + $0x5e8] ss:$16 sps:$4 sm:$0xff]  }
  0x66   :  { %1729 = vmatpush1.bf16.msra.mxu0 %v11469_v33  ;;  %1893 = vmatpush1.bf16.msra.mxu1 %v11472_v34  ;;  %v11556_v33 = vld [vmem:[%s16731_s9 + $0x448] ss:$16 sps:$4 sm:$0xff]   ;;  %v11561_v34 = vld [vmem:[%s16731_s9 + $0x464] ss:$16 sps:$4 sm:$0xff]  }
  0x67   :  { %1730 = vmatprep.subr.bf16.mxu0 %v11477_v35  ;;  %1894 = vmatprep.subr.bf16.mxu1 %v11480_v36  ;;  %v11564_v35 = vld [vmem:[%s16731_s9 + $0x46c] ss:$16 sps:$4 sm:$0xff]   ;;  %v11559_v36 = vld [vmem:[%s16731_s9 + $0x460] ss:$16 sps:$4 sm:$0xff]  }
  0x6a   :  { %1731 = vmatpush1.bf16.msra.mxu0 %v11475_v37  ;;  %1895 = vmatpush1.bf16.msra.mxu1 %v11478_v38  ;;  %v11562_v37 = vld [vmem:[%s16731_s9 + $0x468] ss:$16 sps:$4 sm:$0xff]   ;;  %v11567_v38 = vld [vmem:[%s16731_s9 + $0x484] ss:$16 sps:$4 sm:$0xff]  }
  0x6b   :  { %1732 = vmatprep.subr.bf16.mxu0 %v11483_v39  ;;  %1896 = vmatprep.subr.bf16.mxu1 %v11486_v40  ;;  %v11570_v39 = vld [vmem:[%s16731_s9 + $0x48c] ss:$16 sps:$4 sm:$0xff]   ;;  %v11565_v40 = vld [vmem:[%s16731_s9 + $0x480] ss:$16 sps:$4 sm:$0xff]  }
  0x6e   :  { %1733 = vmatpush1.bf16.msra.mxu0 %v11481_v41  ;;  %1897 = vmatpush1.bf16.msra.mxu1 %v11484_v42  ;;  %v11568_v41 = vld [vmem:[%s16731_s9 + $0x488] ss:$16 sps:$4 sm:$0xff]   ;;  %v11573_v42 = vld [vmem:[%s16731_s9 + $0x4a4] ss:$16 sps:$4 sm:$0xff]  }
  0x6f   :  { %1734 = vmatprep.subr.bf16.mxu0 %v11489_v44  ;;  %1898 = vmatprep.subr.bf16.mxu1 %v11492_v45  ;;  %v11576_v44 = vld [vmem:[%s16731_s9 + $0x4ac] ss:$16 sps:$4 sm:$0xff]   ;;  %v11571_v45 = vld [vmem:[%s16731_s9 + $0x4a0] ss:$16 sps:$4 sm:$0xff]  }
  0x72   :  { %1735 = vmatpush1.bf16.msra.mxu0 %v11487_v46  ;;  %1899 = vmatpush1.bf16.msra.mxu1 %v11490_v47  ;;  %v11574_v46 = vld [vmem:[%s16731_s9 + $0x4a8] ss:$16 sps:$4 sm:$0xff]   ;;  %v11579_v47 = vld [vmem:[%s16731_s9 + $0x4c4] ss:$16 sps:$4 sm:$0xff]  }
  0x73   :  { %1736 = vmatprep.subr.bf16.mxu0 %v11495_v48  ;;  %1900 = vmatprep.subr.bf16.mxu1 %v11498_v50  ;;  %v11582_v48 = vld [vmem:[%s16731_s9 + $0x4cc] ss:$16 sps:$4 sm:$0xff]   ;;  %v11577_v50 = vld [vmem:[%s16731_s9 + $0x4c0] ss:$16 sps:$4 sm:$0xff]  }
  0x76   :  { %1737 = vmatpush1.bf16.msra.mxu0 %v11493_v51  ;;  %1901 = vmatpush1.bf16.msra.mxu1 %v11496_v52  ;;  %v11580_v51 = vld [vmem:[%s16731_s9 + $0x4c8] ss:$16 sps:$4 sm:$0xff]   ;;  %v11585_v52 = vld [vmem:[%s16731_s9 + $0x4e4] ss:$16 sps:$4 sm:$0xff]  }
  0x77   :  { %1738 = vmatprep.subr.bf16.mxu0 %v11501_v53  ;;  %1902 = vmatprep.subr.bf16.mxu1 %v11504_v54  ;;  %v11588_v53 = vld [vmem:[%s16731_s9 + $0x4ec] ss:$16 sps:$4 sm:$0xff]   ;;  %v11583_v54 = vld [vmem:[%s16731_s9 + $0x4e0] ss:$16 sps:$4 sm:$0xff]  }
  0x7a   :  { %1739 = vmatpush1.bf16.msra.mxu0 %v11499_v55  ;;  %1903 = vmatpush1.bf16.msra.mxu1 %v11502_v56  ;;  %v11586_v55 = vld [vmem:[%s16731_s9 + $0x4e8] ss:$16 sps:$4 sm:$0xff]   ;;  %v11591_v56 = vld [vmem:[%s16731_s9 + $0x504] ss:$16 sps:$4 sm:$0xff]  }
  0x7b   :  { %1740 = vmatprep.subr.bf16.mxu0 %v11507_v57  ;;  %1904 = vmatprep.subr.bf16.mxu1 %v11510_v58  ;;  %v11594_v57 = vld [vmem:[%s16731_s9 + $0x50c] ss:$16 sps:$4 sm:$0xff]   ;;  %v11589_v58 = vld [vmem:[%s16731_s9 + $0x500] ss:$16 sps:$4 sm:$0xff]  }
  0x7e   :  { %1741 = vmatpush1.bf16.msra.mxu0 %v11505_v59  ;;  %1905 = vmatpush1.bf16.msra.mxu1 %v11508_v60  ;;  %v11592_v59 = vld [vmem:[%s16731_s9 + $0x508] ss:$16 sps:$4 sm:$0xff]   ;;  %v11597_v60 = vld [vmem:[%s16731_s9 + $0x524] ss:$16 sps:$4 sm:$0xff]  }
  0x7f   :  { %1742 = vmatprep.subr.bf16.mxu0 %v11513_v61  ;;  %1906 = vmatprep.subr.bf16.mxu1 %v11516_v62  ;;  %v11600_v61 = vld [vmem:[%s16731_s9 + $0x52c] ss:$16 sps:$4 sm:$0xff]   ;;  %v11595_v62 = vld [vmem:[%s16731_s9 + $0x520] ss:$16 sps:$4 sm:$0xff]  }
  0x82   :  { %1743 = vmatpush1.bf16.msra.mxu0 %v11511_v63  ;;  %1907 = vmatpush1.bf16.msra.mxu1 %v11514_v0  ;;  %v11598_v63 = vld [vmem:[%s16731_s9 + $0x528] ss:$16 sps:$4 sm:$0xff]   ;;  %v11603_v0 = vld [vmem:[%s16731_s9 + $0x544] ss:$16 sps:$4 sm:$0xff]  }
  0x83   :  { %1744 = vmatprep.subr.bf16.mxu0 %v11519_v1  ;;  %1908 = vmatprep.subr.bf16.mxu1 %v11522_v2  ;;  %v11606_v1 = vld [vmem:[%s16731_s9 + $0x54c] ss:$16 sps:$4 sm:$0xff]   ;;  %v11601_v2 = vld [vmem:[%s16731_s9 + $0x540] ss:$16 sps:$4 sm:$0xff]  }
  0x86   :  { %1745 = vmatpush1.bf16.msra.mxu0 %v11517_v3  ;;  %1909 = vmatpush1.bf16.msra.mxu1 %v11520_v4  ;;  %v11604_v3 = vld [vmem:[%s16731_s9 + $0x548] ss:$16 sps:$4 sm:$0xff]   ;;  %v11609_v4 = vld [vmem:[%s16731_s9 + $0x564] ss:$16 sps:$4 sm:$0xff]  }
  0x87   :  { %1746 = vmatprep.subr.bf16.mxu0 %v11525_v5  ;;  %1910 = vmatprep.subr.bf16.mxu1 %v11528_v6  ;;  %v11612_v5 = vld [vmem:[%s16731_s9 + $0x56c] ss:$16 sps:$4 sm:$0xff]   ;;  %v11607_v6 = vld [vmem:[%s16731_s9 + $0x560] ss:$16 sps:$4 sm:$0xff]  }
  0x8a   :  { %1747 = vmatpush1.bf16.msra.mxu0 %v11523_v7  ;;  %1911 = vmatpush1.bf16.msra.mxu1 %v11526_v8  ;;  %v11610_v7 = vld [vmem:[%s16731_s9 + $0x568] ss:$16 sps:$4 sm:$0xff]   ;;  %v11615_v8 = vld [vmem:[%s16731_s9 + $0x584] ss:$16 sps:$4 sm:$0xff]  }
  0x8b   :  { %1748 = vmatprep.subr.bf16.mxu0 %v11531_v10  ;;  %1912 = vmatprep.subr.bf16.mxu1 %v11534_v11  ;;  %v11618_v10 = vld [vmem:[%s16731_s9 + $0x58c] ss:$16 sps:$4 sm:$0xff]   ;;  %v11613_v11 = vld [vmem:[%s16731_s9 + $0x580] ss:$16 sps:$4 sm:$0xff]  }
  0x8e   :  { %1749 = vmatpush1.bf16.msra.mxu0 %v11529_v12  ;;  %1913 = vmatpush1.bf16.msra.mxu1 %v11532_v13  ;;  %v11616_v12 = vld [vmem:[%s16731_s9 + $0x588] ss:$16 sps:$4 sm:$0xff]   ;;  %v11621_v13 = vld [vmem:[%s16731_s9 + $0x5a4] ss:$16 sps:$4 sm:$0xff]  }
  0x8f   :  { %1750 = vmatprep.subr.bf16.mxu0 %v11537_v14  ;;  %1914 = vmatprep.subr.bf16.mxu1 %v11540_v15  ;;  %v11624_v14 = vld [vmem:[%s16731_s9 + $0x5ac] ss:$16 sps:$4 sm:$0xff]   ;;  %v11619_v15 = vld [vmem:[%s16731_s9 + $0x5a0] ss:$16 sps:$4 sm:$0xff]  }
  0x92   :  { %1751 = vmatpush1.bf16.msra.mxu0 %v11535_v16  ;;  %1915 = vmatpush1.bf16.msra.mxu1 %v11538_v17  ;;  %v11622_v16 = vld [vmem:[%s16731_s9 + $0x5a8] ss:$16 sps:$4 sm:$0xff]   ;;  %v11627_v17 = vld [vmem:[%s16731_s9 + $0x5c4] ss:$16 sps:$4 sm:$0xff]  }
  0x93   :  { %1761 = vmatprep.subr.bf16.mxu0 %v11543_v18  ;;  %1925 = vmatprep.subr.bf16.mxu1 %v11546_v19  ;;  %v11630_v18 = vld [vmem:[%s16731_s9 + $0x5cc] ss:$16 sps:$4 sm:$0xff]   ;;  %v366_v19 = vcombine.high %v13081_v23, %v13081_v23 }
  0x94   :  { %v11636_v23 = vld [vmem:[%s16731_s9 + $0x5ec] ss:$16 sps:$4 sm:$0xff]  }
  0x95   :  { %1753 = vmatmul.mubr.bf16.vlgmr.msra.gmra.mrb[0].mxu0 %v393_v21  ;;  %1917 = vmatmul.mubr.bf16.vlgmr.msra.gmra.mrb[0].mxu1 %v393_v21  ;;  %v11628_v21 = vld [vmem:[%s16731_s9 + $0x5c8] ss:$16 sps:$4 sm:$0xff]  }
  0x96   :  { %1762 = vmatpush1.bf16.msra.mxu0 %v11541_v20  ;;  %1926 = vmatpush1.bf16.msra.mxu1 %v11544_v22  ;;  %v11625_v20 = vld [vmem:[%s16731_s9 + $0x5c0] ss:$16 sps:$4 sm:$0xff]   ;;  %v11633_v22 = vld [vmem:[%s16731_s9 + $0x5e4] ss:$16 sps:$4 sm:$0xff]  }
  0x97   :  { %1763 = vmatprep.subr.bf16.mxu0 %v11549_v24  ;;  %1927 = vmatprep.subr.bf16.mxu1 %v11552_v9  ;;  %v13266_v24 = vrot.slane %v366_v19, %v12801_v49  ;;  %v11631_v9 = vld [vmem:[%s16731_s9 + $0x5e0] ss:$16 sps:$4 sm:$0xff]   ;;  %v11712_v19 = vld [vmem:[%s16731_s9 + $0x788] ss:$16 sps:$4 sm:$0xff]  }
  0x98   :  { %1793 = vmatprep.mubr.bf16.mxu0 %v396_v31  ;;  %1957 = vmatprep.mubr.bf16.mxu1 %v396_v31 }
  0x99   :  { %v382_v31 = vcombine.high %v13266_v24, %v13266_v24 }
  0x9a   :  { %1764 = vmatpush1.bf16.msra.mxu0 %v11547_v27  ;;  %1928 = vmatpush1.bf16.msra.mxu1 %v11550_v28  ;;  %v11639_v27 = vld [vmem:[%s16731_s9 + $0x604] ss:$16 sps:$4 sm:$0xff]   ;;  %v11642_v28 = vld [vmem:[%s16731_s9 + $0x60c] ss:$16 sps:$4 sm:$0xff]  }
  0x9b   :  { %1765 = vmatprep.subr.bf16.mxu0 %v11555_v29  ;;  %1929 = vmatprep.subr.bf16.mxu1 %v11558_v30  ;;  %v11637_v29 = vld [vmem:[%s16731_s9 + $0x600] ss:$16 sps:$4 sm:$0xff]   ;;  %v11640_v30 = vld [vmem:[%s16731_s9 + $0x608] ss:$16 sps:$4 sm:$0xff]  }
  0x9e   :  { %1766 = vmatpush1.bf16.msra.mxu0 %v11553_v32  ;;  %1930 = vmatpush1.bf16.msra.mxu1 %v11556_v33  ;;  %v395_v32 = vpack.c.bf16 %v13091_v25, %v13091_v25  ;;  %v11645_v33 = vld [vmem:[%s16731_s9 + $0x624] ss:$16 sps:$4 sm:$0xff]   ;;  %v11646_v25 = vld [vmem:[%s16731_s9 + $0x628] ss:$16 sps:$4 sm:$0xff]  }
  0x9f   :  { %1767 = vmatprep.subr.bf16.mxu0 %v11561_v34  ;;  %1931 = vmatprep.subr.bf16.mxu1 %v11564_v35  ;;  %v11648_v34 = vld [vmem:[%s16731_s9 + $0x62c] ss:$16 sps:$4 sm:$0xff]   ;;  %v11643_v35 = vld [vmem:[%s16731_s9 + $0x620] ss:$16 sps:$4 sm:$0xff]  }
  0xa2   :  { %1768 = vmatpush1.bf16.msra.mxu0 %v11559_v36  ;;  %1932 = vmatpush1.bf16.msra.mxu1 %v11562_v37  ;;  %v398_v36 = vpack.c.bf16 %v382_v31, %v382_v31  ;;  %v11651_v37 = vld [vmem:[%s16731_s9 + $0x644] ss:$16 sps:$4 sm:$0xff]   ;;  %v11727_v31 = vld [vmem:[%s16731_s9 + $0x7e0] ss:$16 sps:$4 sm:$0xff]  }
  0xa3   :  { %1769 = vmatprep.subr.bf16.mxu0 %v11567_v38  ;;  %1933 = vmatprep.subr.bf16.mxu1 %v11570_v39  ;;  %v11654_v38 = vld [vmem:[%s16731_s9 + $0x64c] ss:$16 sps:$4 sm:$0xff]   ;;  %v11649_v39 = vld [vmem:[%s16731_s9 + $0x640] ss:$16 sps:$4 sm:$0xff]  }
  0xa6   :  { %1770 = vmatpush1.bf16.msra.mxu0 %v11565_v40  ;;  %1934 = vmatpush1.bf16.msra.mxu1 %v11568_v41  ;;  %v11652_v40 = vld [vmem:[%s16731_s9 + $0x648] ss:$16 sps:$4 sm:$0xff]   ;;  %v11657_v41 = vld [vmem:[%s16731_s9 + $0x664] ss:$16 sps:$4 sm:$0xff]  }
  0xa7   :  { %1771 = vmatprep.subr.bf16.mxu0 %v11573_v42  ;;  %1935 = vmatprep.subr.bf16.mxu1 %v11576_v44  ;;  %v11660_v42 = vld [vmem:[%s16731_s9 + $0x66c] ss:$16 sps:$4 sm:$0xff]   ;;  %v11655_v44 = vld [vmem:[%s16731_s9 + $0x660] ss:$16 sps:$4 sm:$0xff]  }
  0xaa   :  { %1772 = vmatpush1.bf16.msra.mxu0 %v11571_v45  ;;  %1936 = vmatpush1.bf16.msra.mxu1 %v11574_v46  ;;  %v11658_v45 = vld [vmem:[%s16731_s9 + $0x668] ss:$16 sps:$4 sm:$0xff]   ;;  %v11663_v46 = vld [vmem:[%s16731_s9 + $0x684] ss:$16 sps:$4 sm:$0xff]  }
  0xab   :  { %1773 = vmatprep.subr.bf16.mxu0 %v11579_v47  ;;  %1937 = vmatprep.subr.bf16.mxu1 %v11582_v48  ;;  %v11666_v47 = vld [vmem:[%s16731_s9 + $0x68c] ss:$16 sps:$4 sm:$0xff]   ;;  %v11661_v48 = vld [vmem:[%s16731_s9 + $0x680] ss:$16 sps:$4 sm:$0xff]  }
  0xae   :  { %1774 = vmatpush1.bf16.msra.mxu0 %v11577_v50  ;;  %1938 = vmatpush1.bf16.msra.mxu1 %v11580_v51  ;;  %v11664_v50 = vld [vmem:[%s16731_s9 + $0x688] ss:$16 sps:$4 sm:$0xff]   ;;  %v11669_v51 = vld [vmem:[%s16731_s9 + $0x6a4] ss:$16 sps:$4 sm:$0xff]  }
  0xaf   :  { %1775 = vmatprep.subr.bf16.mxu0 %v11585_v52  ;;  %1939 = vmatprep.subr.bf16.mxu1 %v11588_v53  ;;  %v11672_v52 = vld [vmem:[%s16731_s9 + $0x6ac] ss:$16 sps:$4 sm:$0xff]   ;;  %v11667_v53 = vld [vmem:[%s16731_s9 + $0x6a0] ss:$16 sps:$4 sm:$0xff]  }
  0xb2   :  { %1776 = vmatpush1.bf16.msra.mxu0 %v11583_v54  ;;  %1940 = vmatpush1.bf16.msra.mxu1 %v11586_v55  ;;  %v11670_v54 = vld [vmem:[%s16731_s9 + $0x6a8] ss:$16 sps:$4 sm:$0xff]   ;;  %v11675_v55 = vld [vmem:[%s16731_s9 + $0x6c4] ss:$16 sps:$4 sm:$0xff]  }
  0xb3   :  { %1777 = vmatprep.subr.bf16.mxu0 %v11591_v56  ;;  %1941 = vmatprep.subr.bf16.mxu1 %v11594_v57  ;;  %v11678_v56 = vld [vmem:[%s16731_s9 + $0x6cc] ss:$16 sps:$4 sm:$0xff]   ;;  %v11673_v57 = vld [vmem:[%s16731_s9 + $0x6c0] ss:$16 sps:$4 sm:$0xff]  }
  0xb6   :  { %1778 = vmatpush1.bf16.msra.mxu0 %v11589_v58  ;;  %1942 = vmatpush1.bf16.msra.mxu1 %v11592_v59  ;;  %v11676_v58 = vld [vmem:[%s16731_s9 + $0x6c8] ss:$16 sps:$4 sm:$0xff]   ;;  %v11681_v59 = vld [vmem:[%s16731_s9 + $0x6e4] ss:$16 sps:$4 sm:$0xff]  }
  0xb7   :  { %1779 = vmatprep.subr.bf16.mxu0 %v11597_v60  ;;  %1943 = vmatprep.subr.bf16.mxu1 %v11600_v61  ;;  %v11684_v60 = vld [vmem:[%s16731_s9 + $0x6ec] ss:$16 sps:$4 sm:$0xff]   ;;  %v11679_v61 = vld [vmem:[%s16731_s9 + $0x6e0] ss:$16 sps:$4 sm:$0xff]  }
  0xba   :  { %1780 = vmatpush1.bf16.msra.mxu0 %v11595_v62  ;;  %1944 = vmatpush1.bf16.msra.mxu1 %v11598_v63  ;;  %v11682_v62 = vld [vmem:[%s16731_s9 + $0x6e8] ss:$16 sps:$4 sm:$0xff]   ;;  %v11687_v63 = vld [vmem:[%s16731_s9 + $0x704] ss:$16 sps:$4 sm:$0xff]  }
  0xbb   :  { %1781 = vmatprep.subr.bf16.mxu0 %v11603_v0  ;;  %1945 = vmatprep.subr.bf16.mxu1 %v11606_v1  ;;  %v11690_v0 = vld [vmem:[%s16731_s9 + $0x70c] ss:$16 sps:$4 sm:$0xff]   ;;  %v11685_v1 = vld [vmem:[%s16731_s9 + $0x700] ss:$16 sps:$4 sm:$0xff]  }
  0xbe   :  { %1782 = vmatpush1.bf16.msra.mxu0 %v11601_v2  ;;  %1946 = vmatpush1.bf16.msra.mxu1 %v11604_v3  ;;  %v11688_v2 = vld [vmem:[%s16731_s9 + $0x708] ss:$16 sps:$4 sm:$0xff]   ;;  %v11693_v3 = vld [vmem:[%s16731_s9 + $0x724] ss:$16 sps:$4 sm:$0xff]  }
  0xbf   :  { %1783 = vmatprep.subr.bf16.mxu0 %v11609_v4  ;;  %1947 = vmatprep.subr.bf16.mxu1 %v11612_v5  ;;  %v11696_v4 = vld [vmem:[%s16731_s9 + $0x72c] ss:$16 sps:$4 sm:$0xff]   ;;  %v11691_v5 = vld [vmem:[%s16731_s9 + $0x720] ss:$16 sps:$4 sm:$0xff]  }
  0xc2   :  { %1784 = vmatpush1.bf16.msra.mxu0 %v11607_v6  ;;  %1948 = vmatpush1.bf16.msra.mxu1 %v11610_v7  ;;  %v11694_v6 = vld [vmem:[%s16731_s9 + $0x728] ss:$16 sps:$4 sm:$0xff]   ;;  %v11699_v7 = vld [vmem:[%s16731_s9 + $0x744] ss:$16 sps:$4 sm:$0xff]  }
  0xc3   :  { %1785 = vmatprep.subr.bf16.mxu0 %v11615_v8  ;;  %1949 = vmatprep.subr.bf16.mxu1 %v11618_v10  ;;  %v11702_v8 = vld [vmem:[%s16731_s9 + $0x74c] ss:$16 sps:$4 sm:$0xff]   ;;  %v11697_v10 = vld [vmem:[%s16731_s9 + $0x740] ss:$16 sps:$4 sm:$0xff]  }
  0xc6   :  { %1786 = vmatpush1.bf16.msra.mxu0 %v11613_v11  ;;  %1950 = vmatpush1.bf16.msra.mxu1 %v11616_v12  ;;  %v11700_v11 = vld [vmem:[%s16731_s9 + $0x748] ss:$16 sps:$4 sm:$0xff]   ;;  %v11705_v12 = vld [vmem:[%s16731_s9 + $0x764] ss:$16 sps:$4 sm:$0xff]  }
  0xc7   :  { %1787 = vmatprep.subr.bf16.mxu0 %v11621_v13  ;;  %1951 = vmatprep.subr.bf16.mxu1 %v11624_v14  ;;  %v11708_v13 = vld [vmem:[%s16731_s9 + $0x76c] ss:$16 sps:$4 sm:$0xff]   ;;  %v11703_v14 = vld [vmem:[%s16731_s9 + $0x760] ss:$16 sps:$4 sm:$0xff]  }
  0xca   :  { %1788 = vmatpush1.bf16.msra.mxu0 %v11619_v15  ;;  %1952 = vmatpush1.bf16.msra.mxu1 %v11622_v16  ;;  %v11706_v15 = vld [vmem:[%s16731_s9 + $0x768] ss:$16 sps:$4 sm:$0xff]   ;;  %v11711_v16 = vld [vmem:[%s16731_s9 + $0x784] ss:$16 sps:$4 sm:$0xff]  }
  0xcb   :  { %1789 = vmatprep.subr.bf16.mxu0 %v11627_v17  ;;  %1953 = vmatprep.subr.bf16.mxu1 %v11630_v18  ;;  %v11714_v17 = vld [vmem:[%s16731_s9 + $0x78c] ss:$16 sps:$4 sm:$0xff]   ;;  %v11709_v18 = vld [vmem:[%s16731_s9 + $0x780] ss:$16 sps:$4 sm:$0xff]  }
  0xce   :  { %1790 = vmatpush1.bf16.msra.mxu0 %v11625_v20  ;;  %1954 = vmatpush1.bf16.msra.mxu1 %v11628_v21  ;;  %v11717_v20 = vld [vmem:[%s16731_s9 + $0x7a4] ss:$16 sps:$4 sm:$0xff]   ;;  %v11720_v21 = vld [vmem:[%s16731_s9 + $0x7ac] ss:$16 sps:$4 sm:$0xff]  }
  0xcf   :  { %1791 = vmatprep.subr.bf16.mxu0 %v11633_v22  ;;  %1955 = vmatprep.subr.bf16.mxu1 %v11636_v23  ;;  %v11715_v22 = vld [vmem:[%s16731_s9 + $0x7a0] ss:$16 sps:$4 sm:$0xff]   ;;  %v11718_v23 = vld [vmem:[%s16731_s9 + $0x7a8] ss:$16 sps:$4 sm:$0xff]  }
  0xd2   :  { %1792 = vmatpush1.bf16.msra.mxu0 %v11631_v9  ;;  %1956 = vmatpush1.bf16.msra.mxu1 %v11634_v26  ;;  %v11723_v9 = vld [vmem:[%s16731_s9 + $0x7c4] ss:$16 sps:$4 sm:$0xff]   ;;  %v11726_v26 = vld [vmem:[%s16731_s9 + $0x7cc] ss:$16 sps:$4 sm:$0xff]  }
  0xd3   :  { %1802 = vmatprep.subr.bf16.mxu0 %v11639_v27  ;;  %1966 = vmatprep.subr.bf16.mxu1 %v11642_v28  ;;  %v11721_v27 = vld [vmem:[%s16731_s9 + $0x7c0] ss:$16 sps:$4 sm:$0xff]   ;;  %v11724_v28 = vld [vmem:[%s16731_s9 + $0x7c8] ss:$16 sps:$4 sm:$0xff]  }
  0xd5   :  { %1794 = vmatmul.mubr.bf16.vlgmr.msra.gmra.mrb[0].mxu0 %v395_v32  ;;  %1958 = vmatmul.mubr.bf16.vlgmr.msra.gmra.mrb[0].mxu1 %v395_v32  ;;  %v11730_v32 = vld [vmem:[%s16731_s9 + $0x7e8] ss:$16 sps:$4 sm:$0xff]  }
  0xd6   :  { %1803 = vmatpush1.bf16.msra.mxu0 %v11637_v29  ;;  %1967 = vmatpush1.bf16.msra.mxu1 %v11640_v30  ;;  %v11729_v29 = vld [vmem:[%s16731_s9 + $0x7e4] ss:$16 sps:$4 sm:$0xff]   ;;  %v11732_v30 = vld [vmem:[%s16731_s9 + $0x7ec] ss:$16 sps:$4 sm:$0xff]  }
  0xd7   :  { %1804 = vmatprep.subr.bf16.mxu0 %v11645_v33  ;;  %1968 = vmatprep.subr.bf16.mxu1 %v11648_v34  ;;  %v11736_v33 = vld [vmem:[%s16733_s8 + $0x4] ss:$8 sps:$4 sm:$0xff]   ;;  %v11734_v34 = vld [vmem:[%s16733_s8] ss:$8 sps:$4 sm:$0xff]  }
  0xd8   :  { %1834 = vmatprep.mubr.bf16.mxu0 %v398_v36  ;;  %1998 = vmatprep.mubr.bf16.mxu1 %v398_v36  ;;  %v11737_v36 = vld [vmem:[%s16733_s8 + $0x10] ss:$8 sps:$4 sm:$0xff]  }
  0xda   :  { %1805 = vmatpush1.bf16.msra.mxu0 %v11643_v35  ;;  %1969 = vmatpush1.bf16.msra.mxu1 %v11646_v25  ;;  %v397_v35 = vpack.c.bf16 %v13266_v24, %v13266_v24  ;;  %v11739_v25 = vld [vmem:[%s16733_s8 + $0x14] ss:$8 sps:$4 sm:$0xff]   ;;  %v11740_v24 = vld [vmem:[%s16733_s8 + $0x20] ss:$8 sps:$4 sm:$0xff]  }
  0xdb   :  { %1806 = vmatprep.subr.bf16.mxu0 %v11651_v37  ;;  %1970 = vmatprep.subr.bf16.mxu1 %v11654_v38  ;;  %v11742_v37 = vld [vmem:[%s16733_s8 + $0x24] ss:$8 sps:$4 sm:$0xff]   ;;  %v11745_v38 = vld [vmem:[%s16733_s8 + $0x34] ss:$8 sps:$4 sm:$0xff]  }
  0xde   :  { %1807 = vmatpush1.bf16.msra.mxu0 %v11649_v39  ;;  %1971 = vmatpush1.bf16.msra.mxu1 %v11652_v40  ;;  %v11743_v39 = vld [vmem:[%s16733_s8 + $0x30] ss:$8 sps:$4 sm:$0xff]   ;;  %v11748_v40 = vld [vmem:[%s16733_s8 + $0x44] ss:$8 sps:$4 sm:$0xff]  }
  0xdf   :  { %1808 = vmatprep.subr.bf16.mxu0 %v11657_v41  ;;  %1972 = vmatprep.subr.bf16.mxu1 %v11660_v42  ;;  %v11746_v41 = vld [vmem:[%s16733_s8 + $0x40] ss:$8 sps:$4 sm:$0xff]   ;;  %v11751_v42 = vld [vmem:[%s16733_s8 + $0x54] ss:$8 sps:$4 sm:$0xff]  }
  0xe2   :  { %1809 = vmatpush1.bf16.msra.mxu0 %v11655_v44  ;;  %1973 = vmatpush1.bf16.msra.mxu1 %v11658_v45  ;;  %v11749_v44 = vld [vmem:[%s16733_s8 + $0x50] ss:$8 sps:$4 sm:$0xff]   ;;  %v11754_v45 = vld [vmem:[%s16733_s8 + $0x64] ss:$8 sps:$4 sm:$0xff]  }
  0xe3   :  { %1810 = vmatprep.subr.bf16.mxu0 %v11663_v46  ;;  %1974 = vmatprep.subr.bf16.mxu1 %v11666_v47  ;;  %v11752_v46 = vld [vmem:[%s16733_s8 + $0x60] ss:$8 sps:$4 sm:$0xff]   ;;  %v11757_v47 = vld [vmem:[%s16733_s8 + $0x74] ss:$8 sps:$4 sm:$0xff]  }
  0xe6   :  { %1811 = vmatpush1.bf16.msra.mxu0 %v11661_v48  ;;  %1975 = vmatpush1.bf16.msra.mxu1 %v11664_v50  ;;  %v11755_v48 = vld [vmem:[%s16733_s8 + $0x70] ss:$8 sps:$4 sm:$0xff]   ;;  %v11760_v50 = vld [vmem:[%s16733_s8 + $0x84] ss:$8 sps:$4 sm:$0xff]  }
  0xe7   :  { %1812 = vmatprep.subr.bf16.mxu0 %v11669_v51  ;;  %1976 = vmatprep.subr.bf16.mxu1 %v11672_v52  ;;  %v11758_v51 = vld [vmem:[%s16733_s8 + $0x80] ss:$8 sps:$4 sm:$0xff]   ;;  %v11763_v52 = vld [vmem:[%s16733_s8 + $0x94] ss:$8 sps:$4 sm:$0xff]  }
  0xea   :  { %1813 = vmatpush1.bf16.msra.mxu0 %v11667_v53  ;;  %1977 = vmatpush1.bf16.msra.mxu1 %v11670_v54  ;;  %v11761_v53 = vld [vmem:[%s16733_s8 + $0x90] ss:$8 sps:$4 sm:$0xff]   ;;  %v11766_v54 = vld [vmem:[%s16733_s8 + $0xa4] ss:$8 sps:$4 sm:$0xff]  }
  0xeb   :  { %1814 = vmatprep.subr.bf16.mxu0 %v11675_v55  ;;  %1978 = vmatprep.subr.bf16.mxu1 %v11678_v56  ;;  %v11764_v55 = vld [vmem:[%s16733_s8 + $0xa0] ss:$8 sps:$4 sm:$0xff]   ;;  %v11769_v56 = vld [vmem:[%s16733_s8 + $0xb4] ss:$8 sps:$4 sm:$0xff]  }
  0xee   :  { %1815 = vmatpush1.bf16.msra.mxu0 %v11673_v57  ;;  %1979 = vmatpush1.bf16.msra.mxu1 %v11676_v58  ;;  %v11767_v57 = vld [vmem:[%s16733_s8 + $0xb0] ss:$8 sps:$4 sm:$0xff]   ;;  %v11772_v58 = vld [vmem:[%s16733_s8 + $0xc4] ss:$8 sps:$4 sm:$0xff]  }
  0xef   :  { %1816 = vmatprep.subr.bf16.mxu0 %v11681_v59  ;;  %1980 = vmatprep.subr.bf16.mxu1 %v11684_v60  ;;  %v11770_v59 = vld [vmem:[%s16733_s8 + $0xc0] ss:$8 sps:$4 sm:$0xff]   ;;  %v11775_v60 = vld [vmem:[%s16733_s8 + $0xd4] ss:$8 sps:$4 sm:$0xff]  }
  0xf2   :  { %1817 = vmatpush1.bf16.msra.mxu0 %v11679_v61  ;;  %1981 = vmatpush1.bf16.msra.mxu1 %v11682_v62  ;;  %v11773_v61 = vld [vmem:[%s16733_s8 + $0xd0] ss:$8 sps:$4 sm:$0xff]   ;;  %v11778_v62 = vld [vmem:[%s16733_s8 + $0xe4] ss:$8 sps:$4 sm:$0xff]  }
  0xf3   :  { %1818 = vmatprep.subr.bf16.mxu0 %v11687_v63  ;;  %1982 = vmatprep.subr.bf16.mxu1 %v11690_v0  ;;  %v11776_v63 = vld [vmem:[%s16733_s8 + $0xe0] ss:$8 sps:$4 sm:$0xff]   ;;  %v11781_v0 = vld [vmem:[%s16733_s8 + $0xf4] ss:$8 sps:$4 sm:$0xff]  }
  0xf6   :  { %1819 = vmatpush1.bf16.msra.mxu0 %v11685_v1  ;;  %1983 = vmatpush1.bf16.msra.mxu1 %v11688_v2  ;;  %v11779_v1 = vld [vmem:[%s16733_s8 + $0xf0] ss:$8 sps:$4 sm:$0xff]   ;;  %v11784_v2 = vld [vmem:[%s16733_s8 + $0x104] ss:$8 sps:$4 sm:$0xff]  }
  0xf7   :  { %1820 = vmatprep.subr.bf16.mxu0 %v11693_v3  ;;  %1984 = vmatprep.subr.bf16.mxu1 %v11696_v4 }
  0xfa   :  { %1821 = vmatpush1.bf16.msra.mxu0 %v11691_v5  ;;  %1985 = vmatpush1.bf16.msra.mxu1 %v11694_v6 }
  0xfb   :  { %1822 = vmatprep.subr.bf16.mxu0 %v11699_v7  ;;  %1986 = vmatprep.subr.bf16.mxu1 %v11702_v8 }
  0xfe   :  { %1823 = vmatpush1.bf16.msra.mxu0 %v11697_v10  ;;  %1987 = vmatpush1.bf16.msra.mxu1 %v11700_v11 }
  0xff   :  { %1824 = vmatprep.subr.bf16.mxu0 %v11705_v12  ;;  %1988 = vmatprep.subr.bf16.mxu1 %v11708_v13 }
 0x102   :  { %1825 = vmatpush1.bf16.msra.mxu0 %v11703_v14  ;;  %1989 = vmatpush1.bf16.msra.mxu1 %v11706_v15 }
 0x103   :  { %1826 = vmatprep.subr.bf16.mxu0 %v11711_v16  ;;  %1990 = vmatprep.subr.bf16.mxu1 %v11714_v17 }
 0x106   :  { %1827 = vmatpush1.bf16.msra.mxu0 %v11709_v18  ;;  %1991 = vmatpush1.bf16.msra.mxu1 %v11712_v19 }
 0x107   :  { %1828 = vmatprep.subr.bf16.mxu0 %v11717_v20  ;;  %1992 = vmatprep.subr.bf16.mxu1 %v11720_v21 }
 0x10a   :  { %1829 = vmatpush1.bf16.msra.mxu0 %v11715_v22  ;;  %1993 = vmatpush1.bf16.msra.mxu1 %v11718_v23 }
 0x10b   :  { %1830 = vmatprep.subr.bf16.mxu0 %v11723_v9  ;;  %1994 = vmatprep.subr.bf16.mxu1 %v11726_v26 }
 0x10e   :  { %1831 = vmatpush1.bf16.msra.mxu0 %v11721_v27  ;;  %1995 = vmatpush1.bf16.msra.mxu1 %v11724_v28 }
 0x10f   :  { %1832 = vmatprep.subr.bf16.mxu0 %v11729_v29  ;;  %1996 = vmatprep.subr.bf16.mxu1 %v11732_v30 }
 0x112   :  { %1833 = vmatpush1.bf16.msra.mxu0 %v11727_v31  ;;  %1997 = vmatpush1.bf16.msra.mxu1 %v11730_v32 }
 0x113   :  { %2407 = vmatprep.subr.bf16.mxu0 %v11736_v33 }
 0x115   :  { %1835 = vmatmul.mubr.bf16.vlgmr.msra.gmra.mrb[0].mxu0 %v397_v35  ;;  %1999 = vmatmul.mubr.bf16.vlgmr.msra.gmra.mrb[0].mxu1 %v397_v35 }
 0x116   :  { %2408 = vmatpush1.bf16.msra.mxu0 %v11734_v34 }
 0x117   :  { %2409 = vmatprep.subr.bf16.mxu0 %v11739_v25 }
 0x11a   :  { %2410 = vmatpush1.bf16.msra.mxu0 %v11737_v36 }
 0x11b   :  { %2411 = vmatprep.subr.bf16.mxu0 %v11742_v37 }
 0x11e   :  { %2412 = vmatpush1.bf16.msra.mxu0 %v11740_v24 }
 0x11f   :  { %2413 = vmatprep.subr.bf16.mxu0 %v11745_v38 }
 0x122   :  { %2414 = vmatpush1.bf16.msra.mxu0 %v11743_v39 }
 0x123   :  { %2415 = vmatprep.subr.bf16.mxu0 %v11748_v40 }
 0x126   :  { %2416 = vmatpush1.bf16.msra.mxu0 %v11746_v41 }
 0x127   :  { %2417 = vmatprep.subr.bf16.mxu0 %v11751_v42 }
 0x12a   :  { %2418 = vmatpush1.bf16.msra.mxu0 %v11749_v44 }
 0x12b   :  { %2419 = vmatprep.subr.bf16.mxu0 %v11754_v45 }
 0x12e   :  { %2420 = vmatpush1.bf16.msra.mxu0 %v11752_v46 }
 0x12f   :  { %2421 = vmatprep.subr.bf16.mxu0 %v11757_v47 }
 0x132   :  { %2422 = vmatpush1.bf16.msra.mxu0 %v11755_v48 }
 0x133   :  { %2423 = vmatprep.subr.bf16.mxu0 %v11760_v50 }
 0x136   :  { %2424 = vmatpush1.bf16.msra.mxu0 %v11758_v51 }
 0x137   :  { %2425 = vmatprep.subr.bf16.mxu0 %v11763_v52 }
 0x13a   :  { %2426 = vmatpush1.bf16.msra.mxu0 %v11761_v53 }
 0x13b   :  { %2427 = vmatprep.subr.bf16.mxu0 %v11766_v54 }
 0x13e   :  { %2428 = vmatpush1.bf16.msra.mxu0 %v11764_v55 }
 0x13f   :  { %2429 = vmatprep.subr.bf16.mxu0 %v11769_v56 }
 0x142   :  { %2430 = vmatpush1.bf16.msra.mxu0 %v11767_v57 }
 0x143   :  { %2431 = vmatprep.subr.bf16.mxu0 %v11772_v58 }
 0x146   :  { %2432 = vmatpush1.bf16.msra.mxu0 %v11770_v59 }
 0x147   :  { %2433 = vmatprep.subr.bf16.mxu0 %v11775_v60 }
 0x14a   :  { %2434 = vmatpush1.bf16.msra.mxu0 %v11773_v61 }
 0x14b   :  { %2435 = vmatprep.subr.bf16.mxu0 %v11778_v62 }
 0x14e   :  { %2436 = vmatpush1.bf16.msra.mxu0 %v11776_v63 }
 0x14f   :  { %2437 = vmatprep.subr.bf16.mxu0 %v11781_v0 }
 0x152   :  { %2438 = vmatpush1.bf16.msra.mxu0 %v11779_v1 }
 0x153   :  { %2448 = vmatprep.subr.bf16.mxu0 %v11784_v2 }
 0x154   :  { %35 = vsyncpa [#allocation5], 0  ;;  %s16734_s2 = sld [smem:[#allocation13_spill]]  ;;  %s16735_s5 = sld [smem:[#allocation14_spill]]  ;;  %vm2597_vm4 = vcmask 123904   ;;  %vm2695_vm5 = vcmask 130048  }
 0x155   :  { %s16736_s11 = sld [smem:[#allocation11_spill]]  ;;  %s16737_s1 = sld [smem:[#allocation15_spill]]  ;;  %vm3040_vm8 = vcmask 254976   ;;  %vm3067_vm9 = vcmask 261120   ;;  %vm4164_vm10 = vcmask 58368   ;;  %vm4334_vm11 = vcmask 64512  }
 0x156   :  { %s16739_s10 = sld [smem:[#allocation16_spill]]  ;;  %s16740_s4 = sld [smem:[#allocation19_spill]] }
 0x157   :  { %s16741_s7 = sld [smem:[#allocation20_spill]] }
 0x15a   :  { %v2507_v3 = vld [vmem:[%s16734_s2 + $0x80] sm:$0xff]  ;;  %v2508_v4 = vld [vmem:[%s16734_s2 + $0x88] sm:$0xff]  ;;  %v2509_v8 = vld [vmem:[%s16734_s2 + $0x90] sm:$0xff] }
 0x15b   :  { %v2491_v5 = vld [vmem:[%s16734_s2] sm:$0xff]  ;;  %v10927_v6 = vpack.c.bf16 %v2508_v4, %v2507_v3  ;;  %v2492_v7 = vld [vmem:[%s16734_s2 + $0x8] sm:$0xff]  ;;  %v2510_v10 = vld [vmem:[%s16734_s2 + $0x98] sm:$0xff] }
 0x15c   :  { %v13589_v11 = vpack.c.bf16 %v2492_v7, %v2491_v5  ;;  %v13591_v12 = vpack.c.bf16 %v2510_v10, %v2509_v8  ;;  %v2493_v13 = vld [vmem:[%s16734_s2 + $0x10] sm:$0xff]  ;;  %v2494_v14 = vld [vmem:[%s16734_s2 + $0x18] sm:$0xff]  ;;  %v2511_v15 = vld [vmem:[%s16734_s2 + $0xa0] sm:$0xff] }
 0x15d   :  { %10928 = vmatprep.subr.bf16.mxu1 %v10927_v6  ;;  %v2512_v16 = vld [vmem:[%s16734_s2 + $0xa8] sm:$0xff]  ;;  %v13606_v17 = vpack.c.bf16 %v2494_v14, %v2493_v13  ;;  %v2495_v19 = vld [vmem:[%s16734_s2 + $0x20] sm:$0xff]  ;;  %v2513_v21 = vld [vmem:[%s16734_s2 + $0xb0] sm:$0xff] }
 0x15e   :  { %10930 = vmatpush3.bf16.msra.mxu1 %v13589_v11  ;;  %v13609_v18 = vpack.c.bf16 %v2512_v16, %v2511_v15  ;;  %v2496_v20 = vld [vmem:[%s16734_s2 + $0x28] sm:$0xff]  ;;  %v2514_v22 = vld [vmem:[%s16734_s2 + $0xb8] sm:$0xff]  ;;  %v2497_v26 = vld [vmem:[%s16734_s2 + $0x30] sm:$0xff] }
 0x15f   :  { %10932 = vmatprep.subr.bf16.mxu1 %v13591_v12  ;;  %v13624_v23 = vpack.c.bf16 %v2496_v20, %v2495_v19  ;;  %v13627_v9 = vpack.c.bf16 %v2514_v22, %v2513_v21  ;;  %v2498_v27 = vld [vmem:[%s16734_s2 + $0x38] sm:$0xff]  ;;  %v2515_v28 = vld [vmem:[%s16734_s2 + $0xc0] sm:$0xff]  ;;  %v2516_v29 = vld [vmem:[%s16734_s2 + $0xc8] sm:$0xff] }
 0x160   :  { %v13642_v30 = vpack.c.bf16 %v2498_v27, %v2497_v26  ;;  %v13645_v31 = vpack.c.bf16 %v2516_v29, %v2515_v28  ;;  %v2499_v32 = vld [vmem:[%s16734_s2 + $0x40] sm:$0xff]  ;;  %v2500_v33 = vld [vmem:[%s16734_s2 + $0x48] sm:$0xff]  ;;  %v2517_v34 = vld [vmem:[%s16734_s2 + $0xd0] sm:$0xff] }
 0x161   :  { %v2518_v35 = vld [vmem:[%s16734_s2 + $0xd8] sm:$0xff]  ;;  %v13660_v25 = vpack.c.bf16 %v2500_v33, %v2499_v32  ;;  %v2501_v37 = vld [vmem:[%s16734_s2 + $0x50] sm:$0xff]  ;;  %v2519_v38 = vld [vmem:[%s16734_s2 + $0xe0] sm:$0xff] }
 0x162   :  { %10934 = vmatpush3.bf16.msra.mxu1 %v13606_v17  ;;  %v13663_v36 = vpack.c.bf16 %v2518_v35, %v2517_v34  ;;  %v2502_v24 = vld [vmem:[%s16734_s2 + $0x58] sm:$0xff]  ;;  %v2520_v39 = vld [vmem:[%s16734_s2 + $0xe8] sm:$0xff]  ;;  %v2503_v42 = vld [vmem:[%s16734_s2 + $0x60] sm:$0xff] }
 0x163   :  { %10936 = vmatprep.subr.bf16.mxu1 %v13609_v18  ;;  %v13678_v40 = vpack.c.bf16 %v2502_v24, %v2501_v37  ;;  %v13681_v41 = vpack.c.bf16 %v2520_v39, %v2519_v38  ;;  %v2504_v44 = vld [vmem:[%s16734_s2 + $0x68] sm:$0xff]  ;;  %v2521_v45 = vld [vmem:[%s16734_s2 + $0xf0] sm:$0xff]  ;;  %v2522_v46 = vld [vmem:[%s16734_s2 + $0xf8] sm:$0xff] }
 0x164   :  { %v13696_v47 = vpack.c.bf16 %v2504_v44, %v2503_v42  ;;  %v13699_v48 = vpack.c.bf16 %v2522_v46, %v2521_v45  ;;  %v2505_v50 = vld [vmem:[%s16734_s2 + $0x70] sm:$0xff]  ;;  %v2506_v51 = vld [vmem:[%s16734_s2 + $0x78] sm:$0xff]  ;;  %v11782_v4 = vld [vmem:[%s16733_s8 + $0x100] ss:$8 sps:$4 sm:$0xff]   ;;  %s16742_s2 = sld [smem:[#allocation17_spill]] }
 0x165   :  { %v13708_v52 = vpack.c.bf16 %v2506_v51, %v2505_v50  ;;  %v11785_v8 = vld [vmem:[%s16733_s8 + $0x110] ss:$8 sps:$4 sm:$0xff]   ;;  %v11790_v10 = vld [vmem:[%s16733_s8 + $0x124] ss:$8 sps:$4 sm:$0xff]   ;;  %v11788_v13 = vld [vmem:[%s16733_s8 + $0x120] ss:$8 sps:$4 sm:$0xff]  }
 0x166   :  { %10938 = vmatpush3.bf16.msra.mxu1 %v13624_v23  ;;  %v11793_v14 = vld [vmem:[%s16733_s8 + $0x134] ss:$8 sps:$4 sm:$0xff]   ;;  %v11791_v15 = vld [vmem:[%s16733_s8 + $0x130] ss:$8 sps:$4 sm:$0xff]   ;;  %v11796_v16 = vld [vmem:[%s16733_s8 + $0x144] ss:$8 sps:$4 sm:$0xff]  }
 0x167   :  { %10940 = vmatprep.subr.bf16.mxu1 %v13627_v9  ;;  %v11794_v19 = vld [vmem:[%s16733_s8 + $0x140] ss:$8 sps:$4 sm:$0xff]   ;;  %v11799_v20 = vld [vmem:[%s16733_s8 + $0x154] ss:$8 sps:$4 sm:$0xff]   ;;  %v11797_v21 = vld [vmem:[%s16733_s8 + $0x150] ss:$8 sps:$4 sm:$0xff]  }
 0x168   :  { %v11802_v22 = vld [vmem:[%s16733_s8 + $0x164] ss:$8 sps:$4 sm:$0xff]   ;;  %v11800_v26 = vld [vmem:[%s16733_s8 + $0x160] ss:$8 sps:$4 sm:$0xff]   ;;  %v11805_v27 = vld [vmem:[%s16733_s8 + $0x174] ss:$8 sps:$4 sm:$0xff]  }
 0x169   :  { %v11803_v28 = vld [vmem:[%s16733_s8 + $0x170] ss:$8 sps:$4 sm:$0xff]   ;;  %v11808_v29 = vld [vmem:[%s16733_s8 + $0x184] ss:$8 sps:$4 sm:$0xff]   ;;  %v11806_v32 = vld [vmem:[%s16733_s8 + $0x180] ss:$8 sps:$4 sm:$0xff]  }
 0x16a   :  { %10942 = vmatpush3.bf16.msra.mxu1 %v13642_v30  ;;  %v11811_v33 = vld [vmem:[%s16733_s8 + $0x194] ss:$8 sps:$4 sm:$0xff]   ;;  %v11809_v34 = vld [vmem:[%s16733_s8 + $0x190] ss:$8 sps:$4 sm:$0xff]   ;;  %v11814_v35 = vld [vmem:[%s16733_s8 + $0x1a4] ss:$8 sps:$4 sm:$0xff]  }
 0x16b   :  { %10944 = vmatprep.subr.bf16.mxu1 %v13645_v31  ;;  %v11812_v37 = vld [vmem:[%s16733_s8 + $0x1a0] ss:$8 sps:$4 sm:$0xff]   ;;  %v11817_v24 = vld [vmem:[%s16733_s8 + $0x1b4] ss:$8 sps:$4 sm:$0xff]   ;;  %v11815_v38 = vld [vmem:[%s16733_s8 + $0x1b0] ss:$8 sps:$4 sm:$0xff]  }
 0x16c   :  { %v11820_v39 = vld [vmem:[%s16733_s8 + $0x1c4] ss:$8 sps:$4 sm:$0xff]   ;;  %v11818_v42 = vld [vmem:[%s16733_s8 + $0x1c0] ss:$8 sps:$4 sm:$0xff]   ;;  %v11823_v44 = vld [vmem:[%s16733_s8 + $0x1d4] ss:$8 sps:$4 sm:$0xff]  }
 0x16d   :  { %v11821_v45 = vld [vmem:[%s16733_s8 + $0x1d0] ss:$8 sps:$4 sm:$0xff]   ;;  %v11826_v46 = vld [vmem:[%s16733_s8 + $0x1e4] ss:$8 sps:$4 sm:$0xff]   ;;  %v11824_v50 = vld [vmem:[%s16733_s8 + $0x1e0] ss:$8 sps:$4 sm:$0xff]  }
 0x16e   :  { %10946 = vmatpush3.bf16.msra.mxu1 %v13660_v25  ;;  %v11829_v51 = vld [vmem:[%s16733_s8 + $0x1f4] ss:$8 sps:$4 sm:$0xff]  }
 0x16f   :  { %10948 = vmatprep.subr.bf16.mxu1 %v13663_v36 }
 0x172   :  { %10950 = vmatpush3.bf16.msra.mxu1 %v13678_v40 }
 0x173   :  { %10952 = vmatprep.subr.bf16.mxu1 %v13681_v41 }
 0x176   :  { %10954 = vmatpush3.bf16.msra.mxu1 %v13696_v47 }
 0x177   :  { %10956 = vmatprep.subr.bf16.mxu1 %v13699_v48 }
 0x17a   :  { %10958 = vmatpush3.bf16.msra.mxu1 %v13708_v52 }
 0x17b   :  { %10960 = vmatprep.subr.bf16.mxu1 %v10927_v6  ;;  %v11787_v6 = vld [vmem:[%s16733_s8 + $0x114] ss:$8 sps:$4 sm:$0xff]  }
 0x1e8   :  { %v1836_v53 = vpop.f32.mrb[0].mxu0  ;;  %v13712_v54 = vpop.f32.mrb[0].mxu1 }
 0x1e9   :  { %vm2007_vm0 = vcmp.ge.f32.partialorder %v1836_v53, 0.0  ;;  %v2011_v55 = vmul.f32 0.2, %v1836_v53  ;;  %v1838_v56 = vpop.f32.mrb[1].mxu0  ;;  %v2002_v57 = vpop.f32.mrb[1].mxu1  ;;  %vm2009_vm3 = vcmp.ge.f32.partialorder %v13712_v54, 0.0 }
 0x1ea   :  { %vm2008_vm1 = vcmp.ge.f32.partialorder %v1838_v56, 0.0  ;;  %v2012_v58 = vmul.f32 0.2, %v1838_v56  ;;  %v1840_v59 = vpop.f32.mrb[2].mxu0  ;;  %v2004_v60 = vpop.f32.mrb[2].mxu1  ;;  %vm2010_vm2 = vcmp.ge.f32.partialorder %v2002_v57, 0.0 }
 0x1eb   :  { %v2015_v61 = vsel %vm2007_vm0, %v1836_v53, %v2011_v55  ;;  %v2014_v62 = vmul.f32 0.2, %v2002_v57  ;;  %v1841_v63 = vpop.f32.mrb[3].mxu0  ;;  %v2005_v0 = vpop.f32.mrb[3].mxu1  ;;  %v2013_v53 = vmul.f32 0.2, %v13712_v54 }
 0x1ec   :  { %v2016_v1 = vsel %vm2008_vm1, %v1838_v56, %v2012_v58  ;;  %v2083_v5 = vpack.c.bf16 %v2015_v61, %v2015_v61  ;;  %v11827_v55 = vld [vmem:[%s16733_s8 + $0x1f0] ss:$8 sps:$4 sm:$0xff]   ;;  %s16743_s8 = sld [smem:[#allocation18_spill]] }
 0x1ed   :  { %v2084_v2 = vpack.c.bf16 %v2016_v1, %v2016_v1  ;;  %v2018_v3 = vsel %vm2010_vm2, %v2002_v57, %v2014_v62  ;;  %v2017_v56 = vsel %vm2009_vm3, %v13712_v54, %v2013_v53  ;;  %v11843_v53 = vld [vmem:[%s16737_s1 + $0x30] sm:$0xff]  }
 0x1ee   :  { %v2086_v7 = vpack.c.bf16 %v2018_v3, %v2018_v3  ;;  %v2085_v57 = vpack.c.bf16 %v2017_v56, %v2017_v56  ;;  %v11845_v56 = vld [vmem:[%s16737_s1 + $0x38] sm:$0xff]  }
 0x1ef   :  { %2439 = vmatprep.mubr.bf16.mxu0 %v2084_v2 }
 0x1f0   :  { %2440 = vmatmul.mubr.bf16.vlgmr.msra.gmra.mrb[4].mxu0 %v2083_v5 }
 0x1f1   :  { %2449 = vmatpush1.bf16.msra.mxu0 %v11782_v4  ;;  %2480 = vmatprep.mubr.bf16.mxu0 %v2086_v7 }
 0x1f2   :  { %2450 = vmatprep.subr.bf16.mxu0 %v11787_v6 }
 0x1f5   :  { %2451 = vmatpush1.bf16.msra.mxu0 %v11785_v8 }
 0x1f6   :  { %2452 = vmatprep.subr.bf16.mxu0 %v11790_v10 }
 0x1f9   :  { %2453 = vmatpush1.bf16.msra.mxu0 %v11788_v13 }
 0x1fa   :  { %2454 = vmatprep.subr.bf16.mxu0 %v11793_v14 }
 0x1fd   :  { %2455 = vmatpush1.bf16.msra.mxu0 %v11791_v15 }
 0x1fe   :  { %2456 = vmatprep.subr.bf16.mxu0 %v11796_v16 }
 0x201   :  { %2457 = vmatpush1.bf16.msra.mxu0 %v11794_v19 }
 0x202   :  { %2458 = vmatprep.subr.bf16.mxu0 %v11799_v20 }
 0x205   :  { %2459 = vmatpush1.bf16.msra.mxu0 %v11797_v21 }
 0x206   :  { %2460 = vmatprep.subr.bf16.mxu0 %v11802_v22  ;;  %v2489_v22 = vld [vmem:[%s16736_s11] sm:$0x1] }
 0x209   :  { %2461 = vmatpush1.bf16.msra.mxu0 %v11800_v26 }
 0x20a   :  { %2462 = vmatprep.subr.bf16.mxu0 %v11805_v27 }
 0x20d   :  { %2463 = vmatpush1.bf16.msra.mxu0 %v11803_v28  ;;  %v11830_v28 = vld [vmem:[%s16737_s1 + $0x40] sm:$0xff]  }
 0x20e   :  { %2464 = vmatprep.subr.bf16.mxu0 %v11808_v29 }
 0x211   :  { %2465 = vmatpush1.bf16.msra.mxu0 %v11806_v32 }
 0x212   :  { %2466 = vmatprep.subr.bf16.mxu0 %v11811_v33  ;;  %v11831_v33 = vld [vmem:[%s16737_s1] sm:$0xff]  }
 0x215   :  { %2467 = vmatpush1.bf16.msra.mxu0 %v11809_v34 }
 0x216   :  { %2468 = vmatprep.subr.bf16.mxu0 %v11814_v35  ;;  %v11832_v35 = vld [vmem:[%s16737_s1 + $0x48] sm:$0xff]  }
 0x219   :  { %2469 = vmatpush1.bf16.msra.mxu0 %v11812_v37  ;;  %v11833_v37 = vld [vmem:[%s16737_s1 + $0x8] sm:$0xff]  }
 0x21a   :  { %2470 = vmatprep.subr.bf16.mxu0 %v11817_v24  ;;  %v11834_v24 = vld [vmem:[%s16737_s1 + $0x50] sm:$0xff]  }
 0x21d   :  { %2471 = vmatpush1.bf16.msra.mxu0 %v11815_v38  ;;  %v11835_v38 = vld [vmem:[%s16737_s1 + $0x10] sm:$0xff]  }
 0x21e   :  { %2472 = vmatprep.subr.bf16.mxu0 %v11820_v39  ;;  %v11836_v39 = vld [vmem:[%s16737_s1 + $0x58] sm:$0xff]  }
 0x221   :  { %2473 = vmatpush1.bf16.msra.mxu0 %v11818_v42  ;;  %v11837_v42 = vld [vmem:[%s16737_s1 + $0x18] sm:$0xff]  }
 0x222   :  { %2474 = vmatprep.subr.bf16.mxu0 %v11823_v44  ;;  %v11838_v44 = vld [vmem:[%s16737_s1 + $0x60] sm:$0xff]  }
 0x225   :  { %2475 = vmatpush1.bf16.msra.mxu0 %v11821_v45  ;;  %v11839_v45 = vld [vmem:[%s16737_s1 + $0x20] sm:$0xff]  }
 0x226   :  { %2476 = vmatprep.subr.bf16.mxu0 %v11826_v46  ;;  %v11840_v46 = vld [vmem:[%s16737_s1 + $0x68] sm:$0xff]  }
 0x229   :  { %2477 = vmatpush1.bf16.msra.mxu0 %v11824_v50  ;;  %v11841_v50 = vld [vmem:[%s16737_s1 + $0x28] sm:$0xff]  }
 0x22a   :  { %2478 = vmatprep.subr.bf16.mxu0 %v11829_v51  ;;  %v11842_v51 = vld [vmem:[%s16737_s1 + $0x70] sm:$0xff]  }
 0x22d   :  { %2479 = vmatpush1.bf16.msra.mxu0 %v11827_v55  ;;  %v11844_v55 = vld [vmem:[%s16737_s1 + $0x78] sm:$0xff]  }
 0x230   :  { %2481 = vmatmul.mubr.bf16.vlgmr.msra.gmra.mrb[4].mxu0 %v2085_v57  ;;  %v11848_v57 = vld [vmem:[%s16739_s10 + $0x4] ss:$8 sps:$4 sm:$0xff]  }
 0x303   :  { %v13810_v58 = vpop.f32.mrb[4].mxu0 }
 0x304   :  { %v13812_v59 = vpop.f32.mrb[5].mxu0 }
 0x305   :  { %v2606_v60 = vmul.f32 %v13812_v59, %v13812_v59  ;;  %v2486_v61 = vpop.f32.mrb[6].mxu0  ;;  %2591 = vmatprep.mubr.f32.mxu1 %v13812_v59 }
 0x306   :  { %v2487_v62 = vpop.f32.mrb[7].mxu0  ;;  %2592 = vmatmul.mubr.f32.vlgmr.msra.gmra.mrb[4].mxu1 %v13810_v58 }
 0x307   :  { %10962 = vmatpush3.bf16.msra.mxu1 %v13589_v11  ;;  %2671 = vmatprep.mubr.f32.mxu1 %v2606_v60  ;;  %v2605_v11 = vmul.f32 %v13810_v58, %v13810_v58  ;;  %v13911_v60 = vsub.s32 0, %v12783_v43 }
 0x308   :  { %10964 = vmatprep.subr.bf16.mxu1 %v13591_v12  ;;  %v2524_v12 = vld [vmem:[%s16735_s5 + $0x8] sm:$0xff] }
 0x30b   :  { %10966 = vmatpush3.bf16.msra.mxu1 %v13606_v17  ;;  %v2526_v17 = vld [vmem:[%s16735_s5 + $0x18] sm:$0xff] }
 0x30c   :  { %10968 = vmatprep.subr.bf16.mxu1 %v13609_v18  ;;  %v2523_v18 = vld [vmem:[%s16735_s5] sm:$0xff] }
 0x30f   :  { %10970 = vmatpush3.bf16.msra.mxu1 %v13624_v23  ;;  %v10991_v23 = vpack.c.bf16 %v2526_v17, %v2524_v12 }
 0x310   :  { %10972 = vmatprep.subr.bf16.mxu1 %v13627_v9  ;;  %v2525_v9 = vld [vmem:[%s16735_s5 + $0x10] sm:$0xff]  ;;  %s16738_s5 = sld [smem:[#allocation12_spill]] }
 0x313   :  { %10974 = vmatpush3.bf16.msra.mxu1 %v13642_v30  ;;  %v12517_v30 = vmov 0.0  }
 0x314   :  { %10976 = vmatprep.subr.bf16.mxu1 %v13645_v31  ;;  %v10993_v31 = vpack.c.bf16 %v2525_v9, %v2523_v18 }
 0x316   :  { %v2490_v29 = vld [vmem:[%s16738_s5] sm:$0x1] }
 0x317   :  { %10978 = vmatpush3.bf16.msra.mxu1 %v13660_v25 }
 0x318   :  { %10980 = vmatprep.subr.bf16.mxu1 %v13663_v36 }
 0x31b   :  { %10982 = vmatpush3.bf16.msra.mxu1 %v13678_v40 }
 0x31c   :  { %10984 = vmatprep.subr.bf16.mxu1 %v13681_v41 }
 0x31f   :  { %10986 = vmatpush3.bf16.msra.mxu1 %v13696_v47 }
 0x320   :  { %10988 = vmatprep.subr.bf16.mxu1 %v13699_v48 }
 0x323   :  { %10990 = vmatpush3.bf16.msra.mxu1 %v13708_v52 }
 0x324   :  { %10992 = vmatprep.subr.bf16.mxu1 %v10991_v23 }
 0x326   :  { %2672 = vmatmul.mubr.f32.vlgmr.msra.gmra.mrb[6].mxu1 %v2605_v11 }
 0x327   :  { %2763 = vmatprep.mubr.f32.mxu1 %v12517_v30  ;;  %10994 = vmatpush1.bf16.msra.mxu1 %v10993_v31 }
 0x328   :  { %10996 = vmatprep.subr.bf16.mxu1 %v10991_v23 }
 0x3d9   :  { %v10565_v25 = vpop.f32.mrb[4].mxu1 }
 0x3da   :  { %v10566_v36 = vpop.f32.mrb[5].mxu1 }
 0x3db   :  { %v10567_v40 = vadd.f32 %v10566_v36, %v10565_v25 }
 0x3dd   :  { %v2598_v41 = vsel %vm2597_vm4, %v10567_v40, 0.0 }
 0x3de   :  { %v2599_v47 = vrot.slane %v2598_v41, 4 }
 0x3e0   :  { %v2600_v48 = vadd.f32 %v2599_v47, %v2598_v41 }
 0x3e2   :  { %v2601_v52 = vrot.slane %v2600_v48, 2 }
 0x3e4   :  { %v2602_v63 = vadd.f32 %v2601_v52, %v2600_v48 }
 0x3e6   :  { %v2603_v3 = vrot.slane %v2602_v63, 1 }
 0x3e8   :  { %v2604_v6 = vadd.f32 %v2603_v3, %v2602_v63  ;;  %v11849_v63 = vld [vmem:[%s16739_s10 + $0x10] ss:$8 sps:$4 sm:$0xff]   ;;  %v3114_v3 = vld [vmem:[%s16740_s4] sm:$0xff] }
 0x3ea   :  { %v2685_v10 = vmul.f32 0.03125, %v2604_v6  ;;  %v3132_v6 = vld [vmem:[%s16740_s4 + $0x90] sm:$0xff] }
 0x3ec   :  { %v2687_v15 = vmul.f32 %v2685_v10, %v2685_v10 }
 0x3f9   :  { %v10600_v54 = vpop.f32.mrb[6].mxu1 }
 0x3fa   :  { %v10601_v0 = vpop.f32.mrb[7].mxu1 }
 0x3fb   :  { %v10602_v1 = vadd.f32 %v10601_v0, %v10600_v54  ;;  %v11851_v54 = vld [vmem:[%s16739_s10 + $0x14] ss:$8 sps:$4 sm:$0xff]   ;;  %v12518_v0 = vmov 0  }
 0x3fd   :  { %v2677_v2 = vsel %vm2597_vm4, %v10602_v1, 0.0  ;;  %v3130_v1 = vld [vmem:[%s16740_s4 + $0x80] sm:$0xff] }
 0x3fe   :  { %v2678_v4 = vrot.slane %v2677_v2, 4 }
 0x400   :  { %v2679_v5 = vadd.f32 %v2678_v4, %v2677_v2  ;;  %v3131_v2 = vld [vmem:[%s16740_s4 + $0x88] sm:$0xff] }
 0x401   :  { %v10999_v4 = vpack.c.bf16 %v3131_v2, %v3130_v1  ;;  %v3149_v1 = vld [vmem:[%s16741_s7 + $0x18] sm:$0xff]  ;;  %v3146_v2 = vld [vmem:[%s16741_s7] sm:$0xff] }
 0x402   :  { %v2680_v7 = vrot.slane %v2679_v5, 2 }
 0x403   :  { %11032 = vmatprep.subr.bf16.mxu0 %v10999_v4 }
 0x404   :  { %v2681_v8 = vadd.f32 %v2680_v7, %v2679_v5  ;;  %v3115_v5 = vld [vmem:[%s16740_s4 + $0x8] sm:$0xff]  ;;  %v3133_v7 = vld [vmem:[%s16740_s4 + $0x98] sm:$0xff] }
 0x406   :  { %v2682_v13 = vrot.slane %v2681_v8, 1 }
 0x408   :  { %v2683_v14 = vadd.f32 %v2682_v13, %v2681_v8  ;;  %v13946_v8 = vpack.c.bf16 %v3115_v5, %v3114_v3  ;;  %v3116_v13 = vld [vmem:[%s16740_s4 + $0x10] sm:$0xff] }
 0x40a   :  { %v2686_v16 = vmul.f32 0.03125, %v2683_v14  ;;  %v3117_v14 = vld [vmem:[%s16740_s4 + $0x18] sm:$0xff]  ;;  %11034 = vmatpush3.bf16.msra.mxu0 %v13946_v8 }
 0x40c   :  { %v2688_v19 = vsub.f32 %v2686_v16, %v2687_v15  ;;  %v3134_v15 = vld [vmem:[%s16740_s4 + $0xa0] sm:$0xff]  ;;  %v3135_v16 = vld [vmem:[%s16740_s4 + $0xa8] sm:$0xff] }
 0x40e   :  { %v2689_v20 = vmax.f32 %v2688_v19, 0.0  ;;  %v11005_v19 = vpack.c.bf16 %v3117_v14, %v3116_v13  ;;  %v11869_v13 = vld [vmem:[%s16693_s13 + $0x4c] ss:$16 sps:$4 sm:$0xff]   ;;  %v11867_v14 = vld [vmem:[%s16693_s13 + $0x48] ss:$16 sps:$4 sm:$0xff]  }
 0x410   :  { %v2690_v21 = vadd.f32 1e-05, %v2689_v20  ;;  %v11007_v20 = vpack.c.bf16 %v3135_v16, %v3134_v15  ;;  %v11875_v15 = vld [vmem:[%s16693_s13 + $0x6c] ss:$16 sps:$4 sm:$0xff]   ;;  %v11873_v16 = vld [vmem:[%s16693_s13 + $0x68] ss:$16 sps:$4 sm:$0xff]  }
 0x412   :  { %12444 = vrsqrt.f32 %v2690_v21  ;;  %v3118_v21 = vld [vmem:[%s16740_s4 + $0x20] sm:$0xff] }
 0x41c   :  { %v12445_v26 = vpop.eup %12444 }
 0x41d   :  { %v2692_v27 = vmul.f32 %v12445_v26, %v2489_v22  ;;  %v3119_v22 = vld [vmem:[%s16740_s4 + $0x28] sm:$0xff]  ;;  %v3136_v26 = vld [vmem:[%s16740_s4 + $0xb0] sm:$0xff] }
 0x41f   :  { %9846 = vmatmul.mubr.msk.f32.vlgmr.msra.gmra.mrb[8].mxu1 %vm2695_vm5, %v2692_v27  ;;  %v2693_v32 = vmul.f32 %v2692_v27, %v2685_v10  ;;  %v11003_v10 = vpack.c.bf16 %v3133_v7, %v3132_v6  ;;  %v3137_v27 = vld [vmem:[%s16740_s4 + $0xb8] sm:$0xff] }
 0x420   :  { %10998 = vmatpush1.bf16.msra.mxu1 %v10993_v31  ;;  %2837 = vmatprep.mubr.f32.mxu1 %v12517_v30  ;;  %v11855_v6 = vld [vmem:[%s16693_s13 + $0x8] ss:$16 sps:$4 sm:$0xff]   ;;  %v11857_v7 = vld [vmem:[%s16693_s13 + $0xc] ss:$16 sps:$4 sm:$0xff]  }
 0x421   :  { %v2694_v34 = vsub.f32 %v2490_v29, %v2693_v32  ;;  %10603 = vmatprep.subr.bf16.mxu1 %v11830_v28  ;;  %11036 = vmatprep.subr.bf16.mxu0 %v11003_v10  ;;  %v11009_v28 = vpack.c.bf16 %v3119_v22, %v3118_v21  ;;  %v11011_v29 = vpack.c.bf16 %v3137_v27, %v3136_v26  ;;  %v3120_v32 = vld [vmem:[%s16740_s4 + $0x30] sm:$0xff]  ;;  %v11887_v21 = vld [vmem:[%s16693_s13 + $0xac] ss:$16 sps:$4 sm:$0xff]   ;;  %v11885_v22 = vld [vmem:[%s16693_s13 + $0xa8] ss:$16 sps:$4 sm:$0xff]  }
 0x422   :  { %11038 = vmatpush3.bf16.msra.mxu0 %v11005_v19  ;;  %v11893_v26 = vld [vmem:[%s16693_s13 + $0xcc] ss:$16 sps:$4 sm:$0xff]   ;;  %v11891_v27 = vld [vmem:[%s16693_s13 + $0xc8] ss:$16 sps:$4 sm:$0xff]  }
 0x423   :  { %9847 = vmatmul.mubr.msk.f32.vlgmr.msra.gmra.mrb[10].mxu1 %vm2695_vm5, %v2694_v34  ;;  %11040 = vmatprep.subr.bf16.mxu0 %v11007_v20  ;;  %v3138_v34 = vld [vmem:[%s16740_s4 + $0xc0] sm:$0xff] }
 0x424   :  { %10604 = vmatpush3.bf16.msra.mxu1 %v11831_v33  ;;  %v3121_v33 = vld [vmem:[%s16740_s4 + $0x38] sm:$0xff] }
 0x425   :  { %10605 = vmatprep.subr.bf16.mxu1 %v11832_v35  ;;  %v3139_v35 = vld [vmem:[%s16740_s4 + $0xc8] sm:$0xff] }
 0x426   :  { %11042 = vmatpush3.bf16.msra.mxu0 %v11009_v28 }
 0x427   :  { %11044 = vmatprep.subr.bf16.mxu0 %v11011_v29 }
 0x428   :  { %10606 = vmatpush3.bf16.msra.mxu1 %v11833_v37  ;;  %v11013_v37 = vpack.c.bf16 %v3121_v33, %v3120_v32  ;;  %v11905_v32 = vld [vmem:[%s16693_s13 + $0x10c] ss:$16 sps:$4 sm:$0xff]   ;;  %v11903_v33 = vld [vmem:[%s16693_s13 + $0x108] ss:$16 sps:$4 sm:$0xff]  }
 0x429   :  { %10607 = vmatprep.subr.bf16.mxu1 %v11834_v24  ;;  %v11015_v24 = vpack.c.bf16 %v3139_v35, %v3138_v34  ;;  %v11911_v34 = vld [vmem:[%s16693_s13 + $0x12c] ss:$16 sps:$4 sm:$0xff]   ;;  %v11909_v35 = vld [vmem:[%s16693_s13 + $0x128] ss:$16 sps:$4 sm:$0xff]  }
 0x42a   :  { %11046 = vmatpush3.bf16.msra.mxu0 %v11013_v37 }
 0x42b   :  { %11048 = vmatprep.subr.bf16.mxu0 %v11015_v24 }
 0x42c   :  { %10608 = vmatpush3.bf16.msra.mxu1 %v11835_v38  ;;  %v3122_v38 = vld [vmem:[%s16740_s4 + $0x40] sm:$0xff] }
 0x42d   :  { %10609 = vmatprep.subr.bf16.mxu1 %v11836_v39  ;;  %v3123_v39 = vld [vmem:[%s16740_s4 + $0x48] sm:$0xff] }
 0x430   :  { %10610 = vmatpush3.bf16.msra.mxu1 %v11837_v42  ;;  %v3140_v42 = vld [vmem:[%s16740_s4 + $0xd0] sm:$0xff] }
 0x431   :  { %10611 = vmatprep.subr.bf16.mxu1 %v11838_v44  ;;  %v3141_v44 = vld [vmem:[%s16740_s4 + $0xd8] sm:$0xff] }
 0x434   :  { %10612 = vmatpush3.bf16.msra.mxu1 %v11839_v45  ;;  %v11017_v45 = vpack.c.bf16 %v3123_v39, %v3122_v38  ;;  %v11923_v38 = vld [vmem:[%s16693_s13 + $0x16c] ss:$16 sps:$4 sm:$0xff]   ;;  %v11921_v39 = vld [vmem:[%s16693_s13 + $0x168] ss:$16 sps:$4 sm:$0xff]  }
 0x435   :  { %10613 = vmatprep.subr.bf16.mxu1 %v11840_v46  ;;  %v11019_v46 = vpack.c.bf16 %v3141_v44, %v3140_v42  ;;  %v11929_v42 = vld [vmem:[%s16693_s13 + $0x18c] ss:$16 sps:$4 sm:$0xff]   ;;  %v11927_v44 = vld [vmem:[%s16693_s13 + $0x188] ss:$16 sps:$4 sm:$0xff]  }
 0x436   :  { %11050 = vmatpush3.bf16.msra.mxu0 %v11017_v45 }
 0x437   :  { %11052 = vmatprep.subr.bf16.mxu0 %v11019_v46 }
 0x438   :  { %10614 = vmatpush3.bf16.msra.mxu1 %v11841_v50  ;;  %v3124_v50 = vld [vmem:[%s16740_s4 + $0x50] sm:$0xff] }
 0x439   :  { %10615 = vmatprep.subr.bf16.mxu1 %v11842_v51  ;;  %v3125_v51 = vld [vmem:[%s16740_s4 + $0x58] sm:$0xff] }
 0x43c   :  { %10616 = vmatpush3.bf16.msra.mxu1 %v11843_v53  ;;  %v3142_v53 = vld [vmem:[%s16740_s4 + $0xe0] sm:$0xff] }
 0x43d   :  { %10617 = vmatprep.subr.bf16.mxu1 %v11844_v55  ;;  %v3143_v55 = vld [vmem:[%s16740_s4 + $0xe8] sm:$0xff] }
 0x440   :  { %10618 = vmatpush3.bf16.msra.mxu1 %v11845_v56  ;;  %v11021_v56 = vpack.c.bf16 %v3125_v51, %v3124_v50 }
 0x441   :  { %3071 = vmatprep.subr.bf16.mxu1 %v11848_v57  ;;  %v11023_v57 = vpack.c.bf16 %v3143_v55, %v3142_v53 }
 0x442   :  { %11054 = vmatpush3.bf16.msra.mxu0 %v11021_v56 }
 0x443   :  { %11056 = vmatprep.subr.bf16.mxu0 %v11023_v57 }
 0x4f2   :  { %v2765_v61 = vpop.f32.mrb[8].mxu1 }
 0x4f3   :  { %v2847_v62 = vrot.slane %v2765_v61, %v13911_v60  ;;  %v2767_v11 = vpop.f32.mrb[9].mxu1  ;;  %v3126_v61 = vld [vmem:[%s16740_s4 + $0x60] sm:$0xff] }
 0x4f4   :  { %v2851_v12 = vrot.slane %v2767_v11, %v13911_v60  ;;  %v3144_v11 = vld [vmem:[%s16740_s4 + $0xf0] sm:$0xff] }
 0x4f5   :  { %v2852_v17 = vmul.f32 %v2847_v62, %v13810_v58  ;;  %v11846_v58 = vld [vmem:[%s16739_s10] ss:$8 sps:$4 sm:$0xff]  }
 0x4f6   :  { %v2853_v18 = vmul.f32 %v2851_v12, %v13812_v59  ;;  %v2839_v23 = vpop.f32.mrb[10].mxu1  ;;  %v3127_v62 = vld [vmem:[%s16740_s4 + $0x68] sm:$0xff]  ;;  %v3145_v12 = vld [vmem:[%s16740_s4 + $0xf8] sm:$0xff] }
 0x4f7   :  { %v2857_v9 = vrot.slane %v2839_v23, %v13911_v60  ;;  %v2841_v31 = vpop.f32.mrb[11].mxu1 }
 0x4f8   :  { %v2861_v25 = vrot.slane %v2841_v31, %v13911_v60 }
 0x4f9   :  { %v2862_v36 = vadd.f32 %v2857_v9, %v2852_v17  ;;  %v11025_v17 = vpack.c.bf16 %v3127_v62, %v3126_v61 }
 0x4fa   :  { %v2863_v40 = vadd.f32 %v2861_v25, %v2853_v18  ;;  %v11027_v18 = vpack.c.bf16 %v3145_v12, %v3144_v11 }
 0x4fb   :  { %vm2864_vm6 = vcmp.ge.f32.partialorder %v2862_v36, 0.0  ;;  %v2866_v43 = vmul.f32 0.2, %v2862_v36  ;;  %11058 = vmatpush3.bf16.msra.mxu0 %v11025_v17 }
 0x4fc   :  { %v2867_v41 = vmul.f32 0.2, %v2863_v40  ;;  %vm2865_vm7 = vcmp.ge.f32.partialorder %v2863_v40, 0.0  ;;  %11060 = vmatprep.subr.bf16.mxu0 %v11027_v18 }
 0x4fd   :  { %v2868_v47 = vsel %vm2864_vm6, %v2862_v36, %v2866_v43  ;;  %v3128_v43 = vld [vmem:[%s16740_s4 + $0x70] sm:$0xff] }
 0x4fe   :  { %v2869_v48 = vsel %vm2865_vm7, %v2863_v40, %v2867_v41  ;;  %v2902_v59 = vpack.c.bf16 %v2868_v47, %v2868_v47  ;;  %v3129_v41 = vld [vmem:[%s16740_s4 + $0x78] sm:$0xff] }
 0x4ff   :  { %v2903_v52 = vpack.c.bf16 %v2869_v48, %v2869_v48  ;;  %v11029_v47 = vpack.c.bf16 %v3129_v41, %v3128_v43 }
 0x501   :  { %3032 = vmatprep.mubr.bf16.mxu1 %v2903_v52  ;;  %11062 = vmatpush3.bf16.msra.mxu0 %v11029_v47 }
 0x502   :  { %3033 = vmatmul.mubr.bf16.vlgmr.msra.gmra.mrb[12].mxu1 %v2902_v59  ;;  %3913 = vmatprep.subr.bf16.mxu0 %v11857_v7 }
 0x503   :  { %3072 = vmatpush1.bf16.msra.mxu1 %v11846_v58  ;;  %3103 = vmatprep.mubr.bf16.mxu1 %v12518_v0  ;;  %v3147_v0 = vld [vmem:[%s16741_s7 + $0x8] sm:$0xff] }
 0x504   :  { %3073 = vmatprep.subr.bf16.mxu1 %v11851_v54  ;;  %v11063_v3 = vpack.c.bf16 %v3149_v1, %v3147_v0 }
 0x507   :  { %3074 = vmatpush1.bf16.msra.mxu1 %v11849_v63 }
 0x508   :  { %11000 = vmatprep.subr.bf16.mxu1 %v10999_v4  ;;  %v3148_v4 = vld [vmem:[%s16741_s7 + $0x10] sm:$0xff] }
 0x509   :  { %v14052_v5 = vpack.c.bf16 %v3148_v4, %v3146_v2  ;;  %v11854_v2 = vld [vmem:[%s16693_s13 + $0x4] ss:$16 sps:$4 sm:$0xff]  }
 0x5d5   :  { %v10619_v23 = vpop.f32.mrb[12].mxu1 }
 0x5d6   :  { %v10620_v9 = vpop.f32.mrb[13].mxu1 }
 0x5d7   :  { %v10621_v31 = vadd.f32 %v10620_v9, %v10619_v23  ;;  %v10622_v25 = vpop.f32.mrb[14].mxu1 }
 0x5d8   :  { %v10623_v36 = vpop.f32.mrb[15].mxu1 }
 0x5d9   :  { %v3046_v40 = vpack.c.bf16 %v10621_v31, %v10621_v31  ;;  %3041 = vst.msk [vmem:[#allocation2] sm:$0x3] %vm3040_vm8, %v10621_v31 }
 0x5db   :  { %9868 = vmatmul.mubr.msk.bf16.vlgmr.msra.gmra.mrb[16].mxu1 %vm3067_vm9, %v3046_v40 }
 0x5dc   :  { %11002 = vmatpush3.bf16.msra.mxu1 %v13946_v8  ;;  %v11863_v8 = vld [vmem:[%s16693_s13 + $0x2c] ss:$16 sps:$4 sm:$0xff]  }
 0x5dd   :  { %11004 = vmatprep.subr.bf16.mxu1 %v11003_v10  ;;  %v11861_v10 = vld [vmem:[%s16693_s13 + $0x28] ss:$16 sps:$4 sm:$0xff]  }
 0x5e0   :  { %11006 = vmatpush3.bf16.msra.mxu1 %v11005_v19  ;;  %v11881_v19 = vld [vmem:[%s16693_s13 + $0x8c] ss:$16 sps:$4 sm:$0xff]  }
 0x5e1   :  { %11008 = vmatprep.subr.bf16.mxu1 %v11007_v20  ;;  %v11879_v20 = vld [vmem:[%s16693_s13 + $0x88] ss:$16 sps:$4 sm:$0xff]  }
 0x5e4   :  { %11010 = vmatpush3.bf16.msra.mxu1 %v11009_v28  ;;  %v11899_v28 = vld [vmem:[%s16693_s13 + $0xec] ss:$16 sps:$4 sm:$0xff]  }
 0x5e5   :  { %11012 = vmatprep.subr.bf16.mxu1 %v11011_v29  ;;  %v11897_v29 = vld [vmem:[%s16693_s13 + $0xe8] ss:$16 sps:$4 sm:$0xff]  }
 0x5e8   :  { %11014 = vmatpush3.bf16.msra.mxu1 %v11013_v37  ;;  %v11917_v37 = vld [vmem:[%s16693_s13 + $0x14c] ss:$16 sps:$4 sm:$0xff]  }
 0x5e9   :  { %11016 = vmatprep.subr.bf16.mxu1 %v11015_v24  ;;  %v11915_v24 = vld [vmem:[%s16693_s13 + $0x148] ss:$16 sps:$4 sm:$0xff]  }
 0x5ec   :  { %11018 = vmatpush3.bf16.msra.mxu1 %v11017_v45 }
 0x5ed   :  { %11020 = vmatprep.subr.bf16.mxu1 %v11019_v46 }
 0x5f0   :  { %11022 = vmatpush3.bf16.msra.mxu1 %v11021_v56 }
 0x5f1   :  { %11024 = vmatprep.subr.bf16.mxu1 %v11023_v57 }
 0x5f4   :  { %11026 = vmatpush3.bf16.msra.mxu1 %v11025_v17 }
 0x5f5   :  { %11028 = vmatprep.subr.bf16.mxu1 %v11027_v18 }
 0x5f8   :  { %11030 = vmatpush3.bf16.msra.mxu1 %v11029_v47 }
 0x5f9   :  { %11064 = vmatprep.subr.bf16.mxu1 %v11063_v3 }
 0x6ae   :  { %v14029_v48 = vpop.f32.mrb[16].mxu1 }
 0x6af   :  { %v14031_v52 = vpop.f32.mrb[17].mxu1  ;;  %v3227_v54 = vmul.f32 %v14029_v48, %v14029_v48 }
 0x6b0   :  { %v3228_v58 = vmul.f32 %v14031_v52, %v14031_v52  ;;  %v3109_v59 = vpop.f32.mrb[18].mxu1  ;;  %3214 = vmatprep.mubr.f32.mxu1 %v14031_v52 }
 0x6b1   :  { %v3110_v63 = vpop.f32.mrb[19].mxu1  ;;  %3215 = vmatmul.mubr.f32.vlgmr.msra.gmra.mrb[20].mxu1 %v14029_v48 }
 0x6b2   :  { %3293 = vmatprep.mubr.f32.mxu0 %v3228_v58  ;;  %3383 = vmatprep.mubr.f32.mxu1 %v12517_v30  ;;  %v3112_v63 = vld [vmem:[%s16742_s2] sm:$0x1] }
 0x6b3   :  { %3294 = vmatmul.mubr.f32.vlgmr.msra.gmra.mrb[8].mxu0 %v3227_v54  ;;  %11066 = vmatpush1.bf16.msra.mxu1 %v14052_v5 }
 0x6b4   :  { %11068 = vmatprep.subr.bf16.mxu1 %v11063_v3  ;;  %3914 = vmatpush1.bf16.msra.mxu0 %v11855_v6  ;;  %v3113_v3 = vld [vmem:[%s16743_s8] sm:$0x1] }
 0x6b5   :  { %3915 = vmatprep.subr.bf16.mxu0 %v11863_v8  ;;  %v11852_v6 = vld [vmem:[%s16693_s13] ss:$16 sps:$4 sm:$0xff]   ;;  %v11860_v8 = vld [vmem:[%s16693_s13 + $0x24] ss:$16 sps:$4 sm:$0xff]  }
 0x6b8   :  { %3916 = vmatpush1.bf16.msra.mxu0 %v11861_v10  ;;  %v11858_v10 = vld [vmem:[%s16693_s13 + $0x20] ss:$16 sps:$4 sm:$0xff]  }
 0x6b9   :  { %3917 = vmatprep.subr.bf16.mxu0 %v11869_v13  ;;  %v11864_v13 = vld [vmem:[%s16693_s13 + $0x40] ss:$16 sps:$4 sm:$0xff]  }
 0x6bc   :  { %3918 = vmatpush1.bf16.msra.mxu0 %v11867_v14  ;;  %v11872_v14 = vld [vmem:[%s16693_s13 + $0x64] ss:$16 sps:$4 sm:$0xff]  }
 0x6bd   :  { %3919 = vmatprep.subr.bf16.mxu0 %v11875_v15  ;;  %v11870_v15 = vld [vmem:[%s16693_s13 + $0x60] ss:$16 sps:$4 sm:$0xff]  }
 0x6c0   :  { %3920 = vmatpush1.bf16.msra.mxu0 %v11873_v16  ;;  %v11878_v16 = vld [vmem:[%s16693_s13 + $0x84] ss:$16 sps:$4 sm:$0xff]  }
 0x6c1   :  { %3921 = vmatprep.subr.bf16.mxu0 %v11881_v19  ;;  %v11876_v19 = vld [vmem:[%s16693_s13 + $0x80] ss:$16 sps:$4 sm:$0xff]  }
 0x6c4   :  { %3922 = vmatpush1.bf16.msra.mxu0 %v11879_v20  ;;  %v11884_v20 = vld [vmem:[%s16693_s13 + $0xa4] ss:$16 sps:$4 sm:$0xff]  }
 0x6c5   :  { %3923 = vmatprep.subr.bf16.mxu0 %v11887_v21  ;;  %v11882_v21 = vld [vmem:[%s16693_s13 + $0xa0] ss:$16 sps:$4 sm:$0xff]  }
 0x6c8   :  { %3924 = vmatpush1.bf16.msra.mxu0 %v11885_v22  ;;  %v11890_v22 = vld [vmem:[%s16693_s13 + $0xc4] ss:$16 sps:$4 sm:$0xff]  }
 0x6c9   :  { %3925 = vmatprep.subr.bf16.mxu0 %v11893_v26  ;;  %v11888_v26 = vld [vmem:[%s16693_s13 + $0xc0] ss:$16 sps:$4 sm:$0xff]  }
 0x6cc   :  { %3926 = vmatpush1.bf16.msra.mxu0 %v11891_v27  ;;  %v11896_v27 = vld [vmem:[%s16693_s13 + $0xe4] ss:$16 sps:$4 sm:$0xff]  }
 0x6cd   :  { %3927 = vmatprep.subr.bf16.mxu0 %v11899_v28  ;;  %v11894_v28 = vld [vmem:[%s16693_s13 + $0xe0] ss:$16 sps:$4 sm:$0xff]  }
 0x6d0   :  { %3928 = vmatpush1.bf16.msra.mxu0 %v11897_v29  ;;  %v11902_v29 = vld [vmem:[%s16693_s13 + $0x104] ss:$16 sps:$4 sm:$0xff]  }
 0x6d1   :  { %3929 = vmatprep.subr.bf16.mxu0 %v11905_v32  ;;  %v11900_v32 = vld [vmem:[%s16693_s13 + $0x100] ss:$16 sps:$4 sm:$0xff]  }
 0x6d4   :  { %3930 = vmatpush1.bf16.msra.mxu0 %v11903_v33  ;;  %v11908_v33 = vld [vmem:[%s16693_s13 + $0x124] ss:$16 sps:$4 sm:$0xff]  }
 0x6d5   :  { %3931 = vmatprep.subr.bf16.mxu0 %v11911_v34  ;;  %v11906_v34 = vld [vmem:[%s16693_s13 + $0x120] ss:$16 sps:$4 sm:$0xff]  }
 0x6d8   :  { %3932 = vmatpush1.bf16.msra.mxu0 %v11909_v35  ;;  %v11914_v35 = vld [vmem:[%s16693_s13 + $0x144] ss:$16 sps:$4 sm:$0xff]  }
 0x6d9   :  { %3933 = vmatprep.subr.bf16.mxu0 %v11917_v37  ;;  %v11912_v37 = vld [vmem:[%s16693_s13 + $0x140] ss:$16 sps:$4 sm:$0xff]  }
 0x6dc   :  { %3934 = vmatpush1.bf16.msra.mxu0 %v11915_v24  ;;  %v11920_v24 = vld [vmem:[%s16693_s13 + $0x164] ss:$16 sps:$4 sm:$0xff]  }
 0x6dd   :  { %3935 = vmatprep.subr.bf16.mxu0 %v11923_v38  ;;  %v11918_v38 = vld [vmem:[%s16693_s13 + $0x160] ss:$16 sps:$4 sm:$0xff]  }
 0x6e0   :  { %3936 = vmatpush1.bf16.msra.mxu0 %v11921_v39  ;;  %v11926_v39 = vld [vmem:[%s16693_s13 + $0x184] ss:$16 sps:$4 sm:$0xff]  }
 0x6e1   :  { %3937 = vmatprep.subr.bf16.mxu0 %v11929_v42  ;;  %v11924_v42 = vld [vmem:[%s16693_s13 + $0x180] ss:$16 sps:$4 sm:$0xff]  }
 0x6e4   :  { %3938 = vmatpush1.bf16.msra.mxu0 %v11927_v44  ;;  %v11932_v44 = vld [vmem:[%s16693_s13 + $0x1a4] ss:$16 sps:$4 sm:$0xff]  }
 0x784   :  { %v10657_v45 = vpop.f32.mrb[20].mxu1 }
 0x785   :  { %v10658_v46 = vpop.f32.mrb[21].mxu1 }
 0x786   :  { %v10659_v50 = vadd.f32 %v10658_v46, %v10657_v45  ;;  %v10692_v51 = vpop.f32.mrb[8].mxu0  ;;  %v11935_v45 = vld [vmem:[%s16693_s13 + $0x1ac] ss:$16 sps:$4 sm:$0xff]   ;;  %v11930_v46 = vld [vmem:[%s16693_s13 + $0x1a0] ss:$16 sps:$4 sm:$0xff]  }
 0x787   :  { %v10693_v53 = vpop.f32.mrb[9].mxu0  ;;  %3939 = vmatprep.subr.bf16.mxu0 %v11935_v45  ;;  %v3978_v45 = vld [vmem:[%s16696_s16 + $0xb0] sm:$0xff] }
 0x788   :  { %v3220_v55 = vsel %vm2597_vm4, %v10659_v50, 0.0  ;;  %v10694_v56 = vadd.f32 %v10693_v53, %v10692_v51  ;;  %v11933_v50 = vld [vmem:[%s16693_s13 + $0x1a8] ss:$16 sps:$4 sm:$0xff]   ;;  %v11938_v51 = vld [vmem:[%s16693_s13 + $0x1c4] ss:$16 sps:$4 sm:$0xff]  }
 0x789   :  { %v3221_v57 = vrot.slane %v3220_v55, 4  ;;  %3940 = vmatpush1.bf16.msra.mxu0 %v11933_v50  ;;  %v11941_v53 = vld [vmem:[%s16693_s13 + $0x1cc] ss:$16 sps:$4 sm:$0xff]   ;;  %v4010_v50 = vld [vmem:[%s16696_s16 + $0x1b0] sm:$0xff] }
 0x78a   :  { %v3299_v61 = vsel %vm2597_vm4, %v10694_v56, 0.0  ;;  %v11939_v56 = vld [vmem:[%s16693_s13 + $0x1c8] ss:$16 sps:$4 sm:$0xff]   ;;  %3941 = vmatprep.subr.bf16.mxu0 %v11941_v53 }
 0x78b   :  { %v3222_v62 = vadd.f32 %v3221_v57, %v3220_v55  ;;  %v3300_v11 = vrot.slane %v3299_v61, 4  ;;  %v11936_v55 = vld [vmem:[%s16693_s13 + $0x1c0] ss:$16 sps:$4 sm:$0xff]   ;;  %v11944_v57 = vld [vmem:[%s16693_s13 + $0x1e4] ss:$16 sps:$4 sm:$0xff]  }
 0x78d   :  { %v3223_v12 = vrot.slane %v3222_v62, 2  ;;  %v3301_v17 = vadd.f32 %v3300_v11, %v3299_v61  ;;  %3942 = vmatpush1.bf16.msra.mxu0 %v11939_v56  ;;  %v11947_v61 = vld [vmem:[%s16693_s13 + $0x1ec] ss:$16 sps:$4 sm:$0xff]   ;;  %v11945_v11 = vld [vmem:[%s16693_s13 + $0x1e8] ss:$16 sps:$4 sm:$0xff]   ;;  %v3962_v56 = vld [vmem:[%s16696_s16 + $0x30] sm:$0xff] }
 0x78e   :  { %3943 = vmatprep.subr.bf16.mxu0 %v11947_v61 }
 0x78f   :  { %v3224_v18 = vadd.f32 %v3223_v12, %v3222_v62  ;;  %v3302_v23 = vrot.slane %v3301_v17, 2  ;;  %v11942_v62 = vld [vmem:[%s16693_s13 + $0x1e0] ss:$16 sps:$4 sm:$0xff]  }
 0x790   :  { %v3972_v12 = vld [vmem:[%s16696_s16 + $0x80] sm:$0xff] }
 0x791   :  { %v3225_v9 = vrot.slane %v3224_v18, 1  ;;  %v3303_v31 = vadd.f32 %v3302_v23, %v3301_v17  ;;  %3944 = vmatpush1.bf16.msra.mxu0 %v11945_v11  ;;  %v3973_v17 = vld [vmem:[%s16696_s16 + $0x88] sm:$0xff]  ;;  %v3994_v11 = vld [vmem:[%s16696_s16 + $0x130] sm:$0xff] }
 0x792   :  { %v14268_v23 = vpack.c.bf16 %v3973_v17, %v3972_v12  ;;  %v3995_v12 = vld [vmem:[%s16696_s16 + $0x138] sm:$0xff]  ;;  %v3980_v17 = vld [vmem:[%s16696_s16 + $0xc0] sm:$0xff] }
 0x793   :  { %v3226_v25 = vadd.f32 %v3225_v9, %v3224_v18  ;;  %v3304_v36 = vrot.slane %v3303_v31, 1  ;;  %v4004_v18 = vld [vmem:[%s16696_s16 + $0x180] sm:$0xff]  ;;  %v4005_v9 = vld [vmem:[%s16696_s16 + $0x188] sm:$0xff] }
 0x795   :  { %v3306_v40 = vmul.f32 0.03125, %v3226_v25  ;;  %v3305_v43 = vadd.f32 %v3304_v36, %v3303_v31  ;;  %v14273_v31 = vpack.c.bf16 %v4005_v9, %v4004_v18  ;;  %v3981_v18 = vld [vmem:[%s16696_s16 + $0xc8] sm:$0xff]  ;;  %v4012_v9 = vld [vmem:[%s16696_s16 + $0x1c0] sm:$0xff] }
 0x797   :  { %v3308_v41 = vmul.f32 %v3306_v40, %v3306_v40  ;;  %v3307_v47 = vmul.f32 0.03125, %v3305_v43  ;;  %11104 = vmatprep.subr.bf16.mxu0 %v14273_v31 }
 0x799   :  { %v3309_v58 = vsub.f32 %v3307_v47, %v3308_v41 }
 0x79b   :  { %v3310_v59 = vmax.f32 %v3309_v58, 0.0 }
 0x79d   :  { %v3311_v54 = vadd.f32 1e-05, %v3310_v59 }
 0x79f   :  { %12446 = vrsqrt.f32 %v3311_v54 }
 0x7a9   :  { %v12447_v0 = vpop.eup %12446 }
 0x7aa   :  { %v3313_v1 = vmul.f32 %v12447_v0, %v3112_v63 }
 0x7ac   :  { %9869 = vmatmul.mubr.msk.f32.vlgmr.msra.gmra.mrb[22].mxu1 %vm2695_vm5, %v3313_v1  ;;  %v3314_v4 = vmul.f32 %v3313_v1, %v3306_v40 }
 0x7ad   :  { %11070 = vmatpush1.bf16.msra.mxu1 %v14052_v5  ;;  %3457 = vmatprep.mubr.f32.mxu1 %v12517_v30  ;;  %v11866_v5 = vld [vmem:[%s16693_s13 + $0x44] ss:$16 sps:$4 sm:$0xff]  }
 0x7ae   :  { %v3315_v7 = vsub.f32 %v3113_v3, %v3314_v4  ;;  %3872 = vmatprep.subr.bf16.mxu1 %v11854_v2  ;;  %v3956_v2 = vld [vmem:[%s16696_s16] sm:$0xff]  ;;  %v3957_v3 = vld [vmem:[%s16696_s16 + $0x8] sm:$0xff] }
 0x7b0   :  { %9870 = vmatmul.mubr.msk.f32.vlgmr.msra.gmra.mrb[24].mxu1 %vm2695_vm5, %v3315_v7 }
 0x7b1   :  { %3873 = vmatpush1.bf16.msra.mxu1 %v11852_v6  ;;  %v3974_v6 = vld [vmem:[%s16696_s16 + $0x90] sm:$0xff] }
 0x7b2   :  { %3874 = vmatprep.subr.bf16.mxu1 %v11860_v8  ;;  %v3975_v8 = vld [vmem:[%s16696_s16 + $0x98] sm:$0xff] }
 0x7b5   :  { %3875 = vmatpush1.bf16.msra.mxu1 %v11858_v10  ;;  %v4006_v10 = vld [vmem:[%s16696_s16 + $0x190] sm:$0xff] }
 0x7b6   :  { %3876 = vmatprep.subr.bf16.mxu1 %v11866_v5  ;;  %v4007_v5 = vld [vmem:[%s16696_s16 + $0x198] sm:$0xff] }
 0x7b9   :  { %3877 = vmatpush1.bf16.msra.mxu1 %v11864_v13 }
 0x7ba   :  { %3878 = vmatprep.subr.bf16.mxu1 %v11872_v14  ;;  %v14307_v14 = vpack.c.bf16 %v3957_v3, %v3956_v2  ;;  %v4015_v2 = vld [vmem:[%s16696_s16 + $0x1d8] sm:$0xff] }
 0x7bd   :  { %3879 = vmatpush1.bf16.msra.mxu1 %v11870_v15 }
 0x7be   :  { %3880 = vmatprep.subr.bf16.mxu1 %v11878_v16  ;;  %v3958_v16 = vld [vmem:[%s16696_s16 + $0x10] sm:$0xff] }
 0x7c1   :  { %3881 = vmatpush1.bf16.msra.mxu1 %v11876_v19  ;;  %v3959_v19 = vld [vmem:[%s16696_s16 + $0x18] sm:$0xff] }
 0x7c2   :  { %3882 = vmatprep.subr.bf16.mxu1 %v11884_v20 }
 0x7c5   :  { %3883 = vmatpush1.bf16.msra.mxu1 %v11882_v21  ;;  %v14317_v21 = vpack.c.bf16 %v3975_v8, %v3974_v6  ;;  %v3998_v8 = vld [vmem:[%s16696_s16 + $0x150] sm:$0xff] }
 0x7c6   :  { %3884 = vmatprep.subr.bf16.mxu1 %v11890_v22  ;;  %v14319_v22 = vpack.c.bf16 %v4007_v5, %v4006_v10  ;;  %v3999_v10 = vld [vmem:[%s16696_s16 + $0x158] sm:$0xff]  ;;  %v3984_v5 = vld [vmem:[%s16696_s16 + $0xe0] sm:$0xff] }
 0x7c9   :  { %3885 = vmatpush1.bf16.msra.mxu1 %v11888_v26  ;;  %v3990_v26 = vld [vmem:[%s16696_s16 + $0x110] sm:$0xff] }
 0x7ca   :  { %3886 = vmatprep.subr.bf16.mxu1 %v11896_v27  ;;  %v3991_v27 = vld [vmem:[%s16696_s16 + $0x118] sm:$0xff] }
 0x7cd   :  { %3887 = vmatpush1.bf16.msra.mxu1 %v11894_v28  ;;  %v3976_v28 = vld [vmem:[%s16696_s16 + $0xa0] sm:$0xff] }
 0x7ce   :  { %3888 = vmatprep.subr.bf16.mxu1 %v11902_v29  ;;  %v3977_v29 = vld [vmem:[%s16696_s16 + $0xa8] sm:$0xff] }
 0x7d1   :  { %3889 = vmatpush1.bf16.msra.mxu1 %v11900_v32  ;;  %v4008_v32 = vld [vmem:[%s16696_s16 + $0x1a0] sm:$0xff] }
 0x7d2   :  { %3890 = vmatprep.subr.bf16.mxu1 %v11908_v33  ;;  %v4009_v33 = vld [vmem:[%s16696_s16 + $0x1a8] sm:$0xff] }
 0x7d5   :  { %3891 = vmatpush1.bf16.msra.mxu1 %v11906_v34  ;;  %v14341_v34 = vpack.c.bf16 %v3959_v19, %v3958_v16  ;;  %v4016_v16 = vld [vmem:[%s16696_s16 + $0x1e0] sm:$0xff]  ;;  %v4017_v19 = vld [vmem:[%s16696_s16 + $0x1e8] sm:$0xff] }
 0x7d6   :  { %3892 = vmatprep.subr.bf16.mxu1 %v11914_v35  ;;  %v14343_v35 = vpack.c.bf16 %v3991_v27, %v3990_v26  ;;  %v14487_v26 = vpack.c.bf16 %v3999_v10, %v3998_v8  ;;  %v3968_v27 = vld [vmem:[%s16696_s16 + $0x60] sm:$0xff] }
 0x7d9   :  { %3893 = vmatpush1.bf16.msra.mxu1 %v11912_v37  ;;  %v3960_v37 = vld [vmem:[%s16696_s16 + $0x20] sm:$0xff] }
 0x7da   :  { %3894 = vmatprep.subr.bf16.mxu1 %v11920_v24  ;;  %v3961_v24 = vld [vmem:[%s16696_s16 + $0x28] sm:$0xff] }
 0x7db   :  { %v14377_v53 = vpack.c.bf16 %v3961_v24, %v3960_v37  ;;  %v4001_v37 = vld [vmem:[%s16696_s16 + $0x168] sm:$0xff]  ;;  %v3986_v24 = vld [vmem:[%s16696_s16 + $0xf0] sm:$0xff] }
 0x7dd   :  { %3895 = vmatpush1.bf16.msra.mxu1 %v11918_v38  ;;  %v14353_v38 = vpack.c.bf16 %v3977_v29, %v3976_v28  ;;  %v3969_v28 = vld [vmem:[%s16696_s16 + $0x68] sm:$0xff] }
 0x7de   :  { %3896 = vmatprep.subr.bf16.mxu1 %v11926_v39  ;;  %v14355_v39 = vpack.c.bf16 %v4009_v33, %v4008_v32  ;;  %v14499_v32 = vpack.c.bf16 %v4017_v19, %v4016_v16  ;;  %v4000_v33 = vld [vmem:[%s16696_s16 + $0x160] sm:$0xff] }
 0x7e1   :  { %3897 = vmatpush1.bf16.msra.mxu1 %v11924_v42  ;;  %v3992_v42 = vld [vmem:[%s16696_s16 + $0x120] sm:$0xff] }
 0x7e2   :  { %3898 = vmatprep.subr.bf16.mxu1 %v11932_v44  ;;  %v3993_v44 = vld [vmem:[%s16696_s16 + $0x128] sm:$0xff] }
 0x7e5   :  { %3899 = vmatpush1.bf16.msra.mxu1 %v11930_v46  ;;  %v3979_v46 = vld [vmem:[%s16696_s16 + $0xb8] sm:$0xff] }
 0x7e6   :  { %3900 = vmatprep.subr.bf16.mxu1 %v11938_v51  ;;  %v4011_v51 = vld [vmem:[%s16696_s16 + $0x1b8] sm:$0xff]  ;;  %v14389_v61 = vpack.c.bf16 %v3979_v46, %v3978_v45  ;;  %v11097_v46 = vpack.c.bf16 %v3969_v28, %v3968_v27 }
 0x7e7   :  { %v4019_v45 = vld [vmem:[%s16696_s16 + $0x1f8] sm:$0xff] }
 0x7e9   :  { %3901 = vmatpush1.bf16.msra.mxu1 %v11936_v55  ;;  %v14379_v55 = vpack.c.bf16 %v3993_v44, %v3992_v42  ;;  %v3987_v42 = vld [vmem:[%s16696_s16 + $0xf8] sm:$0xff]  ;;  %v4018_v44 = vld [vmem:[%s16696_s16 + $0x1f0] sm:$0xff] }
 0x7ea   :  { %3902 = vmatprep.subr.bf16.mxu1 %v11944_v57  ;;  %v3963_v57 = vld [vmem:[%s16696_s16 + $0x38] sm:$0xff] }
 0x7ed   :  { %3903 = vmatpush1.bf16.msra.mxu1 %v11942_v62  ;;  %v14391_v62 = vpack.c.bf16 %v4011_v51, %v4010_v50  ;;  %v11129_v50 = vpack.c.bf16 %v4001_v37, %v4000_v33  ;;  %v3970_v51 = vld [vmem:[%s16696_s16 + $0x70] sm:$0xff] }
 0x7ee   :  { %11072 = vmatprep.subr.bf16.mxu1 %v14268_v23 }
 0x87f   :  { %v3385_v25 = vpop.f32.mrb[22].mxu1 }
 0x880   :  { %v3467_v36 = vrot.slane %v3385_v25, %v13911_v60  ;;  %v3387_v40 = vpop.f32.mrb[23].mxu1  ;;  %v4013_v25 = vld [vmem:[%s16696_s16 + $0x1c8] sm:$0xff] }
 0x881   :  { %v3471_v43 = vrot.slane %v3387_v40, %v13911_v60  ;;  %v14415_v40 = vpack.c.bf16 %v3995_v12, %v3994_v11  ;;  %v3971_v11 = vld [vmem:[%s16696_s16 + $0x78] sm:$0xff]  ;;  %v4002_v12 = vld [vmem:[%s16696_s16 + $0x170] sm:$0xff] }
 0x882   :  { %v3472_v41 = vmul.f32 %v3467_v36, %v14029_v48  ;;  %v3988_v48 = vld [vmem:[%s16696_s16 + $0x100] sm:$0xff]  ;;  %v14413_v36 = vpack.c.bf16 %v3963_v57, %v3962_v56  ;;  %v11099_v56 = vpack.c.bf16 %v3987_v42, %v3986_v24  ;;  %v11131_v57 = vpack.c.bf16 %v4019_v45, %v4018_v44 }
 0x883   :  { %v3473_v47 = vmul.f32 %v3471_v43, %v14031_v52  ;;  %v3459_v58 = vpop.f32.mrb[24].mxu1  ;;  %v3989_v52 = vld [vmem:[%s16696_s16 + $0x108] sm:$0xff]  ;;  %v3964_v43 = vld [vmem:[%s16696_s16 + $0x40] sm:$0xff] }
 0x884   :  { %v3477_v59 = vrot.slane %v3459_v58, %v13911_v60  ;;  %v3461_v54 = vpop.f32.mrb[25].mxu1  ;;  %v14309_v15 = vpack.c.bf16 %v3989_v52, %v3988_v48  ;;  %v14427_v58 = vpack.c.bf16 %v4013_v25, %v4012_v9  ;;  %v3966_v48 = vld [vmem:[%s16696_s16 + $0x50] sm:$0xff]  ;;  %v3967_v52 = vld [vmem:[%s16696_s16 + $0x58] sm:$0xff]  ;;  %v4733_v24 = vld [vmem:[%s16698_s18 + $0x200] sm:$0xff] }
 0x885   :  { %v3481_v63 = vrot.slane %v3461_v54, %v13911_v60  ;;  %v3997_v54 = vld [vmem:[%s16696_s16 + $0x148] sm:$0xff]  ;;  %v4737_v42 = vld [vmem:[%s16698_s18 + $0x220] sm:$0xff] }
 0x886   :  { %v3482_v0 = vadd.f32 %v3477_v59, %v3472_v41  ;;  %v3965_v41 = vld [vmem:[%s16696_s16 + $0x48] sm:$0xff]  ;;  %v3996_v59 = vld [vmem:[%s16696_s16 + $0x140] sm:$0xff]  ;;  %v10004_v44 = vcombine.high %v4733_v24, %v4737_v42  ;;  %v10003_v45 = vcombine.low %v4733_v24, %v4737_v42 }
 0x887   :  { %v3483_v1 = vadd.f32 %v3481_v63, %v3473_v47  ;;  %v14425_v47 = vpack.c.bf16 %v3981_v18, %v3980_v17  ;;  %v3982_v63 = vld [vmem:[%s16696_s16 + $0xd0] sm:$0xff]  ;;  %v14449_v3 = vpack.c.bf16 %v3965_v41, %v3964_v43  ;;  %v4003_v17 = vld [vmem:[%s16696_s16 + $0x178] sm:$0xff]  ;;  %v11101_v18 = vpack.c.bf16 %v3971_v11, %v3970_v51  ;;  %v4753_v11 = vld [vmem:[%s16698_s18 + $0x2a0] sm:$0xff] }
 0x888   :  { %v3484_v4 = vmax.f32 %v3482_v0, 0.0  ;;  %v3983_v0 = vld [vmem:[%s16696_s16 + $0xd8] sm:$0xff]  ;;  %v11133_v9 = vpack.c.bf16 %v4003_v17, %v4002_v12  ;;  %v3955_v42 = vld [vmem:[%s16695_s15] sm:$0x1] }
 0x889   :  { %v3485_v7 = vmax.f32 %v3483_v1, 0.0  ;;  %v4014_v1 = vld [vmem:[%s16696_s16 + $0x1d0] sm:$0xff]  ;;  %v14461_v6 = vpack.c.bf16 %v3983_v0, %v3982_v63 }
 0x88a   :  { %v3550_v20 = vpack.c.bf16 %v3484_v4, %v3484_v4  ;;  %v14451_v4 = vpack.c.bf16 %v3997_v54, %v3996_v59 }
 0x88b   :  { %v3551_v13 = vpack.c.bf16 %v3485_v7, %v3485_v7  ;;  %v14463_v7 = vpack.c.bf16 %v4015_v2, %v4014_v1 }
 0x88d   :  { %3904 = vmatprep.mubr.bf16.mxu1 %v3551_v13  ;;  %3945 = vmatprep.mubr.bf16.mxu0 %v3551_v13  ;;  %v3985_v13 = vld [vmem:[%s16696_s16 + $0xe8] sm:$0xff] }
 0x88e   :  { %3905 = vmatmul.mubr.bf16.vlgmr.msra.gmra.mrb[28].mxu1 %v3550_v20  ;;  %3946 = vmatmul.mubr.bf16.vlgmr.msra.gmra.mrb[12].mxu0 %v3550_v20  ;;  %v14485_v20 = vpack.c.bf16 %v3967_v52, %v3966_v48  ;;  %v14497_v29 = vpack.c.bf16 %v3985_v13, %v3984_v5  ;;  %v4709_v5 = vld [vmem:[%s16698_s18 + $0x140] sm:$0xff] }
 0x88f   :  { %11074 = vmatpush3.bf16.msra.mxu1 %v14307_v14  ;;  %11106 = vmatpush3.bf16.msra.mxu0 %v14309_v15  ;;  %v4713_v13 = vld [vmem:[%s16698_s18 + $0x160] sm:$0xff] }
 0x890   :  { %11076 = vmatprep.subr.bf16.mxu1 %v14317_v21  ;;  %11108 = vmatprep.subr.bf16.mxu0 %v14319_v22  ;;  %v9980_v16 = vcombine.high %v4709_v5, %v4713_v13  ;;  %v9979_v19 = vcombine.low %v4709_v5, %v4713_v13 }
 0x893   :  { %11078 = vmatpush3.bf16.msra.mxu1 %v14341_v34  ;;  %11110 = vmatpush3.bf16.msra.mxu0 %v14343_v35 }
 0x894   :  { %11080 = vmatprep.subr.bf16.mxu1 %v14353_v38  ;;  %11112 = vmatprep.subr.bf16.mxu0 %v14355_v39 }
 0x897   :  { %11082 = vmatpush3.bf16.msra.mxu1 %v14377_v53  ;;  %11114 = vmatpush3.bf16.msra.mxu0 %v14379_v55 }
 0x898   :  { %11084 = vmatprep.subr.bf16.mxu1 %v14389_v61  ;;  %11116 = vmatprep.subr.bf16.mxu0 %v14391_v62 }
 0x89b   :  { %11086 = vmatpush3.bf16.msra.mxu1 %v14413_v36  ;;  %11118 = vmatpush3.bf16.msra.mxu0 %v14415_v40 }
 0x89c   :  { %11088 = vmatprep.subr.bf16.mxu1 %v14425_v47  ;;  %11120 = vmatprep.subr.bf16.mxu0 %v14427_v58 }
 0x89f   :  { %11090 = vmatpush3.bf16.msra.mxu1 %v14449_v3  ;;  %11122 = vmatpush3.bf16.msra.mxu0 %v14451_v4 }
 0x8a0   :  { %11092 = vmatprep.subr.bf16.mxu1 %v14461_v6  ;;  %11124 = vmatprep.subr.bf16.mxu0 %v14463_v7 }
 0x8a3   :  { %11094 = vmatpush3.bf16.msra.mxu1 %v14485_v20  ;;  %11126 = vmatpush3.bf16.msra.mxu0 %v14487_v26 }
 0x8a4   :  { %11096 = vmatprep.subr.bf16.mxu1 %v14497_v29  ;;  %11128 = vmatprep.subr.bf16.mxu0 %v14499_v32 }
 0x8a7   :  { %11098 = vmatpush3.bf16.msra.mxu1 %v11097_v46  ;;  %11130 = vmatpush3.bf16.msra.mxu0 %v11129_v50 }
 0x8a8   :  { %11100 = vmatprep.subr.bf16.mxu1 %v11099_v56  ;;  %11132 = vmatprep.subr.bf16.mxu0 %v11131_v57 }
 0x8ab   :  { %11102 = vmatpush3.bf16.msra.mxu1 %v11101_v18  ;;  %11134 = vmatpush3.bf16.msra.mxu0 %v11133_v9 }
 0x8ac   :  { %11136 = vmatprep.subr.bf16.mxu1 %v14268_v23  ;;  %11168 = vmatprep.subr.bf16.mxu0 %v14273_v31 }
 0x961   :  { %v14537_v25 = vpop.f32.mrb[28].mxu1  ;;  %v14539_v43 = vpop.f32.mrb[12].mxu0 }
 0x962   :  { %v14541_v41 = vpop.f32.mrb[29].mxu1  ;;  %v14543_v59 = vpop.f32.mrb[13].mxu0 }
 0x963   :  { %v4173_v54 = vmul.f32 %v14541_v41, %v14541_v41  ;;  %v4175_v63 = vmul.f32 %v14543_v59, %v14543_v59  ;;  %v3910_v0 = vpop.f32.mrb[30].mxu1  ;;  %v3951_v1 = vpop.f32.mrb[14].mxu0  ;;  %4088 = vmatprep.mubr.f32.mxu1 %v14541_v41  ;;  %4158 = vmatprep.mubr.f32.mxu0 %v14543_v59 }
 0x964   :  { %v3911_v23 = vpop.f32.mrb[31].mxu1  ;;  %v3952_v31 = vpop.f32.mrb[15].mxu0  ;;  %4089 = vmatmul.mubr.f32.vlgmr.msra.gmra.mrb[26].mxu1 %v14537_v25  ;;  %4159 = vmatmul.mubr.f32.vlgmr.msra.gmra.mrb[10].mxu0 %v14539_v43 }
 0x965   :  { %11138 = vmatpush3.bf16.msra.mxu1 %v14307_v14  ;;  %11170 = vmatpush3.bf16.msra.mxu0 %v14309_v15  ;;  %v4172_v14 = vmul.f32 %v14537_v25, %v14537_v25  ;;  %v4174_v15 = vmul.f32 %v14539_v43, %v14539_v43 }
 0x966   :  { %4240 = vmatprep.mubr.f32.mxu1 %v4173_v54  ;;  %4310 = vmatprep.mubr.f32.mxu0 %v4175_v63 }
 0x967   :  { %11140 = vmatprep.subr.bf16.mxu1 %v14317_v21  ;;  %11172 = vmatprep.subr.bf16.mxu0 %v14319_v22  ;;  %v14585_v21 = vld [vmem:[%s16697_s17 + $0x8] sm:$0xff]  ;;  %v14590_v22 = vld [vmem:[%s16697_s17] sm:$0xff] }
 0x969   :  { %11142 = vmatpush3.bf16.msra.mxu1 %v14341_v34  ;;  %11174 = vmatpush3.bf16.msra.mxu0 %v14343_v35  ;;  %v14595_v34 = vld [vmem:[%s16697_s17 + $0x18] sm:$0xff]  ;;  %v4669_v35 = vld [vmem:[%s16698_s18] sm:$0xff] }
 0x96a   :  { %11144 = vmatprep.subr.bf16.mxu1 %v14353_v38  ;;  %11176 = vmatprep.subr.bf16.mxu0 %v14355_v39  ;;  %v4673_v38 = vld [vmem:[%s16698_s18 + $0x20] sm:$0xff] }
 0x96b   :  { %v9939_v39 = vcombine.low %v4669_v35, %v4673_v38 }
 0x96d   :  { %11146 = vmatpush3.bf16.msra.mxu1 %v14377_v53  ;;  %11178 = vmatpush3.bf16.msra.mxu0 %v14379_v55  ;;  %v9940_v53 = vcombine.high %v4669_v35, %v4673_v38  ;;  %v4677_v55 = vld [vmem:[%s16698_s18 + $0x40] sm:$0xff] }
 0x96e   :  { %11148 = vmatprep.subr.bf16.mxu1 %v14389_v61  ;;  %11180 = vmatprep.subr.bf16.mxu0 %v14391_v62  ;;  %v4681_v61 = vld [vmem:[%s16698_s18 + $0x60] sm:$0xff] }
 0x96f   :  { %v9948_v62 = vcombine.high %v4677_v55, %v4681_v61 }
 0x971   :  { %11150 = vmatpush3.bf16.msra.mxu1 %v14413_v36  ;;  %11182 = vmatpush3.bf16.msra.mxu0 %v14415_v40  ;;  %v9947_v36 = vcombine.low %v4677_v55, %v4681_v61  ;;  %v4685_v40 = vld [vmem:[%s16698_s18 + $0x80] sm:$0xff] }
 0x972   :  { %11152 = vmatprep.subr.bf16.mxu1 %v14425_v47  ;;  %11184 = vmatprep.subr.bf16.mxu0 %v14427_v58  ;;  %v4689_v47 = vld [vmem:[%s16698_s18 + $0xa0] sm:$0xff] }
 0x973   :  { %v9956_v58 = vcombine.high %v4685_v40, %v4689_v47  ;;  %v9955_v2 = vcombine.low %v4685_v40, %v4689_v47 }
 0x975   :  { %11154 = vmatpush3.bf16.msra.mxu1 %v14449_v3  ;;  %11186 = vmatpush3.bf16.msra.mxu0 %v14451_v4  ;;  %v4693_v3 = vld [vmem:[%s16698_s18 + $0xc0] sm:$0xff] }
 0x976   :  { %11156 = vmatprep.subr.bf16.mxu1 %v14461_v6  ;;  %11188 = vmatprep.subr.bf16.mxu0 %v14463_v7  ;;  %v4697_v4 = vld [vmem:[%s16698_s18 + $0xe0] sm:$0xff] }
 0x977   :  { %v9964_v48 = vcombine.high %v4693_v3, %v4697_v4  ;;  %v9963_v52 = vcombine.low %v4693_v3, %v4697_v4  ;;  %v4701_v6 = vld [vmem:[%s16698_s18 + $0x100] sm:$0xff] }
 0x978   :  { %v4705_v7 = vld [vmem:[%s16698_s18 + $0x120] sm:$0xff] }
 0x979   :  { %11158 = vmatpush3.bf16.msra.mxu1 %v14485_v20  ;;  %11190 = vmatpush3.bf16.msra.mxu0 %v14487_v26  ;;  %v9972_v8 = vcombine.high %v4701_v6, %v4705_v7  ;;  %v9971_v10 = vcombine.low %v4701_v6, %v4705_v7  ;;  %v4717_v20 = vld [vmem:[%s16698_s18 + $0x180] sm:$0xff] }
 0x97a   :  { %11160 = vmatprep.subr.bf16.mxu1 %v14497_v29  ;;  %11192 = vmatprep.subr.bf16.mxu0 %v14499_v32  ;;  %v4721_v26 = vld [vmem:[%s16698_s18 + $0x1a0] sm:$0xff] }
 0x97b   :  { %v9988_v27 = vcombine.high %v4717_v20, %v4721_v26  ;;  %v9987_v28 = vcombine.low %v4717_v20, %v4721_v26  ;;  %v4725_v29 = vld [vmem:[%s16698_s18 + $0x1c0] sm:$0xff] }
 0x97c   :  { %v4729_v32 = vld [vmem:[%s16698_s18 + $0x1e0] sm:$0xff] }
 0x97d   :  { %11162 = vmatpush3.bf16.msra.mxu1 %v11097_v46  ;;  %11194 = vmatpush3.bf16.msra.mxu0 %v11129_v50  ;;  %v9996_v33 = vcombine.high %v4725_v29, %v4729_v32  ;;  %v9995_v37 = vcombine.low %v4725_v29, %v4729_v32  ;;  %v4741_v46 = vld [vmem:[%s16698_s18 + $0x240] sm:$0xff] }
 0x97e   :  { %11164 = vmatprep.subr.bf16.mxu1 %v11099_v56  ;;  %11196 = vmatprep.subr.bf16.mxu0 %v11131_v57  ;;  %v4745_v50 = vld [vmem:[%s16698_s18 + $0x260] sm:$0xff] }
 0x97f   :  { %v10012_v51 = vcombine.high %v4741_v46, %v4745_v50  ;;  %v10011_v56 = vcombine.low %v4741_v46, %v4745_v50  ;;  %v4749_v57 = vld [vmem:[%s16698_s18 + $0x280] sm:$0xff]  ;;  %v4678_v50 = vld [vmem:[%s16698_s18 + $0x48] sm:$0xff] }
 0x980   :  { %v10020_v12 = vcombine.high %v4749_v57, %v4753_v11  ;;  %v10019_v17 = vcombine.low %v4749_v57, %v4753_v11  ;;  %v3954_v29 = vld [vmem:[%s16694_s14] sm:$0x1]  ;;  %v4690_v57 = vld [vmem:[%s16698_s18 + $0xa8] sm:$0xff] }
 0x981   :  { %11166 = vmatpush3.bf16.msra.mxu1 %v11101_v18  ;;  %11198 = vmatpush3.bf16.msra.mxu0 %v11133_v9  ;;  %v4757_v18 = vld [vmem:[%s16698_s18 + $0x2c0] sm:$0xff] }
 0x982   :  { %4338 = vmatprep.subr.mxu1 %v14585_v21  ;;  %6209 = vmatprep.subr.bf16.mxu0 %v9940_v53  ;;  %v4761_v9 = vld [vmem:[%s16698_s18 + $0x2e0] sm:$0xff] }
 0x983   :  { %v10028_v54 = vcombine.high %v4757_v18, %v4761_v9  ;;  %v10027_v1 = vcombine.low %v4757_v18, %v4761_v9  ;;  %v4698_v18 = vld [vmem:[%s16698_s18 + $0xe8] sm:$0xff] }
 0x984   :  { %4241 = vmatmul.mubr.f32.vlgmr.msra.gmra.mrb[32].mxu1 %v4172_v14  ;;  %4311 = vmatmul.mubr.f32.vlgmr.msra.gmra.mrb[16].mxu0 %v4174_v15 }
 0x985   :  { %4402 = vmatprep.mubr.f32.mxu1 %v12517_v30  ;;  %4339 = vmatpush1.msra.mxu1 %v14590_v22 }
 0x986   :  { %4409 = vmatprep.subr.mxu1 %v14595_v34  ;;  %6210 = vmatpush1.bf16.msra.mxu0 %v9939_v39 }
 0x987   :  { %6211 = vmatprep.subr.bf16.mxu0 %v9948_v62 }
 0x98a   :  { %6212 = vmatpush1.bf16.msra.mxu0 %v9947_v36 }
 0x98b   :  { %6213 = vmatprep.subr.bf16.mxu0 %v9956_v58 }
 0x98e   :  { %6214 = vmatpush1.bf16.msra.mxu0 %v9955_v2 }
 0x98f   :  { %6215 = vmatprep.subr.bf16.mxu0 %v9964_v48 }
 0x992   :  { %6216 = vmatpush1.bf16.msra.mxu0 %v9963_v52 }
 0x993   :  { %6217 = vmatprep.subr.bf16.mxu0 %v9972_v8 }
 0x996   :  { %6218 = vmatpush1.bf16.msra.mxu0 %v9971_v10 }
 0x997   :  { %6219 = vmatprep.subr.bf16.mxu0 %v9980_v16 }
 0x99a   :  { %6220 = vmatpush1.bf16.msra.mxu0 %v9979_v19 }
 0x99b   :  { %6221 = vmatprep.subr.bf16.mxu0 %v9988_v27 }
 0x99e   :  { %6222 = vmatpush1.bf16.msra.mxu0 %v9987_v28 }
 0x99f   :  { %6223 = vmatprep.subr.bf16.mxu0 %v9996_v33 }
 0x9a2   :  { %6224 = vmatpush1.bf16.msra.mxu0 %v9995_v37  ;;  %v4022_v37 = vld [vmem:[%s16697_s17 + $0x10] sm:$0xff] }
 0x9a3   :  { %6225 = vmatprep.subr.bf16.mxu0 %v10004_v44  ;;  %v4670_v44 = vld [vmem:[%s16698_s18 + $0x8] sm:$0xff] }
 0x9a6   :  { %6226 = vmatpush1.bf16.msra.mxu0 %v10003_v45  ;;  %v4674_v45 = vld [vmem:[%s16698_s18 + $0x28] sm:$0xff] }
 0x9a7   :  { %6227 = vmatprep.subr.bf16.mxu0 %v10012_v51  ;;  %v4682_v51 = vld [vmem:[%s16698_s18 + $0x68] sm:$0xff] }
 0x9a8   :  { %v9949_v11 = vcombine.low %v4678_v50, %v4682_v51 }
 0x9aa   :  { %6228 = vmatpush1.bf16.msra.mxu0 %v10011_v56  ;;  %v9950_v56 = vcombine.high %v4678_v50, %v4682_v51  ;;  %v4778_v50 = vld [vmem:[%s16698_s18 + $0x368] sm:$0xff] }
 0x9ab   :  { %6229 = vmatprep.subr.bf16.mxu0 %v10020_v12 }
 0x9ae   :  { %6230 = vmatpush1.bf16.msra.mxu0 %v10019_v17  ;;  %v4694_v17 = vld [vmem:[%s16698_s18 + $0xc8] sm:$0xff] }
 0x9af   :  { %6231 = vmatprep.subr.bf16.mxu0 %v10028_v54  ;;  %v9966_v54 = vcombine.high %v4694_v17, %v4698_v18 }
 0x9b2   :  { %6232 = vmatpush1.bf16.msra.mxu0 %v10027_v1  ;;  %v9965_v1 = vcombine.low %v4694_v17, %v4698_v18  ;;  %v4786_v17 = vld [vmem:[%s16698_s18 + $0x3a8] sm:$0xff] }
 0xa37   :  { %v10727_v63 = vpop.f32.mrb[26].mxu1  ;;  %v10762_v0 = vpop.f32.mrb[10].mxu0 }
 0xa38   :  { %v10728_v23 = vpop.f32.mrb[27].mxu1  ;;  %v10763_v31 = vpop.f32.mrb[11].mxu0 }
 0xa39   :  { %v10729_v14 = vadd.f32 %v10728_v23, %v10727_v63  ;;  %v10764_v15 = vadd.f32 %v10763_v31, %v10762_v0  ;;  %v4702_v63 = vld [vmem:[%s16698_s18 + $0x108] sm:$0xff] }
 0xa3a   :  { %v4706_v0 = vld [vmem:[%s16698_s18 + $0x128] sm:$0xff] }
 0xa3b   :  { %v4161_v35 = vadd.f32 %v10764_v15, %v10729_v14  ;;  %v9974_v23 = vcombine.high %v4702_v63, %v4706_v0  ;;  %v4710_v31 = vld [vmem:[%s16698_s18 + $0x148] sm:$0xff]  ;;  %v9973_v15 = vcombine.low %v4702_v63, %v4706_v0  ;;  %v4789_v63 = vld [vmem:[%s16698_s18 + $0x3c0] sm:$0xff] }
 0xa3c   :  { %v4714_v14 = vld [vmem:[%s16698_s18 + $0x168] sm:$0xff]  ;;  %v4793_v0 = vld [vmem:[%s16698_s18 + $0x3e0] sm:$0xff] }
 0xa3d   :  { %v4165_v38 = vsel %vm4164_vm10, %v4161_v35, 0.0  ;;  %v9982_v35 = vcombine.high %v4710_v31, %v4714_v14 }
 0xa3e   :  { %v4166_v39 = vrot.slane %v4165_v38, 4 }
 0xa40   :  { %v4167_v53 = vadd.f32 %v4166_v39, %v4165_v38  ;;  %v4718_v38 = vld [vmem:[%s16698_s18 + $0x188] sm:$0xff] }
 0xa41   :  { %v4722_v39 = vld [vmem:[%s16698_s18 + $0x1a8] sm:$0xff] }
 0xa42   :  { %v4168_v55 = vrot.slane %v4167_v53, 2 }
 0xa44   :  { %v4169_v2 = vadd.f32 %v4168_v55, %v4167_v53  ;;  %v9981_v53 = vcombine.low %v4710_v31, %v4714_v14  ;;  %v9990_v55 = vcombine.high %v4718_v38, %v4722_v39  ;;  %v4794_v31 = vld [vmem:[%s16698_s18 + $0x3e8] sm:$0xff]  ;;  %v10059_v14 = vcombine.low %v4789_v63, %v4793_v0 }
 0xa46   :  { %v4170_v48 = vrot.slane %v4169_v2, 1 }
 0xa48   :  { %v4171_v7 = vadd.f32 %v4170_v48, %v4169_v2  ;;  %v4746_v48 = vld [vmem:[%s16698_s18 + $0x268] sm:$0xff] }
 0xa4a   :  { %v4324_v5 = vmul.f32 0.0078125, %v4171_v7  ;;  %v4750_v7 = vld [vmem:[%s16698_s18 + $0x288] sm:$0xff] }
 0xa4c   :  { %v4326_v19 = vmul.f32 %v4324_v5, %v4324_v5 }
 0xa57   :  { %v10797_v61 = vpop.f32.mrb[32].mxu1  ;;  %v10832_v62 = vpop.f32.mrb[16].mxu0 }
 0xa58   :  { %v10798_v36 = vpop.f32.mrb[33].mxu1  ;;  %v10833_v40 = vpop.f32.mrb[17].mxu0 }
 0xa59   :  { %v10799_v47 = vadd.f32 %v10798_v36, %v10797_v61  ;;  %v10834_v58 = vadd.f32 %v10833_v40, %v10832_v62  ;;  %v4726_v61 = vld [vmem:[%s16698_s18 + $0x1c8] sm:$0xff]  ;;  %v9989_v36 = vcombine.low %v4718_v38, %v4722_v39  ;;  %v4797_v38 = vld [vmem:[%s16698_s18 + $0x400] sm:$0xff] }
 0xa5a   :  { %v4730_v62 = vld [vmem:[%s16698_s18 + $0x1e8] sm:$0xff]  ;;  %v4801_v39 = vld [vmem:[%s16698_s18 + $0x420] sm:$0xff] }
 0xa5b   :  { %v4313_v3 = vadd.f32 %v10834_v58, %v10799_v47  ;;  %v9998_v40 = vcombine.high %v4726_v61, %v4730_v62  ;;  %v4734_v47 = vld [vmem:[%s16698_s18 + $0x208] sm:$0xff]  ;;  %v9997_v2 = vcombine.low %v4726_v61, %v4730_v62  ;;  %v10067_v62 = vcombine.low %v4797_v38, %v4801_v39 }
 0xa5c   :  { %v4738_v58 = vld [vmem:[%s16698_s18 + $0x228] sm:$0xff] }
 0xa5d   :  { %v4316_v4 = vsel %vm4164_vm10, %v4313_v3, 0.0  ;;  %v10006_v3 = vcombine.high %v4734_v47, %v4738_v58  ;;  %v4802_v61 = vld [vmem:[%s16698_s18 + $0x428] sm:$0xff] }
 0xa5e   :  { %v4317_v52 = vrot.slane %v4316_v4, 4 }
 0xa60   :  { %v4318_v6 = vadd.f32 %v4317_v52, %v4316_v4  ;;  %v4742_v4 = vld [vmem:[%s16698_s18 + $0x248] sm:$0xff]  ;;  %v10005_v52 = vcombine.low %v4734_v47, %v4738_v58 }
 0xa62   :  { %v4319_v8 = vrot.slane %v4318_v6, 2 }
 0xa64   :  { %v4320_v10 = vadd.f32 %v4319_v8, %v4318_v6  ;;  %v10014_v6 = vcombine.high %v4742_v4, %v4746_v48  ;;  %v4754_v8 = vld [vmem:[%s16698_s18 + $0x2a8] sm:$0xff] }
 0xa66   :  { %v4321_v13 = vrot.slane %v4320_v10, 1 }
 0xa68   :  { %v4322_v16 = vadd.f32 %v4321_v13, %v4320_v10  ;;  %v10013_v10 = vcombine.low %v4742_v4, %v4746_v48  ;;  %v4758_v13 = vld [vmem:[%s16698_s18 + $0x2c8] sm:$0xff] }
 0xa6a   :  { %v4325_v20 = vmul.f32 0.0078125, %v4322_v16  ;;  %v4762_v16 = vld [vmem:[%s16698_s18 + $0x2e8] sm:$0xff] }
 0xa6c   :  { %v4327_v26 = vsub.f32 %v4325_v20, %v4326_v19  ;;  %v10021_v19 = vcombine.low %v4750_v7, %v4754_v8  ;;  %v10030_v20 = vcombine.high %v4758_v13, %v4762_v16 }
 0xa6e   :  { %v4328_v27 = vmax.f32 %v4327_v26, 0.0  ;;  %v10029_v26 = vcombine.low %v4758_v13, %v4762_v16 }
 0xa70   :  { %v4329_v28 = vadd.f32 1e-05, %v4328_v27  ;;  %v4765_v27 = vld [vmem:[%s16698_s18 + $0x300] sm:$0xff] }
 0xa72   :  { %12448 = vrsqrt.f32 %v4329_v28  ;;  %v4769_v28 = vld [vmem:[%s16698_s18 + $0x320] sm:$0xff] }
 0xa7c   :  { %v12449_v32 = vpop.eup %12448 }
 0xa7d   :  { %v4331_v33 = vmul.f32 %v12449_v32, %v3954_v29  ;;  %v4766_v29 = vld [vmem:[%s16698_s18 + $0x308] sm:$0xff]  ;;  %v10036_v32 = vcombine.high %v4765_v27, %v4769_v28 }
 0xa7f   :  { %9935 = vmatmul.mubr.msk.f32.vlgmr.msra.gmra.mrb[34].mxu1 %vm4334_vm11, %v4331_v33  ;;  %v4332_v24 = vmul.f32 %v4331_v33, %v4324_v5  ;;  %v10022_v5 = vcombine.high %v4750_v7, %v4754_v8  ;;  %6233 = vmatprep.subr.bf16.mxu0 %v10036_v32  ;;  %v4805_v32 = vld [vmem:[%s16698_s18 + $0x440] sm:$0xff] }
 0xa80   :  { %4410 = vmatpush1.msra.mxu1 %v4022_v37  ;;  %4473 = vmatprep.mubr.f32.mxu1 %v12517_v30 }
 0xa81   :  { %4483 = vmatprep.subr.mxu1 %v14585_v21  ;;  %v4333_v46 = vsub.f32 %v3955_v42, %v4332_v24  ;;  %v9942_v21 = vcombine.high %v4670_v44, %v4674_v45 }
 0xa83   :  { %9936 = vmatmul.mubr.msk.f32.vlgmr.msra.gmra.mrb[36].mxu1 %vm4334_vm11, %v4331_v33  ;;  %v4770_v33 = vld [vmem:[%s16698_s18 + $0x328] sm:$0xff] }
 0xa84   :  { %4484 = vmatpush1.msra.mxu1 %v14590_v22  ;;  %4547 = vmatprep.mubr.f32.mxu1 %v12517_v30  ;;  %v9941_v22 = vcombine.low %v4670_v44, %v4674_v45  ;;  %v10037_v24 = vcombine.low %v4766_v29, %v4770_v33  ;;  %v10038_v42 = vcombine.high %v4766_v29, %v4770_v33  ;;  %v4773_v44 = vld [vmem:[%s16698_s18 + $0x340] sm:$0xff] }
 0xa85   :  { %4554 = vmatprep.subr.mxu1 %v14595_v34  ;;  %v4686_v34 = vld [vmem:[%s16698_s18 + $0x88] sm:$0xff]  ;;  %v4777_v45 = vld [vmem:[%s16698_s18 + $0x360] sm:$0xff] }
 0xa86   :  { %v9958_v12 = vcombine.high %v4686_v34, %v4690_v57  ;;  %v9957_v9 = vcombine.low %v4686_v34, %v4690_v57  ;;  %v10043_v51 = vcombine.low %v4773_v44, %v4777_v45  ;;  %v4781_v34 = vld [vmem:[%s16698_s18 + $0x380] sm:$0xff] }
 0xa87   :  { %9937 = vmatmul.mubr.msk.f32.vlgmr.msra.gmra.mrb[38].mxu1 %vm4334_vm11, %v4333_v46  ;;  %v4785_v57 = vld [vmem:[%s16698_s18 + $0x3a0] sm:$0xff] }
 0xa88   :  { %4555 = vmatpush1.msra.mxu1 %v4022_v37  ;;  %4618 = vmatprep.mubr.f32.mxu1 %v12517_v30  ;;  %v10035_v37 = vcombine.low %v4765_v27, %v4769_v28  ;;  %v10051_v18 = vcombine.low %v4781_v34, %v4785_v57  ;;  %v4809_v33 = vld [vmem:[%s16698_s18 + $0x460] sm:$0xff] }
 0xa89   :  { %6291 = vmatprep.subr.bf16.mxu1 %v9942_v21  ;;  %v10044_v21 = vcombine.high %v4773_v44, %v4777_v45 }
 0xa8a   :  { %6234 = vmatpush1.bf16.msra.mxu0 %v10035_v37  ;;  %v4806_v37 = vld [vmem:[%s16698_s18 + $0x448] sm:$0xff] }
 0xa8b   :  { %9938 = vmatmul.mubr.msk.f32.vlgmr.msra.gmra.mrb[40].mxu1 %vm4334_vm11, %v4333_v46  ;;  %v4774_v46 = vld [vmem:[%s16698_s18 + $0x348] sm:$0xff]  ;;  %6235 = vmatprep.subr.bf16.mxu0 %v10044_v21  ;;  %v10076_v21 = vcombine.high %v4805_v32, %v4809_v33 }
 0xa8c   :  { %6292 = vmatpush1.bf16.msra.mxu1 %v9941_v22  ;;  %v10045_v22 = vcombine.low %v4774_v46, %v4778_v50 }
 0xa8d   :  { %6293 = vmatprep.subr.bf16.mxu1 %v9950_v56  ;;  %v10046_v56 = vcombine.high %v4774_v46, %v4778_v50 }
 0xa8e   :  { %6236 = vmatpush1.bf16.msra.mxu0 %v10043_v51  ;;  %v4813_v51 = vld [vmem:[%s16698_s18 + $0x480] sm:$0xff] }
 0xa90   :  { %6294 = vmatpush1.bf16.msra.mxu1 %v9949_v11  ;;  %v4782_v11 = vld [vmem:[%s16698_s18 + $0x388] sm:$0xff] }
 0xa91   :  { %6295 = vmatprep.subr.bf16.mxu1 %v9958_v12  ;;  %v10052_v12 = vcombine.high %v4781_v34, %v4785_v57  ;;  %v4814_v34 = vld [vmem:[%s16698_s18 + $0x488] sm:$0xff] }
 0xa92   :  { %v4818_v57 = vld [vmem:[%s16698_s18 + $0x4a8] sm:$0xff] }
 0xa93   :  { %6237 = vmatprep.subr.bf16.mxu0 %v10052_v12  ;;  %v10075_v12 = vcombine.low %v4805_v32, %v4809_v33  ;;  %v4862_v33 = vld [vmem:[%s16698_s18 + $0x608] sm:$0xff] }
 0xa94   :  { %6296 = vmatpush1.bf16.msra.mxu1 %v9957_v9  ;;  %v10053_v9 = vcombine.low %v4782_v11, %v4786_v17  ;;  %6238 = vmatpush1.bf16.msra.mxu0 %v10051_v18 }
 0xa95   :  { %6297 = vmatprep.subr.bf16.mxu1 %v9966_v54  ;;  %v10054_v54 = vcombine.high %v4782_v11, %v4786_v17 }
 0xa98   :  { %6298 = vmatpush1.bf16.msra.mxu1 %v9965_v1  ;;  %v4790_v1 = vld [vmem:[%s16698_s18 + $0x3c8] sm:$0xff] }
 0xa99   :  { %6299 = vmatprep.subr.bf16.mxu1 %v9974_v23  ;;  %v10060_v23 = vcombine.high %v4789_v63, %v4793_v0  ;;  %v4825_v63 = vld [vmem:[%s16698_s18 + $0x4e0] sm:$0xff]  ;;  %v4822_v0 = vld [vmem:[%s16698_s18 + $0x4c8] sm:$0xff] }
 0xa9b   :  { %6239 = vmatprep.subr.bf16.mxu0 %v10060_v23 }
 0xa9c   :  { %6300 = vmatpush1.bf16.msra.mxu1 %v9973_v15  ;;  %v10061_v15 = vcombine.low %v4790_v1, %v4794_v31  ;;  %6240 = vmatpush1.bf16.msra.mxu0 %v10059_v14 }
 0xa9d   :  { %6301 = vmatprep.subr.bf16.mxu1 %v9982_v35  ;;  %v10062_v35 = vcombine.high %v4790_v1, %v4794_v31  ;;  %v4826_v1 = vld [vmem:[%s16698_s18 + $0x4e8] sm:$0xff]  ;;  %v10085_v31 = vcombine.low %v4814_v34, %v4818_v57 }
 0xaa0   :  { %6302 = vmatpush1.bf16.msra.mxu1 %v9981_v53  ;;  %v4798_v53 = vld [vmem:[%s16698_s18 + $0x408] sm:$0xff] }
 0xaa1   :  { %6303 = vmatprep.subr.bf16.mxu1 %v9990_v55  ;;  %v10068_v55 = vcombine.high %v4797_v38, %v4801_v39  ;;  %v4833_v38 = vld [vmem:[%s16698_s18 + $0x520] sm:$0xff]  ;;  %v4830_v39 = vld [vmem:[%s16698_s18 + $0x508] sm:$0xff] }
 0xaa3   :  { %6250 = vmatprep.subr.bf16.mxu0 %v10068_v55 }
 0xaa4   :  { %6304 = vmatpush1.bf16.msra.mxu1 %v9989_v36  ;;  %v10069_v36 = vcombine.low %v4798_v53, %v4802_v61 }
 0xaa5   :  { %6305 = vmatprep.subr.bf16.mxu1 %v9998_v40  ;;  %v10070_v40 = vcombine.high %v4798_v53, %v4802_v61  ;;  %v4834_v53 = vld [vmem:[%s16698_s18 + $0x528] sm:$0xff]  ;;  %v10093_v61 = vcombine.low %v4822_v0, %v4826_v1 }
 0xaa8   :  { %6306 = vmatpush1.bf16.msra.mxu1 %v9997_v2 }
 0xaa9   :  { %6307 = vmatprep.subr.bf16.mxu1 %v10006_v3 }
 0xaac   :  { %6308 = vmatpush1.bf16.msra.mxu1 %v10005_v52 }
 0xaad   :  { %6309 = vmatprep.subr.bf16.mxu1 %v10014_v6 }
 0xab0   :  { %6310 = vmatpush1.bf16.msra.mxu1 %v10013_v10 }
 0xab1   :  { %6311 = vmatprep.subr.bf16.mxu1 %v10022_v5 }
 0xab4   :  { %6312 = vmatpush1.bf16.msra.mxu1 %v10021_v19 }
 0xab5   :  { %6313 = vmatprep.subr.bf16.mxu1 %v10030_v20 }
 0xab8   :  { %6314 = vmatpush1.bf16.msra.mxu1 %v10029_v26 }
 0xab9   :  { %6315 = vmatprep.subr.bf16.mxu1 %v10038_v42 }
 0xabc   :  { %6316 = vmatpush1.bf16.msra.mxu1 %v10037_v24  ;;  %v4810_v24 = vld [vmem:[%s16698_s18 + $0x468] sm:$0xff] }
 0xabd   :  { %6317 = vmatprep.subr.bf16.mxu1 %v10046_v56  ;;  %v10078_v50 = vcombine.high %v4806_v37, %v4810_v24  ;;  %v4817_v56 = vld [vmem:[%s16698_s18 + $0x4a0] sm:$0xff]  ;;  %v10077_v17 = vcombine.low %v4806_v37, %v4810_v24  ;;  %v4866_v37 = vld [vmem:[%s16698_s18 + $0x628] sm:$0xff] }
 0xabe   :  { %v10084_v18 = vcombine.high %v4813_v51, %v4817_v56  ;;  %v10083_v23 = vcombine.low %v4813_v51, %v4817_v56  ;;  %v4869_v51 = vld [vmem:[%s16698_s18 + $0x640] sm:$0xff]  ;;  %v4870_v56 = vld [vmem:[%s16698_s18 + $0x648] sm:$0xff] }
 0xac0   :  { %6318 = vmatpush1.bf16.msra.mxu1 %v10045_v22 }
 0xac1   :  { %6319 = vmatprep.subr.bf16.mxu1 %v10054_v54  ;;  %v4821_v54 = vld [vmem:[%s16698_s18 + $0x4c0] sm:$0xff] }
 0xac2   :  { %v10092_v14 = vcombine.high %v4821_v54, %v4825_v63  ;;  %v10091_v55 = vcombine.low %v4821_v54, %v4825_v63  ;;  %v4881_v54 = vld [vmem:[%s16698_s18 + $0x6a0] sm:$0xff]  ;;  %v4878_v63 = vld [vmem:[%s16698_s18 + $0x688] sm:$0xff] }
 0xac4   :  { %6320 = vmatpush1.bf16.msra.mxu1 %v10053_v9  ;;  %v10086_v9 = vcombine.high %v4814_v34, %v4818_v57  ;;  %v4874_v34 = vld [vmem:[%s16698_s18 + $0x668] sm:$0xff] }
 0xac5   :  { %6321 = vmatprep.subr.bf16.mxu1 %v10062_v35  ;;  %v4829_v35 = vld [vmem:[%s16698_s18 + $0x500] sm:$0xff] }
 0xac8   :  { %6322 = vmatpush1.bf16.msra.mxu1 %v10061_v15  ;;  %v10094_v15 = vcombine.high %v4822_v0, %v4826_v1  ;;  %v4882_v0 = vld [vmem:[%s16698_s18 + $0x6a8] sm:$0xff] }
 0xac9   :  { %6332 = vmatprep.subr.bf16.mxu1 %v10070_v40  ;;  %v4837_v40 = vld [vmem:[%s16698_s18 + $0x540] sm:$0xff] }
 0xb52   :  { %v4404_v47 = vpop.f32.mrb[34].mxu1 }
 0xb53   :  { %v4628_v58 = vrot.slane %v4404_v47, %v13911_v60  ;;  %v4406_v2 = vpop.f32.mrb[35].mxu1  ;;  %v4841_v47 = vld [vmem:[%s16698_s18 + $0x560] sm:$0xff] }
 0xb54   :  { %v4632_v3 = vrot.slane %v4406_v2, %v13911_v60  ;;  %v4842_v2 = vld [vmem:[%s16698_s18 + $0x568] sm:$0xff] }
 0xb55   :  { %v4641_v4 = vmul.f32 %v4628_v58, %v14537_v25  ;;  %v4838_v58 = vld [vmem:[%s16698_s18 + $0x548] sm:$0xff] }
 0xb56   :  { %v4642_v48 = vmul.f32 %v4632_v3, %v14541_v41  ;;  %v4475_v52 = vpop.f32.mrb[36].mxu1  ;;  %v10099_v3 = vcombine.low %v4829_v35, %v4833_v38 }
 0xb57   :  { %v4636_v6 = vrot.slane %v4475_v52, %v13911_v60  ;;  %v4477_v7 = vpop.f32.mrb[37].mxu1  ;;  %v10110_v52 = vcombine.high %v4838_v58, %v4842_v2 }
 0xb58   :  { %v4640_v8 = vrot.slane %v4477_v7, %v13911_v60  ;;  %v4849_v7 = vld [vmem:[%s16698_s18 + $0x5a0] sm:$0xff] }
 0xb59   :  { %v4643_v10 = vmul.f32 %v4636_v6, %v14539_v43  ;;  %v4845_v6 = vld [vmem:[%s16698_s18 + $0x580] sm:$0xff] }
 0xb5a   :  { %v4644_v5 = vmul.f32 %v4640_v8, %v14543_v59  ;;  %v4549_v13 = vpop.f32.mrb[38].mxu1  ;;  %v4846_v8 = vld [vmem:[%s16698_s18 + $0x588] sm:$0xff] }
 0xb5b   :  { %v4648_v16 = vrot.slane %v4549_v13, %v13911_v60  ;;  %v4551_v19 = vpop.f32.mrb[39].mxu1  ;;  %v10109_v13 = vcombine.low %v4838_v58, %v4842_v2  ;;  %v4898_v58 = vld [vmem:[%s16698_s18 + $0x728] sm:$0xff] }
 0xb5c   :  { %v4652_v20 = vrot.slane %v4551_v19, %v13911_v60 }
 0xb5d   :  { %v4661_v26 = vadd.f32 %v4648_v16, %v4641_v4  ;;  %v10101_v4 = vcombine.low %v4830_v39, %v4834_v53  ;;  %v10116_v16 = vcombine.high %v4845_v6, %v4849_v7 }
 0xb5e   :  { %v4662_v25 = vadd.f32 %v4652_v20, %v4642_v48  ;;  %v4620_v27 = vpop.f32.mrb[40].mxu1  ;;  %v10108_v48 = vcombine.high %v4837_v40, %v4841_v47  ;;  %v4853_v20 = vld [vmem:[%s16698_s18 + $0x5c0] sm:$0xff] }
 0xb5f   :  { %v4665_v41 = vmax.f32 %v4661_v26, 0.0  ;;  %v4656_v28 = vrot.slane %v4620_v27, %v13911_v60  ;;  %v4622_v29 = vpop.f32.mrb[41].mxu1  ;;  %v4857_v26 = vld [vmem:[%s16698_s18 + $0x5e0] sm:$0xff]  ;;  %v4858_v27 = vld [vmem:[%s16698_s18 + $0x5e8] sm:$0xff] }
 0xb60   :  { %v4666_v43 = vmax.f32 %v4662_v25, 0.0  ;;  %v4660_v59 = vrot.slane %v4622_v29, %v13911_v60  ;;  %v4854_v25 = vld [vmem:[%s16698_s18 + $0x5c8] sm:$0xff]  ;;  %v10124_v29 = vcombine.high %v4853_v20, %v4857_v26  ;;  %v10123_v24 = vcombine.low %v4853_v20, %v4857_v26  ;;  %v4913_v20 = vld [vmem:[%s16698_s18 + $0x7a0] sm:$0xff] }
 0xb61   :  { %v14847_v42 = vadd.f32 %v4656_v28, %v4643_v10  ;;  %v14851_v46 = vpack.c.bf16 %v4665_v41, %v4665_v41  ;;  %v4850_v10 = vld [vmem:[%s16698_s18 + $0x5a8] sm:$0xff]  ;;  %v10115_v41 = vcombine.low %v4845_v6, %v4849_v7  ;;  %v10126_v32 = vcombine.high %v4854_v25, %v4858_v27  ;;  %v4905_v6 = vld [vmem:[%s16698_s18 + $0x760] sm:$0xff] }
 0xb62   :  { %v14849_v44 = vpack.c.bf16 %v4666_v43, %v4666_v43  ;;  %v4664_v45 = vadd.f32 %v4660_v59, %v4644_v5  ;;  %v10107_v5 = vcombine.low %v4837_v40, %v4841_v47  ;;  %v10118_v19 = vcombine.high %v4846_v8, %v4850_v10  ;;  %v4861_v43 = vld [vmem:[%s16698_s18 + $0x600] sm:$0xff]  ;;  %v4894_v47 = vld [vmem:[%s16698_s18 + $0x708] sm:$0xff] }
 0xb63   :  { %v10117_v28 = vcombine.low %v4846_v8, %v4850_v10  ;;  %v4865_v59 = vld [vmem:[%s16698_s18 + $0x620] sm:$0xff]  ;;  %v4902_v7 = vld [vmem:[%s16698_s18 + $0x748] sm:$0xff] }
 0xb64   :  { %v4668_v22 = vmax.f32 %v4664_v45, 0.0  ;;  %6241 = vmatprep.mubr.bf16.mxu0 %v14849_v44  ;;  %6323 = vmatprep.mubr.bf16.mxu1 %v14849_v44  ;;  %v10125_v45 = vcombine.low %v4854_v25, %v4858_v27  ;;  %v10131_v57 = vcombine.low %v4861_v43, %v4865_v59  ;;  %v4897_v40 = vld [vmem:[%s16698_s18 + $0x720] sm:$0xff]  ;;  %v4906_v8 = vld [vmem:[%s16698_s18 + $0x768] sm:$0xff] }
 0xb65   :  { %6242 = vmatmul.mubr.bf16.vlgmr.msra.gmra.mrb[20].mxu0 %v14851_v46  ;;  %6324 = vmatmul.mubr.bf16.vlgmr.msra.gmra.mrb[44].mxu1 %v14851_v46  ;;  %v4910_v26 = vld [vmem:[%s16698_s18 + $0x788] sm:$0xff] }
 0xb66   :  { %v14869_v11 = vpack.c.bf16 %v4668_v22, %v4668_v22  ;;  %6251 = vmatpush1.bf16.msra.mxu0 %v10067_v62  ;;  %6333 = vmatpush1.bf16.msra.mxu1 %v10069_v36  ;;  %v10100_v62 = vcombine.high %v4829_v35, %v4833_v38  ;;  %v10102_v36 = vcombine.high %v4830_v39, %v4834_v53  ;;  %v4873_v22 = vld [vmem:[%s16698_s18 + $0x660] sm:$0xff]  ;;  %v4886_v38 = vld [vmem:[%s16698_s18 + $0x6c8] sm:$0xff] }
 0xb67   :  { %6252 = vmatprep.subr.bf16.mxu0 %v10076_v21  ;;  %6334 = vmatprep.subr.bf16.mxu1 %v10078_v50  ;;  %v10132_v21 = vcombine.high %v4861_v43, %v4865_v59  ;;  %v10134_v50 = vcombine.high %v4862_v33, %v4866_v37  ;;  %v10139_v1 = vcombine.low %v4869_v51, %v4873_v22  ;;  %v4889_v35 = vld [vmem:[%s16698_s18 + $0x6e0] sm:$0xff]  ;;  %v4890_v39 = vld [vmem:[%s16698_s18 + $0x6e8] sm:$0xff] }
 0xb68   :  { %6282 = vmatprep.mubr.bf16.mxu0 %v14869_v11  ;;  %6364 = vmatprep.mubr.bf16.mxu1 %v14869_v11  ;;  %v4914_v25 = vld [vmem:[%s16698_s18 + $0x7a8] sm:$0xff]  ;;  %v4921_v43 = vld [vmem:[%s16698_s18 + $0x7e0] sm:$0xff] }
 0xb69   :  { %v4918_v59 = vld [vmem:[%s16698_s18 + $0x7c8] sm:$0xff] }
 0xb6a   :  { %6253 = vmatpush1.bf16.msra.mxu0 %v10075_v12  ;;  %6335 = vmatpush1.bf16.msra.mxu1 %v10077_v17  ;;  %v10133_v12 = vcombine.low %v4862_v33, %v4866_v37  ;;  %v10140_v17 = vcombine.high %v4869_v51, %v4873_v22  ;;  %v4922_v33 = vld [vmem:[%s16698_s18 + $0x7e8] sm:$0xff]  ;;  %v4675_v51 = vld [vmem:[%s16698_s18 + $0x30] sm:$0xff]  ;;  %v4672_v22 = vld [vmem:[%s16698_s18 + $0x18] sm:$0xff] }
 0xb6b   :  { %6254 = vmatprep.subr.bf16.mxu0 %v10084_v18  ;;  %6336 = vmatprep.subr.bf16.mxu1 %v10086_v9  ;;  %v10142_v18 = vcombine.high %v4870_v56, %v4874_v34  ;;  %v4877_v9 = vld [vmem:[%s16698_s18 + $0x680] sm:$0xff] }
 0xb6c   :  { %v10147_v53 = vcombine.low %v4877_v9, %v4881_v54 }
 0xb6e   :  { %6255 = vmatpush1.bf16.msra.mxu0 %v10083_v23  ;;  %6337 = vmatpush1.bf16.msra.mxu1 %v10085_v31  ;;  %v10141_v23 = vcombine.low %v4870_v56, %v4874_v34  ;;  %v10148_v31 = vcombine.high %v4877_v9, %v4881_v54  ;;  %v4676_v56 = vld [vmem:[%s16698_s18 + $0x38] sm:$0xff]  ;;  %v4679_v9 = vld [vmem:[%s16698_s18 + $0x50] sm:$0xff] }
 0xb6f   :  { %6256 = vmatprep.subr.bf16.mxu0 %v10092_v14  ;;  %6338 = vmatprep.subr.bf16.mxu1 %v10094_v15  ;;  %v10150_v14 = vcombine.high %v4878_v63, %v4882_v0  ;;  %v4885_v15 = vld [vmem:[%s16698_s18 + $0x6c0] sm:$0xff]  ;;  %v4683_v54 = vld [vmem:[%s16698_s18 + $0x70] sm:$0xff] }
 0xb70   :  { %v10155_v2 = vcombine.low %v4885_v15, %v4889_v35 }
 0xb72   :  { %6257 = vmatpush1.bf16.msra.mxu0 %v10091_v55  ;;  %6339 = vmatpush1.bf16.msra.mxu1 %v10093_v61  ;;  %v10149_v55 = vcombine.low %v4878_v63, %v4882_v0  ;;  %v10156_v61 = vcombine.high %v4885_v15, %v4889_v35  ;;  %v4680_v63 = vld [vmem:[%s16698_s18 + $0x58] sm:$0xff]  ;;  %v4687_v15 = vld [vmem:[%s16698_s18 + $0x90] sm:$0xff] }
 0xb73   :  { %6258 = vmatprep.subr.bf16.mxu0 %v10100_v62  ;;  %6340 = vmatprep.subr.bf16.mxu1 %v10102_v36  ;;  %v10158_v62 = vcombine.high %v4886_v38, %v4890_v39  ;;  %v4893_v36 = vld [vmem:[%s16698_s18 + $0x700] sm:$0xff]  ;;  %v4691_v35 = vld [vmem:[%s16698_s18 + $0xb0] sm:$0xff] }
 0xb74   :  { %v10163_v10 = vcombine.low %v4893_v36, %v4897_v40 }
 0xb76   :  { %6259 = vmatpush1.bf16.msra.mxu0 %v10099_v3  ;;  %6341 = vmatpush1.bf16.msra.mxu1 %v10101_v4  ;;  %v10157_v3 = vcombine.low %v4886_v38, %v4890_v39  ;;  %v10164_v4 = vcombine.high %v4893_v36, %v4897_v40  ;;  %v4688_v38 = vld [vmem:[%s16698_s18 + $0x98] sm:$0xff]  ;;  %v4695_v36 = vld [vmem:[%s16698_s18 + $0xd0] sm:$0xff] }
 0xb77   :  { %6260 = vmatprep.subr.bf16.mxu0 %v10108_v48  ;;  %6342 = vmatprep.subr.bf16.mxu1 %v10110_v52  ;;  %v10166_v48 = vcombine.high %v4894_v47, %v4898_v58  ;;  %v4901_v52 = vld [vmem:[%s16698_s18 + $0x740] sm:$0xff]  ;;  %v4692_v39 = vld [vmem:[%s16698_s18 + $0xb8] sm:$0xff]  ;;  %v4699_v40 = vld [vmem:[%s16698_s18 + $0xf0] sm:$0xff] }
 0xb78   :  { %v10171_v27 = vcombine.low %v4901_v52, %v4905_v6 }
 0xb7a   :  { %6261 = vmatpush1.bf16.msra.mxu0 %v10107_v5  ;;  %6343 = vmatpush1.bf16.msra.mxu1 %v10109_v13  ;;  %v10165_v5 = vcombine.low %v4894_v47, %v4898_v58  ;;  %v10172_v13 = vcombine.high %v4901_v52, %v4905_v6  ;;  %v4696_v47 = vld [vmem:[%s16698_s18 + $0xd8] sm:$0xff]  ;;  %v9959_v58 = vcombine.low %v4687_v15, %v4691_v35  ;;  %v4707_v52 = vld [vmem:[%s16698_s18 + $0x130] sm:$0xff] }
 0xb7b   :  { %6262 = vmatprep.subr.bf16.mxu0 %v10116_v16  ;;  %6344 = vmatprep.subr.bf16.mxu1 %v10118_v19  ;;  %v10174_v16 = vcombine.high %v4902_v7, %v4906_v8  ;;  %v4909_v19 = vld [vmem:[%s16698_s18 + $0x780] sm:$0xff]  ;;  %v4704_v6 = vld [vmem:[%s16698_s18 + $0x118] sm:$0xff] }
 0xb7c   :  { %v10179_v37 = vcombine.low %v4909_v19, %v4913_v20 }
 0xb7e   :  { %6263 = vmatpush1.bf16.msra.mxu0 %v10115_v41  ;;  %6345 = vmatpush1.bf16.msra.mxu1 %v10117_v28  ;;  %v10173_v41 = vcombine.low %v4902_v7, %v4906_v8  ;;  %v10180_v28 = vcombine.high %v4909_v19, %v4913_v20  ;;  %v4708_v7 = vld [vmem:[%s16698_s18 + $0x138] sm:$0xff]  ;;  %v9967_v8 = vcombine.low %v4695_v36, %v4699_v40  ;;  %v4715_v19 = vld [vmem:[%s16698_s18 + $0x170] sm:$0xff] }
 0xb7f   :  { %6264 = vmatprep.subr.bf16.mxu0 %v10124_v29  ;;  %6346 = vmatprep.subr.bf16.mxu1 %v10126_v32  ;;  %v10182_v29 = vcombine.high %v4910_v26, %v4914_v25  ;;  %v4917_v32 = vld [vmem:[%s16698_s18 + $0x7c0] sm:$0xff]  ;;  %v4712_v20 = vld [vmem:[%s16698_s18 + $0x158] sm:$0xff] }
 0xb80   :  { %v10187_v34 = vcombine.low %v4917_v32, %v4921_v43 }
 0xb82   :  { %6265 = vmatpush1.bf16.msra.mxu0 %v10123_v24  ;;  %6347 = vmatpush1.bf16.msra.mxu1 %v10125_v45  ;;  %v10181_v24 = vcombine.low %v4910_v26, %v4914_v25  ;;  %v10188_v45 = vcombine.high %v4917_v32, %v4921_v43  ;;  %v4716_v26 = vld [vmem:[%s16698_s18 + $0x178] sm:$0xff]  ;;  %v4723_v32 = vld [vmem:[%s16698_s18 + $0x1b0] sm:$0xff] }
 0xb83   :  { %6266 = vmatprep.subr.bf16.mxu0 %v10132_v21  ;;  %6348 = vmatprep.subr.bf16.mxu1 %v10134_v50  ;;  %v10190_v21 = vcombine.high %v4918_v59, %v4922_v33  ;;  %v4671_v50 = vld [vmem:[%s16698_s18 + $0x10] sm:$0xff]  ;;  %v4720_v43 = vld [vmem:[%s16698_s18 + $0x198] sm:$0xff] }
 0xb84   :  { %v9943_v0 = vcombine.low %v4671_v50, %v4675_v51 }
 0xb86   :  { %6267 = vmatpush1.bf16.msra.mxu0 %v10131_v57  ;;  %6349 = vmatpush1.bf16.msra.mxu1 %v10133_v12  ;;  %v10189_v57 = vcombine.low %v4918_v59, %v4922_v33  ;;  %v4667_v12 = vmax.f32 %v14847_v42, 0.0  ;;  %v4684_v42 = vld [vmem:[%s16698_s18 + $0x78] sm:$0xff] }
 0xb87   :  { %6268 = vmatprep.subr.bf16.mxu0 %v10140_v17  ;;  %6350 = vmatprep.subr.bf16.mxu1 %v10142_v18  ;;  %v9944_v17 = vcombine.high %v4671_v50, %v4675_v51  ;;  %v9946_v18 = vcombine.high %v4672_v22, %v4676_v56  ;;  %v4724_v59 = vld [vmem:[%s16698_s18 + $0x1b8] sm:$0xff]  ;;  %v4731_v50 = vld [vmem:[%s16698_s18 + $0x1f0] sm:$0xff] }
 0xb88   :  { %v4728_v51 = vld [vmem:[%s16698_s18 + $0x1d8] sm:$0xff] }
 0xb8a   :  { %6269 = vmatpush1.bf16.msra.mxu0 %v10139_v1  ;;  %6351 = vmatpush1.bf16.msra.mxu1 %v10141_v23  ;;  %v15054_v1 = vpack.c.bf16 %v4667_v12, %v4667_v12  ;;  %v9945_v23 = vcombine.low %v4672_v22, %v4676_v56  ;;  %v4732_v22 = vld [vmem:[%s16698_s18 + $0x1f8] sm:$0xff] }
 0xb8b   :  { %6270 = vmatprep.subr.bf16.mxu0 %v10148_v31  ;;  %6352 = vmatprep.subr.bf16.mxu1 %v10150_v14  ;;  %v9952_v31 = vcombine.high %v4679_v9, %v4683_v54  ;;  %v9954_v14 = vcombine.high %v4680_v63, %v4684_v42  ;;  %v10002_v12 = vcombine.high %v4728_v51, %v4732_v22 }
 0xb8e   :  { %6271 = vmatpush1.bf16.msra.mxu0 %v10147_v53  ;;  %6353 = vmatpush1.bf16.msra.mxu1 %v10149_v55  ;;  %v9951_v53 = vcombine.low %v4679_v9, %v4683_v54  ;;  %v9953_v55 = vcombine.low %v4680_v63, %v4684_v42  ;;  %v4736_v9 = vld [vmem:[%s16698_s18 + $0x218] sm:$0xff]  ;;  %v10001_v42 = vcombine.low %v4728_v51, %v4732_v22 }
 0xb8f   :  { %6272 = vmatprep.subr.bf16.mxu0 %v10156_v61  ;;  %6354 = vmatprep.subr.bf16.mxu1 %v10158_v62  ;;  %v9960_v61 = vcombine.high %v4687_v15, %v4691_v35  ;;  %v9962_v62 = vcombine.high %v4688_v38, %v4692_v39  ;;  %v4740_v54 = vld [vmem:[%s16698_s18 + $0x238] sm:$0xff] }
 0xb90   :  { %v4744_v15 = vld [vmem:[%s16698_s18 + $0x258] sm:$0xff] }
 0xb91   :  { %v4748_v35 = vld [vmem:[%s16698_s18 + $0x278] sm:$0xff] }
 0xb92   :  { %6273 = vmatpush1.bf16.msra.mxu0 %v10155_v2  ;;  %6355 = vmatpush1.bf16.msra.mxu1 %v10157_v3  ;;  %v9961_v2 = vcombine.low %v4688_v38, %v4692_v39  ;;  %v9968_v3 = vcombine.high %v4695_v36, %v4699_v40  ;;  %v10009_v39 = vcombine.low %v4736_v9, %v4740_v54  ;;  %v4752_v36 = vld [vmem:[%s16698_s18 + $0x298] sm:$0xff] }
 0xb93   :  { %6274 = vmatprep.subr.bf16.mxu0 %v10164_v4  ;;  %6356 = vmatprep.subr.bf16.mxu1 %v10166_v48  ;;  %v4703_v48 = vld [vmem:[%s16698_s18 + $0x110] sm:$0xff]  ;;  %v4756_v40 = vld [vmem:[%s16698_s18 + $0x2b8] sm:$0xff] }
 0xb94   :  { %v9975_v25 = vcombine.low %v4703_v48, %v4707_v52 }
 0xb96   :  { %6275 = vmatpush1.bf16.msra.mxu0 %v10163_v10  ;;  %6357 = vmatpush1.bf16.msra.mxu1 %v10165_v5  ;;  %v9976_v5 = vcombine.high %v4703_v48, %v4707_v52  ;;  %v4760_v48 = vld [vmem:[%s16698_s18 + $0x2d8] sm:$0xff] }
 0xb97   :  { %6276 = vmatprep.subr.bf16.mxu0 %v10172_v13  ;;  %6358 = vmatprep.subr.bf16.mxu1 %v10174_v16  ;;  %v9978_v13 = vcombine.high %v4704_v6, %v4708_v7  ;;  %v4711_v16 = vld [vmem:[%s16698_s18 + $0x150] sm:$0xff]  ;;  %v4764_v52 = vld [vmem:[%s16698_s18 + $0x2f8] sm:$0xff] }
 0xb98   :  { %v9983_v33 = vcombine.low %v4711_v16, %v4715_v19 }
 0xb9a   :  { %6277 = vmatpush1.bf16.msra.mxu0 %v10171_v27  ;;  %6359 = vmatpush1.bf16.msra.mxu1 %v10173_v41  ;;  %v9977_v27 = vcombine.low %v4704_v6, %v4708_v7  ;;  %v9984_v41 = vcombine.high %v4711_v16, %v4715_v19  ;;  %v10025_v7 = vcombine.low %v4752_v36, %v4756_v40  ;;  %v4768_v16 = vld [vmem:[%s16698_s18 + $0x318] sm:$0xff] }
 0xb9b   :  { %6278 = vmatprep.subr.bf16.mxu0 %v10180_v28  ;;  %6360 = vmatprep.subr.bf16.mxu1 %v10182_v29  ;;  %v9986_v28 = vcombine.high %v4712_v20, %v4716_v26  ;;  %v4719_v29 = vld [vmem:[%s16698_s18 + $0x190] sm:$0xff]  ;;  %v4772_v19 = vld [vmem:[%s16698_s18 + $0x338] sm:$0xff] }
 0xb9c   :  { %v9991_v56 = vcombine.low %v4719_v29, %v4723_v32 }
 0xb9e   :  { %6279 = vmatpush1.bf16.msra.mxu0 %v10179_v37  ;;  %6361 = vmatpush1.bf16.msra.mxu1 %v10181_v24  ;;  %v9985_v37 = vcombine.low %v4712_v20, %v4716_v26  ;;  %v9992_v24 = vcombine.high %v4719_v29, %v4723_v32  ;;  %v10033_v26 = vcombine.low %v4760_v48, %v4764_v52  ;;  %v4776_v29 = vld [vmem:[%s16698_s18 + $0x358] sm:$0xff] }
 0xb9f   :  { %6280 = vmatprep.subr.bf16.mxu0 %v10188_v45  ;;  %6362 = vmatprep.subr.bf16.mxu1 %v10190_v21  ;;  %v9994_v45 = vcombine.high %v4720_v43, %v4724_v59  ;;  %v4727_v21 = vld [vmem:[%s16698_s18 + $0x1d0] sm:$0xff]  ;;  %v4780_v32 = vld [vmem:[%s16698_s18 + $0x378] sm:$0xff] }
 0xba0   :  { %v9999_v63 = vcombine.low %v4727_v21, %v4731_v50  ;;  %v10049_v22 = vcombine.low %v4776_v29, %v4780_v32 }
 0xba2   :  { %6281 = vmatpush1.bf16.msra.mxu0 %v10187_v34  ;;  %6363 = vmatpush1.bf16.msra.mxu1 %v10189_v57  ;;  %v9993_v34 = vcombine.low %v4720_v43, %v4724_v59  ;;  %v10000_v57 = vcombine.high %v4727_v21, %v4731_v50  ;;  %v10041_v59 = vcombine.low %v4768_v16, %v4772_v19  ;;  %v4784_v21 = vld [vmem:[%s16698_s18 + $0x398] sm:$0xff] }
 0xba3   :  { %6373 = vmatprep.subr.bf16.mxu0 %v9944_v17  ;;  %6455 = vmatprep.subr.bf16.mxu1 %v9946_v18  ;;  %v4735_v17 = vld [vmem:[%s16698_s18 + $0x210] sm:$0xff]  ;;  %v4788_v50 = vld [vmem:[%s16698_s18 + $0x3b8] sm:$0xff] }
 0xba4   :  { %v4739_v18 = vld [vmem:[%s16698_s18 + $0x230] sm:$0xff] }
 0xba5   :  { %6283 = vmatmul.mubr.bf16.vlgmr.msra.gmra.mrb[20].mxu0 %v15054_v1  ;;  %6365 = vmatmul.mubr.bf16.vlgmr.msra.gmra.mrb[44].mxu1 %v15054_v1  ;;  %v10007_v38 = vcombine.low %v4735_v17, %v4739_v18 }
 0xba6   :  { %6374 = vmatpush1.bf16.msra.mxu0 %v9943_v0  ;;  %6405 = vmatprep.mubr.bf16.mxu0 %v14849_v44  ;;  %v10008_v0 = vcombine.high %v4735_v17, %v4739_v18  ;;  %v4792_v17 = vld [vmem:[%s16698_s18 + $0x3d8] sm:$0xff] }
 0xba7   :  { %6456 = vmatpush1.bf16.msra.mxu1 %v9945_v23  ;;  %6487 = vmatprep.mubr.bf16.mxu1 %v14849_v44  ;;  %v4700_v44 = vld [vmem:[%s16698_s18 + $0xf8] sm:$0xff]  ;;  %v10010_v23 = vcombine.high %v4736_v9, %v4740_v54  ;;  %v10057_v54 = vcombine.low %v4784_v21, %v4788_v50 }
 0xba8   :  { %6375 = vmatprep.subr.bf16.mxu0 %v9952_v31  ;;  %6457 = vmatprep.subr.bf16.mxu1 %v9954_v14  ;;  %v9970_v4 = vcombine.high %v4696_v47, %v4700_v44  ;;  %v9969_v10 = vcombine.low %v4696_v47, %v4700_v44  ;;  %v4743_v31 = vld [vmem:[%s16698_s18 + $0x250] sm:$0xff]  ;;  %v10017_v44 = vcombine.low %v4744_v15, %v4748_v35  ;;  %v4796_v18 = vld [vmem:[%s16698_s18 + $0x3f8] sm:$0xff] }
 0xba9   :  { %v4747_v14 = vld [vmem:[%s16698_s18 + $0x270] sm:$0xff] }
 0xbaa   :  { %6376 = vmatpush1.bf16.msra.mxu0 %v9951_v53  ;;  %v10016_v53 = vcombine.high %v4743_v31, %v4747_v14  ;;  %v10015_v47 = vcombine.low %v4743_v31, %v4747_v14  ;;  %v4800_v31 = vld [vmem:[%s16698_s18 + $0x418] sm:$0xff] }
 0xbab   :  { %6458 = vmatpush1.bf16.msra.mxu1 %v9953_v55  ;;  %6377 = vmatprep.subr.bf16.mxu0 %v9960_v61  ;;  %v10018_v55 = vcombine.high %v4744_v15, %v4748_v35  ;;  %v4751_v61 = vld [vmem:[%s16698_s18 + $0x290] sm:$0xff]  ;;  %v4804_v14 = vld [vmem:[%s16698_s18 + $0x438] sm:$0xff]  ;;  %v10065_v35 = vcombine.low %v4792_v17, %v4796_v18 }
 0xbac   :  { %6459 = vmatprep.subr.bf16.mxu1 %v9962_v62  ;;  %v4755_v62 = vld [vmem:[%s16698_s18 + $0x2b0] sm:$0xff] }
 0xbad   :  { %v10023_v6 = vcombine.low %v4751_v61, %v4755_v62 }
 0xbae   :  { %6378 = vmatpush1.bf16.msra.mxu0 %v9959_v58  ;;  %v10024_v58 = vcombine.high %v4751_v61, %v4755_v62  ;;  %v4808_v62 = vld [vmem:[%s16698_s18 + $0x458] sm:$0xff] }
 0xbaf   :  { %6460 = vmatpush1.bf16.msra.mxu1 %v9961_v2  ;;  %6379 = vmatprep.subr.bf16.mxu0 %v9968_v3  ;;  %v10026_v2 = vcombine.high %v4752_v36, %v4756_v40  ;;  %v4759_v3 = vld [vmem:[%s16698_s18 + $0x2d0] sm:$0xff]  ;;  %v4812_v36 = vld [vmem:[%s16698_s18 + $0x478] sm:$0xff]  ;;  %v10073_v40 = vcombine.low %v4800_v31, %v4804_v14 }
 0xbb0   :  { %6461 = vmatprep.subr.bf16.mxu1 %v9970_v4  ;;  %v4763_v4 = vld [vmem:[%s16698_s18 + $0x2f0] sm:$0xff] }
 0xbb1   :  { %v10031_v20 = vcombine.low %v4759_v3, %v4763_v4 }
 0xbb2   :  { %6380 = vmatpush1.bf16.msra.mxu0 %v9967_v8  ;;  %v10032_v8 = vcombine.high %v4759_v3, %v4763_v4  ;;  %v4816_v3 = vld [vmem:[%s16698_s18 + $0x498] sm:$0xff] }
 0xbb3   :  { %6462 = vmatpush1.bf16.msra.mxu1 %v9969_v10  ;;  %6381 = vmatprep.subr.bf16.mxu0 %v9976_v5  ;;  %v10034_v10 = vcombine.high %v4760_v48, %v4764_v52  ;;  %v4767_v5 = vld [vmem:[%s16698_s18 + $0x310] sm:$0xff]  ;;  %v4820_v4 = vld [vmem:[%s16698_s18 + $0x4b8] sm:$0xff]  ;;  %v10081_v52 = vcombine.low %v4808_v62, %v4812_v36 }
 0xbb4   :  { %6463 = vmatprep.subr.bf16.mxu1 %v9978_v13  ;;  %v4771_v13 = vld [vmem:[%s16698_s18 + $0x330] sm:$0xff] }
 0xbb5   :  { %v10039_v43 = vcombine.low %v4767_v5, %v4771_v13 }
 0xbb6   :  { %6382 = vmatpush1.bf16.msra.mxu0 %v9975_v25  ;;  %v10040_v25 = vcombine.high %v4767_v5, %v4771_v13  ;;  %v4828_v5 = vld [vmem:[%s16698_s18 + $0x4f8] sm:$0xff]  ;;  %v10089_v13 = vcombine.low %v4816_v3, %v4820_v4 }
 0xbb7   :  { %6464 = vmatpush1.bf16.msra.mxu1 %v9977_v27  ;;  %6383 = vmatprep.subr.bf16.mxu0 %v9984_v41  ;;  %v10042_v27 = vcombine.high %v4768_v16, %v4772_v19  ;;  %v4775_v41 = vld [vmem:[%s16698_s18 + $0x350] sm:$0xff] }
 0xbb8   :  { %6465 = vmatprep.subr.bf16.mxu1 %v9986_v28  ;;  %v4779_v28 = vld [vmem:[%s16698_s18 + $0x370] sm:$0xff] }
 0xbb9   :  { %v10047_v51 = vcombine.low %v4775_v41, %v4779_v28 }
 0xbba   :  { %6384 = vmatpush1.bf16.msra.mxu0 %v9983_v33  ;;  %v10048_v33 = vcombine.high %v4775_v41, %v4779_v28 }
 0xbbb   :  { %6466 = vmatpush1.bf16.msra.mxu1 %v9985_v37  ;;  %6385 = vmatprep.subr.bf16.mxu0 %v9992_v24  ;;  %v10050_v37 = vcombine.high %v4776_v29, %v4780_v32  ;;  %v4783_v24 = vld [vmem:[%s16698_s18 + $0x390] sm:$0xff] }
 0xbbc   :  { %6467 = vmatprep.subr.bf16.mxu1 %v9994_v45  ;;  %v4787_v45 = vld [vmem:[%s16698_s18 + $0x3b0] sm:$0xff] }
 0xbbd   :  { %v10055_v9 = vcombine.low %v4783_v24, %v4787_v45 }
 0xbbe   :  { %6386 = vmatpush1.bf16.msra.mxu0 %v9991_v56  ;;  %v10056_v56 = vcombine.high %v4783_v24, %v4787_v45 }
 0xbbf   :  { %6468 = vmatpush1.bf16.msra.mxu1 %v9993_v34  ;;  %6387 = vmatprep.subr.bf16.mxu0 %v10000_v57  ;;  %v10058_v34 = vcombine.high %v4784_v21, %v4788_v50  ;;  %v4791_v57 = vld [vmem:[%s16698_s18 + $0x3d0] sm:$0xff] }
 0xbc0   :  { %6469 = vmatprep.subr.bf16.mxu1 %v10002_v12  ;;  %v4795_v12 = vld [vmem:[%s16698_s18 + $0x3f0] sm:$0xff] }
 0xbc1   :  { %v10063_v15 = vcombine.low %v4791_v57, %v4795_v12 }
 0xbc2   :  { %6388 = vmatpush1.bf16.msra.mxu0 %v9999_v63  ;;  %v10064_v63 = vcombine.high %v4791_v57, %v4795_v12 }
 0xbc3   :  { %6470 = vmatpush1.bf16.msra.mxu1 %v10001_v42  ;;  %6389 = vmatprep.subr.bf16.mxu0 %v10008_v0  ;;  %v10066_v42 = vcombine.high %v4792_v17, %v4796_v18  ;;  %v4799_v0 = vld [vmem:[%s16698_s18 + $0x410] sm:$0xff] }
 0xbc4   :  { %6471 = vmatprep.subr.bf16.mxu1 %v10010_v23  ;;  %v4803_v23 = vld [vmem:[%s16698_s18 + $0x430] sm:$0xff] }
 0xbc5   :  { %v10071_v61 = vcombine.low %v4799_v0, %v4803_v23 }
 0xbc6   :  { %6390 = vmatpush1.bf16.msra.mxu0 %v10007_v38  ;;  %v10072_v38 = vcombine.high %v4799_v0, %v4803_v23 }
 0xbc7   :  { %6472 = vmatpush1.bf16.msra.mxu1 %v10009_v39  ;;  %6391 = vmatprep.subr.bf16.mxu0 %v10016_v53  ;;  %v10074_v39 = vcombine.high %v4800_v31, %v4804_v14  ;;  %v4807_v53 = vld [vmem:[%s16698_s18 + $0x450] sm:$0xff] }
 0xbc8   :  { %6473 = vmatprep.subr.bf16.mxu1 %v10018_v55  ;;  %v4811_v55 = vld [vmem:[%s16698_s18 + $0x470] sm:$0xff] }
 0xbc9   :  { %v10079_v48 = vcombine.low %v4807_v53, %v4811_v55 }
 0xbca   :  { %6392 = vmatpush1.bf16.msra.mxu0 %v10015_v47  ;;  %v10080_v47 = vcombine.high %v4807_v53, %v4811_v55 }
 0xbcb   :  { %6474 = vmatpush1.bf16.msra.mxu1 %v10017_v44  ;;  %6393 = vmatprep.subr.bf16.mxu0 %v10024_v58  ;;  %v4815_v44 = vld [vmem:[%s16698_s18 + $0x490] sm:$0xff] }
 0xbcc   :  { %6475 = vmatprep.subr.bf16.mxu1 %v10026_v2  ;;  %v4819_v58 = vld [vmem:[%s16698_s18 + $0x4b0] sm:$0xff]  ;;  %v10082_v2 = vcombine.high %v4808_v62, %v4812_v36 }
 0xbcd   :  { %v4871_v36 = vld [vmem:[%s16698_s18 + $0x650] sm:$0xff] }
 0xbce   :  { %6394 = vmatpush1.bf16.msra.mxu0 %v10023_v6  ;;  %v10088_v6 = vcombine.high %v4815_v44, %v4819_v58 }
 0xbcf   :  { %6476 = vmatpush1.bf16.msra.mxu1 %v10025_v7  ;;  %6395 = vmatprep.subr.bf16.mxu0 %v10032_v8  ;;  %v10090_v7 = vcombine.high %v4816_v3, %v4820_v4  ;;  %v4823_v8 = vld [vmem:[%s16698_s18 + $0x4d0] sm:$0xff] }
 0xbd0   :  { %6477 = vmatprep.subr.bf16.mxu1 %v10034_v10  ;;  %v4827_v10 = vld [vmem:[%s16698_s18 + $0x4f0] sm:$0xff] }
 0xbd1   :  { %v10096_v16 = vcombine.high %v4823_v8, %v4827_v10  ;;  %v10095_v41 = vcombine.low %v4823_v8, %v4827_v10 }
 0xbd2   :  { %6396 = vmatpush1.bf16.msra.mxu0 %v10031_v20  ;;  %v4831_v20 = vld [vmem:[%s16698_s18 + $0x510] sm:$0xff] }
 0xbd3   :  { %6478 = vmatpush1.bf16.msra.mxu1 %v10033_v26  ;;  %6397 = vmatprep.subr.bf16.mxu0 %v10040_v25  ;;  %v4835_v26 = vld [vmem:[%s16698_s18 + $0x530] sm:$0xff]  ;;  %v4832_v25 = vld [vmem:[%s16698_s18 + $0x518] sm:$0xff] }
 0xbd4   :  { %6479 = vmatprep.subr.bf16.mxu1 %v10042_v27  ;;  %v4836_v27 = vld [vmem:[%s16698_s18 + $0x538] sm:$0xff]  ;;  %v10104_v29 = vcombine.high %v4831_v20, %v4835_v26  ;;  %v10103_v24 = vcombine.low %v4831_v20, %v4835_v26 }
 0xbd5   :  { %v10106_v32 = vcombine.high %v4832_v25, %v4836_v27  ;;  %v10105_v45 = vcombine.low %v4832_v25, %v4836_v27 }
 0xbd6   :  { %6398 = vmatpush1.bf16.msra.mxu0 %v10039_v43  ;;  %v4839_v43 = vld [vmem:[%s16698_s18 + $0x550] sm:$0xff] }
 0xbd7   :  { %6480 = vmatpush1.bf16.msra.mxu1 %v10041_v59  ;;  %6399 = vmatprep.subr.bf16.mxu0 %v10048_v33  ;;  %v4843_v59 = vld [vmem:[%s16698_s18 + $0x570] sm:$0xff]  ;;  %v4840_v33 = vld [vmem:[%s16698_s18 + $0x558] sm:$0xff] }
 0xbd8   :  { %6481 = vmatprep.subr.bf16.mxu1 %v10050_v37  ;;  %v4844_v37 = vld [vmem:[%s16698_s18 + $0x578] sm:$0xff]  ;;  %v10112_v21 = vcombine.high %v4839_v43, %v4843_v59  ;;  %v10111_v57 = vcombine.low %v4839_v43, %v4843_v59 }
 0xbd9   :  { %v10114_v50 = vcombine.high %v4840_v33, %v4844_v37  ;;  %v10113_v12 = vcombine.low %v4840_v33, %v4844_v37 }
 0xbda   :  { %6400 = vmatpush1.bf16.msra.mxu0 %v10047_v51  ;;  %v4847_v51 = vld [vmem:[%s16698_s18 + $0x590] sm:$0xff] }
 0xbdb   :  { %6482 = vmatpush1.bf16.msra.mxu1 %v10049_v22  ;;  %6401 = vmatprep.subr.bf16.mxu0 %v10056_v56  ;;  %v4851_v22 = vld [vmem:[%s16698_s18 + $0x5b0] sm:$0xff]  ;;  %v4848_v56 = vld [vmem:[%s16698_s18 + $0x598] sm:$0xff] }
 0xbdc   :  { %6483 = vmatprep.subr.bf16.mxu1 %v10058_v34  ;;  %v4852_v34 = vld [vmem:[%s16698_s18 + $0x5b8] sm:$0xff]  ;;  %v10120_v17 = vcombine.high %v4847_v51, %v4851_v22  ;;  %v10119_v0 = vcombine.low %v4847_v51, %v4851_v22 }
 0xbdd   :  { %v10122_v18 = vcombine.high %v4848_v56, %v4852_v34  ;;  %v10121_v23 = vcombine.low %v4848_v56, %v4852_v34 }
 0xbde   :  { %6402 = vmatpush1.bf16.msra.mxu0 %v10055_v9  ;;  %v4855_v9 = vld [vmem:[%s16698_s18 + $0x5d0] sm:$0xff] }
 0xbdf   :  { %6484 = vmatpush1.bf16.msra.mxu1 %v10057_v54  ;;  %6403 = vmatprep.subr.bf16.mxu0 %v10064_v63  ;;  %v4859_v54 = vld [vmem:[%s16698_s18 + $0x5f0] sm:$0xff]  ;;  %v4856_v63 = vld [vmem:[%s16698_s18 + $0x5d8] sm:$0xff] }
 0xbe0   :  { %6485 = vmatprep.subr.bf16.mxu1 %v10066_v42  ;;  %v4860_v42 = vld [vmem:[%s16698_s18 + $0x5f8] sm:$0xff]  ;;  %v10128_v31 = vcombine.high %v4855_v9, %v4859_v54  ;;  %v10127_v53 = vcombine.low %v4855_v9, %v4859_v54 }
 0xbe1   :  { %v10130_v14 = vcombine.high %v4856_v63, %v4860_v42  ;;  %v10129_v55 = vcombine.low %v4856_v63, %v4860_v42 }
 0xbe2   :  { %6404 = vmatpush1.bf16.msra.mxu0 %v10063_v15  ;;  %v4863_v15 = vld [vmem:[%s16698_s18 + $0x610] sm:$0xff] }
 0xbe3   :  { %6486 = vmatpush1.bf16.msra.mxu1 %v10065_v35  ;;  %6414 = vmatprep.subr.bf16.mxu0 %v10072_v38  ;;  %v4867_v35 = vld [vmem:[%s16698_s18 + $0x630] sm:$0xff]  ;;  %v4864_v38 = vld [vmem:[%s16698_s18 + $0x618] sm:$0xff] }
 0xbe4   :  { %6496 = vmatprep.subr.bf16.mxu1 %v10074_v39  ;;  %v4868_v39 = vld [vmem:[%s16698_s18 + $0x638] sm:$0xff] }
 0xbe5   :  { %6406 = vmatmul.mubr.bf16.vlgmr.msra.gmra.mrb[24].mxu0 %v14851_v46  ;;  %v10138_v62 = vcombine.high %v4864_v38, %v4868_v39 }
 0xbe6   :  { %6488 = vmatmul.mubr.bf16.vlgmr.msra.gmra.mrb[48].mxu1 %v14851_v46  ;;  %6415 = vmatpush1.bf16.msra.mxu0 %v10071_v61  ;;  %v4824_v46 = vld [vmem:[%s16698_s18 + $0x4d8] sm:$0xff]  ;;  %v10136_v61 = vcombine.high %v4863_v15, %v4867_v35 }
 0xbe7   :  { %6446 = vmatprep.mubr.bf16.mxu0 %v14869_v11  ;;  %6497 = vmatpush1.bf16.msra.mxu1 %v10073_v40  ;;  %v10098_v19 = vcombine.high %v4824_v46, %v4828_v5  ;;  %v10097_v28 = vcombine.low %v4824_v46, %v4828_v5  ;;  %v4875_v40 = vld [vmem:[%s16698_s18 + $0x670] sm:$0xff] }
 0xbe8   :  { %6528 = vmatprep.mubr.bf16.mxu1 %v14869_v11  ;;  %6416 = vmatprep.subr.bf16.mxu0 %v10080_v47  ;;  %v10087_v11 = vcombine.low %v4815_v44, %v4819_v58  ;;  %v4872_v47 = vld [vmem:[%s16698_s18 + $0x658] sm:$0xff]  ;;  %v10135_v58 = vcombine.low %v4863_v15, %v4867_v35  ;;  %v10144_v3 = vcombine.high %v4871_v36, %v4875_v40 }
 0xbe9   :  { %6498 = vmatprep.subr.bf16.mxu1 %v10082_v2  ;;  %v4876_v44 = vld [vmem:[%s16698_s18 + $0x678] sm:$0xff]  ;;  %v10137_v2 = vcombine.low %v4864_v38, %v4868_v39  ;;  %v10143_v8 = vcombine.low %v4871_v36, %v4875_v40  ;;  %v11948_v36 = vld [vmem:[%s16699_s19] ss:$16 sps:$4 sm:$0xff]  }
 0xbea   :  { %6417 = vmatpush1.bf16.msra.mxu0 %v10079_v48  ;;  %v10146_v4 = vcombine.high %v4872_v47, %v4876_v44  ;;  %v4879_v48 = vld [vmem:[%s16698_s18 + $0x690] sm:$0xff]  ;;  %v10145_v10 = vcombine.low %v4872_v47, %v4876_v44  ;;  %v11951_v40 = vld [vmem:[%s16699_s19 + $0x8] ss:$16 sps:$4 sm:$0xff]   ;;  %v11959_v44 = vld [vmem:[%s16699_s19 + $0x2c] ss:$16 sps:$4 sm:$0xff]  }
 0xbeb   :  { %6499 = vmatpush1.bf16.msra.mxu1 %v10081_v52  ;;  %6418 = vmatprep.subr.bf16.mxu0 %v10088_v6  ;;  %v4883_v52 = vld [vmem:[%s16698_s18 + $0x6b0] sm:$0xff]  ;;  %v4880_v6 = vld [vmem:[%s16698_s18 + $0x698] sm:$0xff] }
 0xbec   :  { %6500 = vmatprep.subr.bf16.mxu1 %v10090_v7  ;;  %v4884_v7 = vld [vmem:[%s16698_s18 + $0x6b8] sm:$0xff]  ;;  %v10152_v46 = vcombine.high %v4879_v48, %v4883_v52  ;;  %v10151_v20 = vcombine.low %v4879_v48, %v4883_v52  ;;  %v11956_v47 = vld [vmem:[%s16699_s19 + $0x24] ss:$16 sps:$4 sm:$0xff]  }
 0xbed   :  { %v10154_v5 = vcombine.high %v4880_v6, %v4884_v7  ;;  %v10153_v26 = vcombine.low %v4880_v6, %v4884_v7  ;;  %v11963_v48 = vld [vmem:[%s16699_s19 + $0x48] ss:$16 sps:$4 sm:$0xff]   ;;  %v11968_v52 = vld [vmem:[%s16699_s19 + $0x64] ss:$16 sps:$4 sm:$0xff]   ;;  %v11971_v6 = vld [vmem:[%s16699_s19 + $0x6c] ss:$16 sps:$4 sm:$0xff]  }
 0xbee   :  { %6419 = vmatpush1.bf16.msra.mxu0 %v10087_v11  ;;  %v4887_v11 = vld [vmem:[%s16698_s18 + $0x6d0] sm:$0xff] }
 0xbef   :  { %6501 = vmatpush1.bf16.msra.mxu1 %v10089_v13  ;;  %6420 = vmatprep.subr.bf16.mxu0 %v10096_v16  ;;  %v4891_v13 = vld [vmem:[%s16698_s18 + $0x6f0] sm:$0xff]  ;;  %v4888_v16 = vld [vmem:[%s16698_s18 + $0x6d8] sm:$0xff] }
 0xbf0   :  { %6502 = vmatprep.subr.bf16.mxu1 %v10098_v19  ;;  %v4892_v19 = vld [vmem:[%s16698_s18 + $0x6f8] sm:$0xff]  ;;  %v10160_v25 = vcombine.high %v4887_v11, %v4891_v13  ;;  %v10159_v43 = vcombine.low %v4887_v11, %v4891_v13  ;;  %v11966_v7 = vld [vmem:[%s16699_s19 + $0x60] ss:$16 sps:$4 sm:$0xff]   ;;  %v11980_v13 = vld [vmem:[%s16699_s19 + $0xa4] ss:$16 sps:$4 sm:$0xff]  }
 0xbf1   :  { %v10162_v27 = vcombine.high %v4888_v16, %v4892_v19  ;;  %v10161_v59 = vcombine.low %v4888_v16, %v4892_v19  ;;  %v11975_v11 = vld [vmem:[%s16699_s19 + $0x88] ss:$16 sps:$4 sm:$0xff]   ;;  %v11983_v16 = vld [vmem:[%s16699_s19 + $0xac] ss:$16 sps:$4 sm:$0xff]   ;;  %v11978_v19 = vld [vmem:[%s16699_s19 + $0xa0] ss:$16 sps:$4 sm:$0xff]  }
 0xbf2   :  { %6421 = vmatpush1.bf16.msra.mxu0 %v10095_v41  ;;  %v4895_v41 = vld [vmem:[%s16698_s18 + $0x710] sm:$0xff] }
 0xbf3   :  { %6503 = vmatpush1.bf16.msra.mxu1 %v10097_v28  ;;  %6422 = vmatprep.subr.bf16.mxu0 %v10104_v29  ;;  %v4899_v28 = vld [vmem:[%s16698_s18 + $0x730] sm:$0xff]  ;;  %v4896_v29 = vld [vmem:[%s16698_s18 + $0x718] sm:$0xff] }
 0xbf4   :  { %6504 = vmatprep.subr.bf16.mxu1 %v10106_v32  ;;  %v4900_v32 = vld [vmem:[%s16698_s18 + $0x738] sm:$0xff]  ;;  %v10168_v33 = vcombine.high %v4895_v41, %v4899_v28  ;;  %v10167_v51 = vcombine.low %v4895_v41, %v4899_v28  ;;  %v11992_v28 = vld [vmem:[%s16699_s19 + $0xe4] ss:$16 sps:$4 sm:$0xff]  }
 0xbf5   :  { %v10170_v37 = vcombine.high %v4896_v29, %v4900_v32  ;;  %v10169_v22 = vcombine.low %v4896_v29, %v4900_v32  ;;  %v11987_v41 = vld [vmem:[%s16699_s19 + $0xc8] ss:$16 sps:$4 sm:$0xff]   ;;  %v11995_v29 = vld [vmem:[%s16699_s19 + $0xec] ss:$16 sps:$4 sm:$0xff]   ;;  %v11990_v32 = vld [vmem:[%s16699_s19 + $0xe0] ss:$16 sps:$4 sm:$0xff]  }
 0xbf6   :  { %6423 = vmatpush1.bf16.msra.mxu0 %v10103_v24  ;;  %v4903_v24 = vld [vmem:[%s16698_s18 + $0x750] sm:$0xff] }
 0xbf7   :  { %6505 = vmatpush1.bf16.msra.mxu1 %v10105_v45  ;;  %6424 = vmatprep.subr.bf16.mxu0 %v10112_v21  ;;  %v4907_v45 = vld [vmem:[%s16698_s18 + $0x770] sm:$0xff]  ;;  %v4904_v21 = vld [vmem:[%s16698_s18 + $0x758] sm:$0xff] }
 0xbf8   :  { %6506 = vmatprep.subr.bf16.mxu1 %v10114_v50  ;;  %v4908_v50 = vld [vmem:[%s16698_s18 + $0x778] sm:$0xff]  ;;  %v10176_v56 = vcombine.high %v4903_v24, %v4907_v45  ;;  %v10175_v9 = vcombine.low %v4903_v24, %v4907_v45  ;;  %v12004_v45 = vld [vmem:[%s16699_s19 + $0x124] ss:$16 sps:$4 sm:$0xff]  }
 0xbf9   :  { %v10178_v34 = vcombine.high %v4904_v21, %v4908_v50  ;;  %v10177_v54 = vcombine.low %v4904_v21, %v4908_v50  ;;  %v11999_v24 = vld [vmem:[%s16699_s19 + $0x108] ss:$16 sps:$4 sm:$0xff]   ;;  %v12007_v21 = vld [vmem:[%s16699_s19 + $0x12c] ss:$16 sps:$4 sm:$0xff]   ;;  %v12002_v50 = vld [vmem:[%s16699_s19 + $0x120] ss:$16 sps:$4 sm:$0xff]  }
 0xbfa   :  { %6425 = vmatpush1.bf16.msra.mxu0 %v10111_v57  ;;  %v4911_v57 = vld [vmem:[%s16698_s18 + $0x790] sm:$0xff] }
 0xbfb   :  { %6507 = vmatpush1.bf16.msra.mxu1 %v10113_v12  ;;  %6426 = vmatprep.subr.bf16.mxu0 %v10120_v17  ;;  %v4915_v12 = vld [vmem:[%s16698_s18 + $0x7b0] sm:$0xff]  ;;  %v4912_v17 = vld [vmem:[%s16698_s18 + $0x798] sm:$0xff] }
 0xbfc   :  { %6508 = vmatprep.subr.bf16.mxu1 %v10122_v18  ;;  %v4916_v18 = vld [vmem:[%s16698_s18 + $0x7b8] sm:$0xff]  ;;  %v10184_v63 = vcombine.high %v4911_v57, %v4915_v12  ;;  %v10183_v15 = vcombine.low %v4911_v57, %v4915_v12  ;;  %v12016_v12 = vld [vmem:[%s16699_s19 + $0x164] ss:$16 sps:$4 sm:$0xff]  }
 0xbfd   :  { %v10186_v42 = vcombine.high %v4912_v17, %v4916_v18  ;;  %v10185_v35 = vcombine.low %v4912_v17, %v4916_v18  ;;  %v12011_v57 = vld [vmem:[%s16699_s19 + $0x148] ss:$16 sps:$4 sm:$0xff]   ;;  %v12019_v17 = vld [vmem:[%s16699_s19 + $0x16c] ss:$16 sps:$4 sm:$0xff]   ;;  %v12014_v18 = vld [vmem:[%s16699_s19 + $0x160] ss:$16 sps:$4 sm:$0xff]  }
 0xbfe   :  { %6427 = vmatpush1.bf16.msra.mxu0 %v10119_v0  ;;  %v4919_v0 = vld [vmem:[%s16698_s18 + $0x7d0] sm:$0xff] }
 0xbff   :  { %6509 = vmatpush1.bf16.msra.mxu1 %v10121_v23  ;;  %6428 = vmatprep.subr.bf16.mxu0 %v10128_v31  ;;  %v4923_v23 = vld [vmem:[%s16698_s18 + $0x7f0] sm:$0xff]  ;;  %v4920_v31 = vld [vmem:[%s16698_s18 + $0x7d8] sm:$0xff] }
 0xc00   :  { %6510 = vmatprep.subr.bf16.mxu1 %v10130_v14  ;;  %v4924_v14 = vld [vmem:[%s16698_s18 + $0x7f8] sm:$0xff]  ;;  %v10192_v38 = vcombine.high %v4919_v0, %v4923_v23 }
 0xc01   :  { %v10194_v39 = vcombine.high %v4920_v31, %v4924_v14 }
 0xc02   :  { %6429 = vmatpush1.bf16.msra.mxu0 %v10127_v53  ;;  %v10191_v53 = vcombine.low %v4919_v0, %v4923_v23  ;;  %v12023_v0 = vld [vmem:[%s16699_s19 + $0x188] ss:$16 sps:$4 sm:$0xff]   ;;  %v12028_v23 = vld [vmem:[%s16699_s19 + $0x1a4] ss:$16 sps:$4 sm:$0xff]  }
 0xc03   :  { %6511 = vmatpush1.bf16.msra.mxu1 %v10129_v55  ;;  %6430 = vmatprep.subr.bf16.mxu0 %v10136_v61  ;;  %v10193_v55 = vcombine.low %v4920_v31, %v4924_v14  ;;  %v11950_v61 = vld [vmem:[%s16699_s19 + $0x4] ss:$16 sps:$4 sm:$0xff]   ;;  %v12031_v31 = vld [vmem:[%s16699_s19 + $0x1ac] ss:$16 sps:$4 sm:$0xff]   ;;  %v12026_v14 = vld [vmem:[%s16699_s19 + $0x1a0] ss:$16 sps:$4 sm:$0xff]  }
 0xc04   :  { %6512 = vmatprep.subr.bf16.mxu1 %v10138_v62  ;;  %v11953_v62 = vld [vmem:[%s16699_s19 + $0xc] ss:$16 sps:$4 sm:$0xff]  }
 0xc06   :  { %6431 = vmatpush1.bf16.msra.mxu0 %v10135_v58  ;;  %v11954_v58 = vld [vmem:[%s16699_s19 + $0x20] ss:$16 sps:$4 sm:$0xff]  }
 0xc07   :  { %6513 = vmatpush1.bf16.msra.mxu1 %v10137_v2  ;;  %6432 = vmatprep.subr.bf16.mxu0 %v10144_v3  ;;  %v11957_v2 = vld [vmem:[%s16699_s19 + $0x28] ss:$16 sps:$4 sm:$0xff]   ;;  %v11962_v3 = vld [vmem:[%s16699_s19 + $0x44] ss:$16 sps:$4 sm:$0xff]  }
 0xc08   :  { %6514 = vmatprep.subr.bf16.mxu1 %v10146_v4  ;;  %v11960_v4 = vld [vmem:[%s16699_s19 + $0x40] ss:$16 sps:$4 sm:$0xff]  }
 0xc0a   :  { %6433 = vmatpush1.bf16.msra.mxu0 %v10143_v8  ;;  %v11969_v8 = vld [vmem:[%s16699_s19 + $0x68] ss:$16 sps:$4 sm:$0xff]  }
 0xc0b   :  { %6515 = vmatpush1.bf16.msra.mxu1 %v10145_v10  ;;  %6434 = vmatprep.subr.bf16.mxu0 %v10152_v46  ;;  %v11974_v10 = vld [vmem:[%s16699_s19 + $0x84] ss:$16 sps:$4 sm:$0xff]   ;;  %v11977_v46 = vld [vmem:[%s16699_s19 + $0x8c] ss:$16 sps:$4 sm:$0xff]  }
 0xc0c   :  { %6516 = vmatprep.subr.bf16.mxu1 %v10154_v5  ;;  %v11972_v5 = vld [vmem:[%s16699_s19 + $0x80] ss:$16 sps:$4 sm:$0xff]  }
 0xc0e   :  { %6435 = vmatpush1.bf16.msra.mxu0 %v10151_v20  ;;  %v11981_v20 = vld [vmem:[%s16699_s19 + $0xa8] ss:$16 sps:$4 sm:$0xff]  }
 0xc0f   :  { %6517 = vmatpush1.bf16.msra.mxu1 %v10153_v26  ;;  %6436 = vmatprep.subr.bf16.mxu0 %v10160_v25  ;;  %v11986_v26 = vld [vmem:[%s16699_s19 + $0xc4] ss:$16 sps:$4 sm:$0xff]   ;;  %v11989_v25 = vld [vmem:[%s16699_s19 + $0xcc] ss:$16 sps:$4 sm:$0xff]  }
 0xc10   :  { %6518 = vmatprep.subr.bf16.mxu1 %v10162_v27  ;;  %v11984_v27 = vld [vmem:[%s16699_s19 + $0xc0] ss:$16 sps:$4 sm:$0xff]  }
 0xc12   :  { %6437 = vmatpush1.bf16.msra.mxu0 %v10159_v43  ;;  %v11993_v43 = vld [vmem:[%s16699_s19 + $0xe8] ss:$16 sps:$4 sm:$0xff]  }
 0xc13   :  { %6519 = vmatpush1.bf16.msra.mxu1 %v10161_v59  ;;  %6438 = vmatprep.subr.bf16.mxu0 %v10168_v33  ;;  %v11998_v59 = vld [vmem:[%s16699_s19 + $0x104] ss:$16 sps:$4 sm:$0xff]   ;;  %v12001_v33 = vld [vmem:[%s16699_s19 + $0x10c] ss:$16 sps:$4 sm:$0xff]  }
 0xc14   :  { %6520 = vmatprep.subr.bf16.mxu1 %v10170_v37  ;;  %v11996_v37 = vld [vmem:[%s16699_s19 + $0x100] ss:$16 sps:$4 sm:$0xff]  }
 0xc16   :  { %6439 = vmatpush1.bf16.msra.mxu0 %v10167_v51  ;;  %v12005_v51 = vld [vmem:[%s16699_s19 + $0x128] ss:$16 sps:$4 sm:$0xff]  }
 0xc17   :  { %6521 = vmatpush1.bf16.msra.mxu1 %v10169_v22  ;;  %6440 = vmatprep.subr.bf16.mxu0 %v10176_v56  ;;  %v12010_v22 = vld [vmem:[%s16699_s19 + $0x144] ss:$16 sps:$4 sm:$0xff]   ;;  %v12013_v56 = vld [vmem:[%s16699_s19 + $0x14c] ss:$16 sps:$4 sm:$0xff]  }
 0xc18   :  { %6522 = vmatprep.subr.bf16.mxu1 %v10178_v34  ;;  %v12008_v34 = vld [vmem:[%s16699_s19 + $0x140] ss:$16 sps:$4 sm:$0xff]  }
 0xc1a   :  { %6441 = vmatpush1.bf16.msra.mxu0 %v10175_v9  ;;  %v12017_v9 = vld [vmem:[%s16699_s19 + $0x168] ss:$16 sps:$4 sm:$0xff]  }
 0xc1b   :  { %6523 = vmatpush1.bf16.msra.mxu1 %v10177_v54  ;;  %6442 = vmatprep.subr.bf16.mxu0 %v10184_v63  ;;  %v12022_v54 = vld [vmem:[%s16699_s19 + $0x184] ss:$16 sps:$4 sm:$0xff]   ;;  %v12025_v63 = vld [vmem:[%s16699_s19 + $0x18c] ss:$16 sps:$4 sm:$0xff]  }
 0xc1c   :  { %6524 = vmatprep.subr.bf16.mxu1 %v10186_v42  ;;  %v12020_v42 = vld [vmem:[%s16699_s19 + $0x180] ss:$16 sps:$4 sm:$0xff]  }
 0xc1e   :  { %6443 = vmatpush1.bf16.msra.mxu0 %v10183_v15  ;;  %v12029_v15 = vld [vmem:[%s16699_s19 + $0x1a8] ss:$16 sps:$4 sm:$0xff]  }
 0xc1f   :  { %6525 = vmatpush1.bf16.msra.mxu1 %v10185_v35  ;;  %6444 = vmatprep.subr.bf16.mxu0 %v10192_v38  ;;  %v12034_v35 = vld [vmem:[%s16699_s19 + $0x1c4] ss:$16 sps:$4 sm:$0xff]   ;;  %v12037_v38 = vld [vmem:[%s16699_s19 + $0x1cc] ss:$16 sps:$4 sm:$0xff]  }
 0xc20   :  { %6526 = vmatprep.subr.bf16.mxu1 %v10194_v39  ;;  %v12032_v39 = vld [vmem:[%s16699_s19 + $0x1c0] ss:$16 sps:$4 sm:$0xff]  }
 0xc22   :  { %6445 = vmatpush1.bf16.msra.mxu0 %v10191_v53  ;;  %v12035_v53 = vld [vmem:[%s16699_s19 + $0x1c8] ss:$16 sps:$4 sm:$0xff]  }
 0xc23   :  { %6527 = vmatpush1.bf16.msra.mxu1 %v10193_v55  ;;  %8135 = vmatprep.subr.bf16.mxu0 %v11950_v61  ;;  %v12040_v55 = vld [vmem:[%s16699_s19 + $0x1e4] ss:$16 sps:$4 sm:$0xff]   ;;  %v12043_v61 = vld [vmem:[%s16699_s19 + $0x1ec] ss:$16 sps:$4 sm:$0xff]  }
 0xc24   :  { %8299 = vmatprep.subr.bf16.mxu1 %v11953_v62  ;;  %v12038_v62 = vld [vmem:[%s16699_s19 + $0x1e0] ss:$16 sps:$4 sm:$0xff]  }
 0xc25   :  { %6447 = vmatmul.mubr.bf16.vlgmr.msra.gmra.mrb[24].mxu0 %v15054_v1 }
 0xc26   :  { %6529 = vmatmul.mubr.bf16.vlgmr.msra.gmra.mrb[48].mxu1 %v15054_v1  ;;  %8136 = vmatpush1.bf16.msra.mxu0 %v11948_v36  ;;  %v11965_v1 = vld [vmem:[%s16699_s19 + $0x4c] ss:$16 sps:$4 sm:$0xff]   ;;  %v12041_v36 = vld [vmem:[%s16699_s19 + $0x1e8] ss:$16 sps:$4 sm:$0xff]  }
 0xc27   :  { %8300 = vmatpush1.bf16.msra.mxu1 %v11951_v40  ;;  %8137 = vmatprep.subr.bf16.mxu0 %v11956_v47  ;;  %v12046_v40 = vld [vmem:[%s16699_s19 + $0x204] ss:$16 sps:$4 sm:$0xff]   ;;  %v12049_v47 = vld [vmem:[%s16699_s19 + $0x20c] ss:$16 sps:$4 sm:$0xff]  }
 0xc28   :  { %8301 = vmatprep.subr.bf16.mxu1 %v11959_v44 }
 0xc2a   :  { %8138 = vmatpush1.bf16.msra.mxu0 %v11954_v58 }
 0xc2b   :  { %8302 = vmatpush1.bf16.msra.mxu1 %v11957_v2  ;;  %8139 = vmatprep.subr.bf16.mxu0 %v11962_v3 }
 0xc2c   :  { %8303 = vmatprep.subr.bf16.mxu1 %v11965_v1 }
 0xc2e   :  { %8140 = vmatpush1.bf16.msra.mxu0 %v11960_v4 }
 0xc2f   :  { %8304 = vmatpush1.bf16.msra.mxu1 %v11963_v48  ;;  %8141 = vmatprep.subr.bf16.mxu0 %v11968_v52 }
 0xc30   :  { %8305 = vmatprep.subr.bf16.mxu1 %v11971_v6 }
 0xc32   :  { %8142 = vmatpush1.bf16.msra.mxu0 %v11966_v7 }
 0xc33   :  { %8306 = vmatpush1.bf16.msra.mxu1 %v11969_v8  ;;  %8143 = vmatprep.subr.bf16.mxu0 %v11974_v10 }
 0xc34   :  { %8307 = vmatprep.subr.bf16.mxu1 %v11977_v46 }
 0xc36   :  { %8144 = vmatpush1.bf16.msra.mxu0 %v11972_v5 }
 0xc37   :  { %8308 = vmatpush1.bf16.msra.mxu1 %v11975_v11  ;;  %8145 = vmatprep.subr.bf16.mxu0 %v11980_v13  ;;  %v12044_v11 = vld [vmem:[%s16699_s19 + $0x200] ss:$16 sps:$4 sm:$0xff]   ;;  %v12047_v13 = vld [vmem:[%s16699_s19 + $0x208] ss:$16 sps:$4 sm:$0xff]  }
 0xc38   :  { %8309 = vmatprep.subr.bf16.mxu1 %v11983_v16 }
 0xc3a   :  { %8146 = vmatpush1.bf16.msra.mxu0 %v11978_v19 }
 0xc3b   :  { %8310 = vmatpush1.bf16.msra.mxu1 %v11981_v20  ;;  %8147 = vmatprep.subr.bf16.mxu0 %v11986_v26  ;;  %v12052_v26 = vld [vmem:[%s16699_s19 + $0x224] ss:$16 sps:$4 sm:$0xff]  }
 0xc3c   :  { %8311 = vmatprep.subr.bf16.mxu1 %v11989_v25  ;;  %v12055_v25 = vld [vmem:[%s16699_s19 + $0x22c] ss:$16 sps:$4 sm:$0xff]  }
 0xc3e   :  { %8148 = vmatpush1.bf16.msra.mxu0 %v11984_v27 }
 0xc3f   :  { %8312 = vmatpush1.bf16.msra.mxu1 %v11987_v41  ;;  %8149 = vmatprep.subr.bf16.mxu0 %v11992_v28  ;;  %v12050_v28 = vld [vmem:[%s16699_s19 + $0x220] ss:$16 sps:$4 sm:$0xff]  }
 0xc40   :  { %8313 = vmatprep.subr.bf16.mxu1 %v11995_v29  ;;  %v12053_v29 = vld [vmem:[%s16699_s19 + $0x228] ss:$16 sps:$4 sm:$0xff]  }
 0xc42   :  { %8150 = vmatpush1.bf16.msra.mxu0 %v11990_v32 }
 0xc43   :  { %8314 = vmatpush1.bf16.msra.mxu1 %v11993_v43  ;;  %8151 = vmatprep.subr.bf16.mxu0 %v11998_v59  ;;  %v12058_v43 = vld [vmem:[%s16699_s19 + $0x244] ss:$16 sps:$4 sm:$0xff]   ;;  %v12061_v59 = vld [vmem:[%s16699_s19 + $0x24c] ss:$16 sps:$4 sm:$0xff]  }
 0xc44   :  { %8315 = vmatprep.subr.bf16.mxu1 %v12001_v33  ;;  %v12056_v33 = vld [vmem:[%s16699_s19 + $0x240] ss:$16 sps:$4 sm:$0xff]  }
 0xc46   :  { %8152 = vmatpush1.bf16.msra.mxu0 %v11996_v37  ;;  %v12059_v37 = vld [vmem:[%s16699_s19 + $0x248] ss:$16 sps:$4 sm:$0xff]  }
 0xc47   :  { %8316 = vmatpush1.bf16.msra.mxu1 %v11999_v24  ;;  %8153 = vmatprep.subr.bf16.mxu0 %v12004_v45  ;;  %v12064_v24 = vld [vmem:[%s16699_s19 + $0x264] ss:$16 sps:$4 sm:$0xff]   ;;  %v12067_v45 = vld [vmem:[%s16699_s19 + $0x26c] ss:$16 sps:$4 sm:$0xff]  }
 0xc48   :  { %8317 = vmatprep.subr.bf16.mxu1 %v12007_v21  ;;  %v12062_v21 = vld [vmem:[%s16699_s19 + $0x260] ss:$16 sps:$4 sm:$0xff]  }
 0xc4a   :  { %8154 = vmatpush1.bf16.msra.mxu0 %v12002_v50  ;;  %v12065_v50 = vld [vmem:[%s16699_s19 + $0x268] ss:$16 sps:$4 sm:$0xff]  }
 0xc4b   :  { %8318 = vmatpush1.bf16.msra.mxu1 %v12005_v51  ;;  %8155 = vmatprep.subr.bf16.mxu0 %v12010_v22  ;;  %v12070_v51 = vld [vmem:[%s16699_s19 + $0x284] ss:$16 sps:$4 sm:$0xff]   ;;  %v12073_v22 = vld [vmem:[%s16699_s19 + $0x28c] ss:$16 sps:$4 sm:$0xff]  }
 0xc4c   :  { %8319 = vmatprep.subr.bf16.mxu1 %v12013_v56  ;;  %v12068_v56 = vld [vmem:[%s16699_s19 + $0x280] ss:$16 sps:$4 sm:$0xff]  }
 0xc4e   :  { %8156 = vmatpush1.bf16.msra.mxu0 %v12008_v34  ;;  %v12071_v34 = vld [vmem:[%s16699_s19 + $0x288] ss:$16 sps:$4 sm:$0xff]  }
 0xc4f   :  { %8320 = vmatpush1.bf16.msra.mxu1 %v12011_v57  ;;  %8157 = vmatprep.subr.bf16.mxu0 %v12016_v12  ;;  %v12076_v57 = vld [vmem:[%s16699_s19 + $0x2a4] ss:$16 sps:$4 sm:$0xff]   ;;  %v12079_v12 = vld [vmem:[%s16699_s19 + $0x2ac] ss:$16 sps:$4 sm:$0xff]  }
 0xc50   :  { %8321 = vmatprep.subr.bf16.mxu1 %v12019_v17  ;;  %v12074_v17 = vld [vmem:[%s16699_s19 + $0x2a0] ss:$16 sps:$4 sm:$0xff]  }
 0xc52   :  { %8158 = vmatpush1.bf16.msra.mxu0 %v12014_v18  ;;  %v12077_v18 = vld [vmem:[%s16699_s19 + $0x2a8] ss:$16 sps:$4 sm:$0xff]  }
 0xc53   :  { %8322 = vmatpush1.bf16.msra.mxu1 %v12017_v9  ;;  %8159 = vmatprep.subr.bf16.mxu0 %v12022_v54  ;;  %v12082_v9 = vld [vmem:[%s16699_s19 + $0x2c4] ss:$16 sps:$4 sm:$0xff]   ;;  %v12085_v54 = vld [vmem:[%s16699_s19 + $0x2cc] ss:$16 sps:$4 sm:$0xff]  }
 0xc54   :  { %8323 = vmatprep.subr.bf16.mxu1 %v12025_v63  ;;  %v12080_v63 = vld [vmem:[%s16699_s19 + $0x2c0] ss:$16 sps:$4 sm:$0xff]  }
 0xc56   :  { %8160 = vmatpush1.bf16.msra.mxu0 %v12020_v42  ;;  %v12083_v42 = vld [vmem:[%s16699_s19 + $0x2c8] ss:$16 sps:$4 sm:$0xff]  }
 0xc57   :  { %8324 = vmatpush1.bf16.msra.mxu1 %v12023_v0  ;;  %8161 = vmatprep.subr.bf16.mxu0 %v12028_v23  ;;  %v12088_v0 = vld [vmem:[%s16699_s19 + $0x2e4] ss:$16 sps:$4 sm:$0xff]   ;;  %v12091_v23 = vld [vmem:[%s16699_s19 + $0x2ec] ss:$16 sps:$4 sm:$0xff]  }
 0xc58   :  { %8325 = vmatprep.subr.bf16.mxu1 %v12031_v31  ;;  %v12086_v31 = vld [vmem:[%s16699_s19 + $0x2e0] ss:$16 sps:$4 sm:$0xff]  }
 0xc5a   :  { %8162 = vmatpush1.bf16.msra.mxu0 %v12026_v14  ;;  %v12089_v14 = vld [vmem:[%s16699_s19 + $0x2e8] ss:$16 sps:$4 sm:$0xff]  }
 0xc5b   :  { %8326 = vmatpush1.bf16.msra.mxu1 %v12029_v15  ;;  %8163 = vmatprep.subr.bf16.mxu0 %v12034_v35  ;;  %v12094_v15 = vld [vmem:[%s16699_s19 + $0x304] ss:$16 sps:$4 sm:$0xff]   ;;  %v12097_v35 = vld [vmem:[%s16699_s19 + $0x30c] ss:$16 sps:$4 sm:$0xff]  }
 0xc5c   :  { %8327 = vmatprep.subr.bf16.mxu1 %v12037_v38  ;;  %v12092_v38 = vld [vmem:[%s16699_s19 + $0x300] ss:$16 sps:$4 sm:$0xff]  }
 0xc5e   :  { %8164 = vmatpush1.bf16.msra.mxu0 %v12032_v39  ;;  %v12095_v39 = vld [vmem:[%s16699_s19 + $0x308] ss:$16 sps:$4 sm:$0xff]  }
 0xc5f   :  { %8328 = vmatpush1.bf16.msra.mxu1 %v12035_v53  ;;  %8165 = vmatprep.subr.bf16.mxu0 %v12040_v55  ;;  %v12100_v53 = vld [vmem:[%s16699_s19 + $0x324] ss:$16 sps:$4 sm:$0xff]   ;;  %v12103_v55 = vld [vmem:[%s16699_s19 + $0x32c] ss:$16 sps:$4 sm:$0xff]  }
 0xc60   :  { %8329 = vmatprep.subr.bf16.mxu1 %v12043_v61  ;;  %v12098_v61 = vld [vmem:[%s16699_s19 + $0x320] ss:$16 sps:$4 sm:$0xff]  }
 0xc62   :  { %8166 = vmatpush1.bf16.msra.mxu0 %v12038_v62  ;;  %v12101_v62 = vld [vmem:[%s16699_s19 + $0x328] ss:$16 sps:$4 sm:$0xff]  }
 0xc63   :  { %8330 = vmatpush1.bf16.msra.mxu1 %v12041_v36  ;;  %8176 = vmatprep.subr.bf16.mxu0 %v12046_v40  ;;  %v12106_v36 = vld [vmem:[%s16699_s19 + $0x344] ss:$16 sps:$4 sm:$0xff]   ;;  %v12109_v40 = vld [vmem:[%s16699_s19 + $0x34c] ss:$16 sps:$4 sm:$0xff]  }
 0xc64   :  { %8340 = vmatprep.subr.bf16.mxu1 %v12049_v47  ;;  %v12104_v47 = vld [vmem:[%s16699_s19 + $0x340] ss:$16 sps:$4 sm:$0xff]  }
 0xc78   :  { %v6284_v44 = vpop.f32.mrb[20].mxu0  ;;  %v6366_v58 = vpop.f32.mrb[44].mxu1 }
 0xc79   :  { %12450 = vtanh.f32 %v6284_v44  ;;  %v6286_v2 = vpop.f32.mrb[21].mxu0  ;;  %v6368_v3 = vpop.f32.mrb[45].mxu1  ;;  %v12107_v44 = vld [vmem:[%s16699_s19 + $0x348] ss:$16 sps:$4 sm:$0xff]  }
 0xc7a   :  { %12452 = vtanh.f32 %v6366_v58  ;;  %v6288_v1 = vpop.f32.mrb[22].mxu0  ;;  %v6370_v4 = vpop.f32.mrb[46].mxu1  ;;  %v12112_v58 = vld [vmem:[%s16699_s19 + $0x364] ss:$16 sps:$4 sm:$0xff]  }
 0xc7b   :  { %12454 = vtanh.f32 %v6286_v2  ;;  %v6289_v48 = vpop.f32.mrb[23].mxu0  ;;  %v6371_v52 = vpop.f32.mrb[47].mxu1  ;;  %v12115_v2 = vld [vmem:[%s16699_s19 + $0x36c] ss:$16 sps:$4 sm:$0xff]   ;;  %v12113_v1 = vld [vmem:[%s16699_s19 + $0x368] ss:$16 sps:$4 sm:$0xff]  }
 0xc7c   :  { %12456 = vtanh.f32 %v6368_v3  ;;  %v12110_v3 = vld [vmem:[%s16699_s19 + $0x360] ss:$16 sps:$4 sm:$0xff]   ;;  %v12118_v4 = vld [vmem:[%s16699_s19 + $0x384] ss:$16 sps:$4 sm:$0xff]   ;;  %v12121_v48 = vld [vmem:[%s16699_s19 + $0x38c] ss:$16 sps:$4 sm:$0xff]  }
 0xc7d   :  { %v12116_v52 = vld [vmem:[%s16699_s19 + $0x380] ss:$16 sps:$4 sm:$0xff]  }
 0xc83   :  { %v12451_v6 = vpop.eup %12450 }
 0xc84   :  { %v15624_v7 = vpop.eup %12452  ;;  %v6847_v19 = vpack.c.bf16 %v12451_v6, %v12451_v6 }
 0xc85   :  { %v12455_v8 = vpop.eup %12454 }
 0xc86   :  { %v12457_v10 = vpop.eup %12456  ;;  %v6553_v46 = vcombine.low %v12451_v6, %v12455_v8  ;;  %v6848_v5 = vpack.c.bf16 %v12455_v8, %v12455_v8  ;;  %v12119_v6 = vld [vmem:[%s16699_s19 + $0x388] ss:$16 sps:$4 sm:$0xff]   ;;  %v12124_v8 = vld [vmem:[%s16699_s19 + $0x3a4] ss:$16 sps:$4 sm:$0xff]  }
 0xc87   :  { %v6554_v16 = vcombine.low %v15624_v7, %v12457_v10  ;;  %v6850_v41 = vpack.c.bf16 %v12457_v10, %v12457_v10  ;;  %v12127_v10 = vld [vmem:[%s16699_s19 + $0x3ac] ss:$16 sps:$4 sm:$0xff]  }
 0xc88   :  { %v6561_v20 = vrot.slane %v6553_v46, %v12801_v49  ;;  %8167 = vmatprep.mubr.bf16.mxu0 %v6848_v5  ;;  %8331 = vmatprep.mubr.bf16.mxu1 %v6848_v5  ;;  %v12122_v46 = vld [vmem:[%s16699_s19 + $0x3a0] ss:$16 sps:$4 sm:$0xff]   ;;  %v12125_v5 = vld [vmem:[%s16699_s19 + $0x3a8] ss:$16 sps:$4 sm:$0xff]  }
 0xc89   :  { %v6568_v27 = vrot.slane %v6554_v16, %v12801_v49  ;;  %8168 = vmatmul.mubr.bf16.vlgmr.msra.gmra.mrb[28].mxu0 %v6847_v19  ;;  %8332 = vmatmul.mubr.bf16.vlgmr.msra.gmra.mrb[52].mxu1 %v6847_v19  ;;  %v12128_v16 = vld [vmem:[%s16699_s19 + $0x3c0] ss:$16 sps:$4 sm:$0xff]   ;;  %v12131_v19 = vld [vmem:[%s16699_s19 + $0x3c8] ss:$16 sps:$4 sm:$0xff]  }
 0xc8a   :  { %8177 = vmatpush1.bf16.msra.mxu0 %v12044_v11  ;;  %8341 = vmatpush1.bf16.msra.mxu1 %v12047_v13  ;;  %v12130_v11 = vld [vmem:[%s16699_s19 + $0x3c4] ss:$16 sps:$4 sm:$0xff]   ;;  %v12133_v13 = vld [vmem:[%s16699_s19 + $0x3cc] ss:$16 sps:$4 sm:$0xff]  }
 0xc8b   :  { %v6569_v32 = vcombine.low %v6561_v20, %v6568_v27  ;;  %8208 = vmatprep.mubr.bf16.mxu0 %v6850_v41  ;;  %8372 = vmatprep.mubr.bf16.mxu1 %v6850_v41  ;;  %v12136_v20 = vld [vmem:[%s16699_s19 + $0x3e4] ss:$16 sps:$4 sm:$0xff]   ;;  %v12137_v27 = vld [vmem:[%s16699_s19 + $0x3e8] ss:$16 sps:$4 sm:$0xff]  }
 0xc8c   :  { %8178 = vmatprep.subr.bf16.mxu0 %v12052_v26  ;;  %8342 = vmatprep.subr.bf16.mxu1 %v12055_v25  ;;  %v12139_v26 = vld [vmem:[%s16699_s19 + $0x3ec] ss:$16 sps:$4 sm:$0xff]   ;;  %v12134_v25 = vld [vmem:[%s16699_s19 + $0x3e0] ss:$16 sps:$4 sm:$0xff]   ;;  %v12142_v41 = vld [vmem:[%s16699_s19 + $0x404] ss:$16 sps:$4 sm:$0xff]  }
 0xc8d   :  { %6589 = vst [vmem:[%s16707_s27] sm:$0xff] %v6569_v32  ;;  %v12143_v32 = vld [vmem:[%s16699_s19 + $0x408] ss:$16 sps:$4 sm:$0xff]  }
 0xc8e   :  { %8179 = vmatpush1.bf16.msra.mxu0 %v12050_v28  ;;  %8343 = vmatpush1.bf16.msra.mxu1 %v12053_v29  ;;  %v12145_v28 = vld [vmem:[%s16699_s19 + $0x40c] ss:$16 sps:$4 sm:$0xff]   ;;  %v12140_v29 = vld [vmem:[%s16699_s19 + $0x400] ss:$16 sps:$4 sm:$0xff]  }
 0xc8f   :  { %8180 = vmatprep.subr.bf16.mxu0 %v12058_v43  ;;  %8344 = vmatprep.subr.bf16.mxu1 %v12061_v59  ;;  %v6849_v43 = vpack.c.bf16 %v15624_v7, %v15624_v7  ;;  %v12148_v59 = vld [vmem:[%s16699_s19 + $0x424] ss:$16 sps:$4 sm:$0xff]   ;;  %v12149_v7 = vld [vmem:[%s16699_s19 + $0x428] ss:$16 sps:$4 sm:$0xff]  }
 0xc92   :  { %8181 = vmatpush1.bf16.msra.mxu0 %v12056_v33  ;;  %8345 = vmatpush1.bf16.msra.mxu1 %v12059_v37  ;;  %v12151_v33 = vld [vmem:[%s16699_s19 + $0x42c] ss:$16 sps:$4 sm:$0xff]   ;;  %v12146_v37 = vld [vmem:[%s16699_s19 + $0x420] ss:$16 sps:$4 sm:$0xff]  }
 0xc93   :  { %8182 = vmatprep.subr.bf16.mxu0 %v12064_v24  ;;  %8346 = vmatprep.subr.bf16.mxu1 %v12067_v45  ;;  %v12154_v24 = vld [vmem:[%s16699_s19 + $0x444] ss:$16 sps:$4 sm:$0xff]   ;;  %v12157_v45 = vld [vmem:[%s16699_s19 + $0x44c] ss:$16 sps:$4 sm:$0xff]  }
 0xc96   :  { %8183 = vmatpush1.bf16.msra.mxu0 %v12062_v21  ;;  %8347 = vmatpush1.bf16.msra.mxu1 %v12065_v50  ;;  %v12152_v21 = vld [vmem:[%s16699_s19 + $0x440] ss:$16 sps:$4 sm:$0xff]   ;;  %v12155_v50 = vld [vmem:[%s16699_s19 + $0x448] ss:$16 sps:$4 sm:$0xff]  }
 0xc97   :  { %8184 = vmatprep.subr.bf16.mxu0 %v12070_v51  ;;  %8348 = vmatprep.subr.bf16.mxu1 %v12073_v22  ;;  %v12160_v51 = vld [vmem:[%s16699_s19 + $0x464] ss:$16 sps:$4 sm:$0xff]   ;;  %v12163_v22 = vld [vmem:[%s16699_s19 + $0x46c] ss:$16 sps:$4 sm:$0xff]  }
 0xc9a   :  { %8185 = vmatpush1.bf16.msra.mxu0 %v12068_v56  ;;  %8349 = vmatpush1.bf16.msra.mxu1 %v12071_v34  ;;  %v12158_v56 = vld [vmem:[%s16699_s19 + $0x460] ss:$16 sps:$4 sm:$0xff]   ;;  %v12161_v34 = vld [vmem:[%s16699_s19 + $0x468] ss:$16 sps:$4 sm:$0xff]  }
 0xc9b   :  { %8186 = vmatprep.subr.bf16.mxu0 %v12076_v57  ;;  %8350 = vmatprep.subr.bf16.mxu1 %v12079_v12  ;;  %v12166_v57 = vld [vmem:[%s16699_s19 + $0x484] ss:$16 sps:$4 sm:$0xff]   ;;  %v12169_v12 = vld [vmem:[%s16699_s19 + $0x48c] ss:$16 sps:$4 sm:$0xff]  }
 0xc9e   :  { %8187 = vmatpush1.bf16.msra.mxu0 %v12074_v17  ;;  %8351 = vmatpush1.bf16.msra.mxu1 %v12077_v18  ;;  %v12164_v17 = vld [vmem:[%s16699_s19 + $0x480] ss:$16 sps:$4 sm:$0xff]   ;;  %v12167_v18 = vld [vmem:[%s16699_s19 + $0x488] ss:$16 sps:$4 sm:$0xff]  }
 0xc9f   :  { %8188 = vmatprep.subr.bf16.mxu0 %v12082_v9  ;;  %8352 = vmatprep.subr.bf16.mxu1 %v12085_v54  ;;  %v12172_v9 = vld [vmem:[%s16699_s19 + $0x4a4] ss:$16 sps:$4 sm:$0xff]   ;;  %v12175_v54 = vld [vmem:[%s16699_s19 + $0x4ac] ss:$16 sps:$4 sm:$0xff]  }
 0xca2   :  { %8189 = vmatpush1.bf16.msra.mxu0 %v12080_v63  ;;  %8353 = vmatpush1.bf16.msra.mxu1 %v12083_v42  ;;  %v12170_v63 = vld [vmem:[%s16699_s19 + $0x4a0] ss:$16 sps:$4 sm:$0xff]   ;;  %v12173_v42 = vld [vmem:[%s16699_s19 + $0x4a8] ss:$16 sps:$4 sm:$0xff]  }
 0xca3   :  { %8190 = vmatprep.subr.bf16.mxu0 %v12088_v0  ;;  %8354 = vmatprep.subr.bf16.mxu1 %v12091_v23  ;;  %v12178_v0 = vld [vmem:[%s16699_s19 + $0x4c4] ss:$16 sps:$4 sm:$0xff]   ;;  %v12181_v23 = vld [vmem:[%s16699_s19 + $0x4cc] ss:$16 sps:$4 sm:$0xff]  }
 0xca6   :  { %8191 = vmatpush1.bf16.msra.mxu0 %v12086_v31  ;;  %8355 = vmatpush1.bf16.msra.mxu1 %v12089_v14  ;;  %v12176_v31 = vld [vmem:[%s16699_s19 + $0x4c0] ss:$16 sps:$4 sm:$0xff]   ;;  %v12179_v14 = vld [vmem:[%s16699_s19 + $0x4c8] ss:$16 sps:$4 sm:$0xff]  }
 0xca7   :  { %8192 = vmatprep.subr.bf16.mxu0 %v12094_v15  ;;  %8356 = vmatprep.subr.bf16.mxu1 %v12097_v35  ;;  %v12184_v15 = vld [vmem:[%s16699_s19 + $0x4e4] ss:$16 sps:$4 sm:$0xff]   ;;  %v12187_v35 = vld [vmem:[%s16699_s19 + $0x4ec] ss:$16 sps:$4 sm:$0xff]  }
 0xcaa   :  { %8193 = vmatpush1.bf16.msra.mxu0 %v12092_v38  ;;  %8357 = vmatpush1.bf16.msra.mxu1 %v12095_v39  ;;  %v12182_v38 = vld [vmem:[%s16699_s19 + $0x4e0] ss:$16 sps:$4 sm:$0xff]   ;;  %v12185_v39 = vld [vmem:[%s16699_s19 + $0x4e8] ss:$16 sps:$4 sm:$0xff]  }
 0xcab   :  { %8194 = vmatprep.subr.bf16.mxu0 %v12100_v53  ;;  %8358 = vmatprep.subr.bf16.mxu1 %v12103_v55  ;;  %v12190_v53 = vld [vmem:[%s16699_s19 + $0x504] ss:$16 sps:$4 sm:$0xff]   ;;  %v12193_v55 = vld [vmem:[%s16699_s19 + $0x50c] ss:$16 sps:$4 sm:$0xff]  }
 0xcae   :  { %8195 = vmatpush1.bf16.msra.mxu0 %v12098_v61  ;;  %8359 = vmatpush1.bf16.msra.mxu1 %v12101_v62  ;;  %v12188_v61 = vld [vmem:[%s16699_s19 + $0x500] ss:$16 sps:$4 sm:$0xff]   ;;  %v12191_v62 = vld [vmem:[%s16699_s19 + $0x508] ss:$16 sps:$4 sm:$0xff]  }
 0xcaf   :  { %8196 = vmatprep.subr.bf16.mxu0 %v12106_v36  ;;  %8360 = vmatprep.subr.bf16.mxu1 %v12109_v40  ;;  %v12196_v36 = vld [vmem:[%s16699_s19 + $0x524] ss:$16 sps:$4 sm:$0xff]   ;;  %v12199_v40 = vld [vmem:[%s16699_s19 + $0x52c] ss:$16 sps:$4 sm:$0xff]  }
 0xcb2   :  { %8197 = vmatpush1.bf16.msra.mxu0 %v12104_v47  ;;  %8361 = vmatpush1.bf16.msra.mxu1 %v12107_v44  ;;  %v12194_v47 = vld [vmem:[%s16699_s19 + $0x520] ss:$16 sps:$4 sm:$0xff]   ;;  %v12197_v44 = vld [vmem:[%s16699_s19 + $0x528] ss:$16 sps:$4 sm:$0xff]  }
 0xcb3   :  { %8198 = vmatprep.subr.bf16.mxu0 %v12112_v58  ;;  %8362 = vmatprep.subr.bf16.mxu1 %v12115_v2  ;;  %v12202_v58 = vld [vmem:[%s16699_s19 + $0x544] ss:$16 sps:$4 sm:$0xff]   ;;  %v12205_v2 = vld [vmem:[%s16699_s19 + $0x54c] ss:$16 sps:$4 sm:$0xff]  }
 0xcb6   :  { %8199 = vmatpush1.bf16.msra.mxu0 %v12110_v3  ;;  %8363 = vmatpush1.bf16.msra.mxu1 %v12113_v1  ;;  %v12200_v3 = vld [vmem:[%s16699_s19 + $0x540] ss:$16 sps:$4 sm:$0xff]   ;;  %v12203_v1 = vld [vmem:[%s16699_s19 + $0x548] ss:$16 sps:$4 sm:$0xff]  }
 0xcb7   :  { %8200 = vmatprep.subr.bf16.mxu0 %v12118_v4  ;;  %8364 = vmatprep.subr.bf16.mxu1 %v12121_v48  ;;  %v12208_v4 = vld [vmem:[%s16699_s19 + $0x564] ss:$16 sps:$4 sm:$0xff]   ;;  %v12211_v48 = vld [vmem:[%s16699_s19 + $0x56c] ss:$16 sps:$4 sm:$0xff]  }
 0xcba   :  { %8201 = vmatpush1.bf16.msra.mxu0 %v12116_v52  ;;  %8365 = vmatpush1.bf16.msra.mxu1 %v12119_v6  ;;  %v12206_v52 = vld [vmem:[%s16699_s19 + $0x560] ss:$16 sps:$4 sm:$0xff]   ;;  %v12209_v6 = vld [vmem:[%s16699_s19 + $0x568] ss:$16 sps:$4 sm:$0xff]  }
 0xcbb   :  { %8202 = vmatprep.subr.bf16.mxu0 %v12124_v8  ;;  %8366 = vmatprep.subr.bf16.mxu1 %v12127_v10  ;;  %v12214_v8 = vld [vmem:[%s16699_s19 + $0x584] ss:$16 sps:$4 sm:$0xff]   ;;  %v12217_v10 = vld [vmem:[%s16699_s19 + $0x58c] ss:$16 sps:$4 sm:$0xff]  }
 0xcbe   :  { %8203 = vmatpush1.bf16.msra.mxu0 %v12122_v46  ;;  %8367 = vmatpush1.bf16.msra.mxu1 %v12125_v5  ;;  %v12212_v46 = vld [vmem:[%s16699_s19 + $0x580] ss:$16 sps:$4 sm:$0xff]   ;;  %v12215_v5 = vld [vmem:[%s16699_s19 + $0x588] ss:$16 sps:$4 sm:$0xff]  }
 0xcbf   :  { %8204 = vmatprep.subr.bf16.mxu0 %v12130_v11  ;;  %8368 = vmatprep.subr.bf16.mxu1 %v12133_v13  ;;  %v12220_v11 = vld [vmem:[%s16699_s19 + $0x5a4] ss:$16 sps:$4 sm:$0xff]   ;;  %v12223_v13 = vld [vmem:[%s16699_s19 + $0x5ac] ss:$16 sps:$4 sm:$0xff]  }
 0xcc2   :  { %8205 = vmatpush1.bf16.msra.mxu0 %v12128_v16  ;;  %8369 = vmatpush1.bf16.msra.mxu1 %v12131_v19 }
 0xcc3   :  { %8206 = vmatprep.subr.bf16.mxu0 %v12136_v20  ;;  %8370 = vmatprep.subr.bf16.mxu1 %v12139_v26 }
 0xcc6   :  { %8207 = vmatpush1.bf16.msra.mxu0 %v12134_v25  ;;  %8371 = vmatpush1.bf16.msra.mxu1 %v12137_v27  ;;  %v12218_v27 = vld [vmem:[%s16699_s19 + $0x5a0] ss:$16 sps:$4 sm:$0xff]  }
 0xcc7   :  { %8217 = vmatprep.subr.bf16.mxu0 %v12142_v41  ;;  %8381 = vmatprep.subr.bf16.mxu1 %v12145_v28  ;;  %v12221_v41 = vld [vmem:[%s16699_s19 + $0x5a8] ss:$16 sps:$4 sm:$0xff]  }
 0xcc9   :  { %8209 = vmatmul.mubr.bf16.vlgmr.msra.gmra.mrb[28].mxu0 %v6849_v43  ;;  %8373 = vmatmul.mubr.bf16.vlgmr.msra.gmra.mrb[52].mxu1 %v6849_v43  ;;  %v12229_v43 = vld [vmem:[%s16699_s19 + $0x5cc] ss:$16 sps:$4 sm:$0xff]  }
 0xcca   :  { %8218 = vmatpush1.bf16.msra.mxu0 %v12140_v29  ;;  %8382 = vmatpush1.bf16.msra.mxu1 %v12143_v32  ;;  %v12226_v32 = vld [vmem:[%s16699_s19 + $0x5c4] ss:$16 sps:$4 sm:$0xff]  }
 0xccb   :  { %8219 = vmatprep.subr.bf16.mxu0 %v12148_v59  ;;  %8383 = vmatprep.subr.bf16.mxu1 %v12151_v33  ;;  %v12224_v33 = vld [vmem:[%s16699_s19 + $0x5c0] ss:$16 sps:$4 sm:$0xff]  }
 0xcce   :  { %8220 = vmatpush1.bf16.msra.mxu0 %v12146_v37  ;;  %8384 = vmatpush1.bf16.msra.mxu1 %v12149_v7  ;;  %v12227_v37 = vld [vmem:[%s16699_s19 + $0x5c8] ss:$16 sps:$4 sm:$0xff]   ;;  %v12232_v7 = vld [vmem:[%s16699_s19 + $0x5e4] ss:$16 sps:$4 sm:$0xff]  }
 0xccf   :  { %8221 = vmatprep.subr.bf16.mxu0 %v12154_v24  ;;  %8385 = vmatprep.subr.bf16.mxu1 %v12157_v45  ;;  %v12235_v24 = vld [vmem:[%s16699_s19 + $0x5ec] ss:$16 sps:$4 sm:$0xff]   ;;  %v12230_v45 = vld [vmem:[%s16699_s19 + $0x5e0] ss:$16 sps:$4 sm:$0xff]  }
 0xcd2   :  { %8222 = vmatpush1.bf16.msra.mxu0 %v12152_v21  ;;  %8386 = vmatpush1.bf16.msra.mxu1 %v12155_v50  ;;  %v12233_v21 = vld [vmem:[%s16699_s19 + $0x5e8] ss:$16 sps:$4 sm:$0xff]  }
 0xcd3   :  { %8223 = vmatprep.subr.bf16.mxu0 %v12160_v51  ;;  %8387 = vmatprep.subr.bf16.mxu1 %v12163_v22  ;;  %v12238_v51 = vld [vmem:[%s16699_s19 + $0x604] ss:$16 sps:$4 sm:$0xff]   ;;  %v12241_v22 = vld [vmem:[%s16699_s19 + $0x60c] ss:$16 sps:$4 sm:$0xff]  }
 0xcd6   :  { %8224 = vmatpush1.bf16.msra.mxu0 %v12158_v56  ;;  %8388 = vmatpush1.bf16.msra.mxu1 %v12161_v34 }
 0xcd7   :  { %8225 = vmatprep.subr.bf16.mxu0 %v12166_v57  ;;  %8389 = vmatprep.subr.bf16.mxu1 %v12169_v12 }
 0xcda   :  { %8226 = vmatpush1.bf16.msra.mxu0 %v12164_v17  ;;  %8390 = vmatpush1.bf16.msra.mxu1 %v12167_v18  ;;  %v12236_v18 = vld [vmem:[%s16699_s19 + $0x600] ss:$16 sps:$4 sm:$0xff]  }
 0xcdb   :  { %8227 = vmatprep.subr.bf16.mxu0 %v12172_v9  ;;  %8391 = vmatprep.subr.bf16.mxu1 %v12175_v54  ;;  %v12239_v9 = vld [vmem:[%s16699_s19 + $0x608] ss:$16 sps:$4 sm:$0xff]  }
 0xcde   :  { %8228 = vmatpush1.bf16.msra.mxu0 %v12170_v63  ;;  %8392 = vmatpush1.bf16.msra.mxu1 %v12173_v42 }
 0xcdf   :  { %8229 = vmatprep.subr.bf16.mxu0 %v12178_v0  ;;  %8393 = vmatprep.subr.bf16.mxu1 %v12181_v23  ;;  %v12244_v0 = vld [vmem:[%s16699_s19 + $0x624] ss:$16 sps:$4 sm:$0xff]   ;;  %v12247_v23 = vld [vmem:[%s16699_s19 + $0x62c] ss:$16 sps:$4 sm:$0xff]  }
 0xce2   :  { %8230 = vmatpush1.bf16.msra.mxu0 %v12176_v31  ;;  %8394 = vmatpush1.bf16.msra.mxu1 %v12179_v14 }
 0xce3   :  { %8231 = vmatprep.subr.bf16.mxu0 %v12184_v15  ;;  %8395 = vmatprep.subr.bf16.mxu1 %v12187_v35  ;;  %v12242_v15 = vld [vmem:[%s16699_s19 + $0x620] ss:$16 sps:$4 sm:$0xff]   ;;  %v12245_v35 = vld [vmem:[%s16699_s19 + $0x628] ss:$16 sps:$4 sm:$0xff]  }
 0xce6   :  { %8232 = vmatpush1.bf16.msra.mxu0 %v12182_v38  ;;  %8396 = vmatpush1.bf16.msra.mxu1 %v12185_v39  ;;  %v12253_v39 = vld [vmem:[%s16699_s19 + $0x64c] ss:$16 sps:$4 sm:$0xff]  }
 0xce7   :  { %8233 = vmatprep.subr.bf16.mxu0 %v12190_v53  ;;  %8397 = vmatprep.subr.bf16.mxu1 %v12193_v55  ;;  %v12248_v53 = vld [vmem:[%s16699_s19 + $0x640] ss:$16 sps:$4 sm:$0xff]   ;;  %v12251_v55 = vld [vmem:[%s16699_s19 + $0x648] ss:$16 sps:$4 sm:$0xff]  }
 0xcea   :  { %8234 = vmatpush1.bf16.msra.mxu0 %v12188_v61  ;;  %8398 = vmatpush1.bf16.msra.mxu1 %v12191_v62  ;;  %v12256_v61 = vld [vmem:[%s16699_s19 + $0x664] ss:$16 sps:$4 sm:$0xff]   ;;  %v12259_v62 = vld [vmem:[%s16699_s19 + $0x66c] ss:$16 sps:$4 sm:$0xff]  }
 0xceb   :  { %8235 = vmatprep.subr.bf16.mxu0 %v12196_v36  ;;  %8399 = vmatprep.subr.bf16.mxu1 %v12199_v40  ;;  %v12254_v36 = vld [vmem:[%s16699_s19 + $0x660] ss:$16 sps:$4 sm:$0xff]   ;;  %v12257_v40 = vld [vmem:[%s16699_s19 + $0x668] ss:$16 sps:$4 sm:$0xff]  }
 0xcee   :  { %8236 = vmatpush1.bf16.msra.mxu0 %v12194_v47  ;;  %8400 = vmatpush1.bf16.msra.mxu1 %v12197_v44  ;;  %v12262_v47 = vld [vmem:[%s16699_s19 + $0x684] ss:$16 sps:$4 sm:$0xff]   ;;  %v12265_v44 = vld [vmem:[%s16699_s19 + $0x68c] ss:$16 sps:$4 sm:$0xff]  }
 0xcef   :  { %8237 = vmatprep.subr.bf16.mxu0 %v12202_v58  ;;  %8401 = vmatprep.subr.bf16.mxu1 %v12205_v2  ;;  %v12260_v58 = vld [vmem:[%s16699_s19 + $0x680] ss:$16 sps:$4 sm:$0xff]   ;;  %v12263_v2 = vld [vmem:[%s16699_s19 + $0x688] ss:$16 sps:$4 sm:$0xff]  }
 0xcf2   :  { %8238 = vmatpush1.bf16.msra.mxu0 %v12200_v3  ;;  %8402 = vmatpush1.bf16.msra.mxu1 %v12203_v1  ;;  %v12268_v3 = vld [vmem:[%s16699_s19 + $0x6a4] ss:$16 sps:$4 sm:$0xff]   ;;  %v12271_v1 = vld [vmem:[%s16699_s19 + $0x6ac] ss:$16 sps:$4 sm:$0xff]  }
 0xcf3   :  { %8239 = vmatprep.subr.bf16.mxu0 %v12208_v4  ;;  %8403 = vmatprep.subr.bf16.mxu1 %v12211_v48  ;;  %v12266_v4 = vld [vmem:[%s16699_s19 + $0x6a0] ss:$16 sps:$4 sm:$0xff]   ;;  %v12269_v48 = vld [vmem:[%s16699_s19 + $0x6a8] ss:$16 sps:$4 sm:$0xff]  }
 0xcf6   :  { %8240 = vmatpush1.bf16.msra.mxu0 %v12206_v52  ;;  %8404 = vmatpush1.bf16.msra.mxu1 %v12209_v6  ;;  %v12274_v52 = vld [vmem:[%s16699_s19 + $0x6c4] ss:$16 sps:$4 sm:$0xff]   ;;  %v12277_v6 = vld [vmem:[%s16699_s19 + $0x6cc] ss:$16 sps:$4 sm:$0xff]  }
 0xcf7   :  { %8241 = vmatprep.subr.bf16.mxu0 %v12214_v8  ;;  %8405 = vmatprep.subr.bf16.mxu1 %v12217_v10  ;;  %v12272_v8 = vld [vmem:[%s16699_s19 + $0x6c0] ss:$16 sps:$4 sm:$0xff]   ;;  %v12275_v10 = vld [vmem:[%s16699_s19 + $0x6c8] ss:$16 sps:$4 sm:$0xff]  }
 0xcf8   :  { %v6448_v16 = vpop.f32.mrb[24].mxu0 }
 0xcf9   :  { %12458 = vtanh.f32 %v6448_v16  ;;  %v6530_v19 = vpop.f32.mrb[48].mxu1  ;;  %v6450_v20 = vpop.f32.mrb[25].mxu0  ;;  %v12286_v16 = vld [vmem:[%s16699_s19 + $0x704] ss:$16 sps:$4 sm:$0xff]  }
 0xcfa   :  { %12460 = vtanh.f32 %v6530_v19  ;;  %8242 = vmatpush1.bf16.msra.mxu0 %v12212_v46  ;;  %8406 = vmatpush1.bf16.msra.mxu1 %v12215_v5  ;;  %v6532_v26 = vpop.f32.mrb[49].mxu1  ;;  %v6452_v25 = vpop.f32.mrb[26].mxu0  ;;  %v12280_v46 = vld [vmem:[%s16699_s19 + $0x6e4] ss:$16 sps:$4 sm:$0xff]   ;;  %v12283_v5 = vld [vmem:[%s16699_s19 + $0x6ec] ss:$16 sps:$4 sm:$0xff]  }
 0xcfb   :  { %12462 = vtanh.f32 %v6450_v20  ;;  %v6534_v28 = vpop.f32.mrb[50].mxu1  ;;  %v6453_v29 = vpop.f32.mrb[27].mxu0  ;;  %8243 = vmatprep.subr.bf16.mxu0 %v12220_v11  ;;  %8407 = vmatprep.subr.bf16.mxu1 %v12223_v13  ;;  %v12278_v11 = vld [vmem:[%s16699_s19 + $0x6e0] ss:$16 sps:$4 sm:$0xff]   ;;  %v12281_v13 = vld [vmem:[%s16699_s19 + $0x6e8] ss:$16 sps:$4 sm:$0xff]  }
 0xcfc   :  { %12464 = vtanh.f32 %v6532_v26  ;;  %v6535_v59 = vpop.f32.mrb[51].mxu1  ;;  %v12289_v19 = vld [vmem:[%s16699_s19 + $0x70c] ss:$16 sps:$4 sm:$0xff]   ;;  %v12284_v20 = vld [vmem:[%s16699_s19 + $0x700] ss:$16 sps:$4 sm:$0xff]  }
 0xcfd   :  { %v12287_v26 = vld [vmem:[%s16699_s19 + $0x708] ss:$16 sps:$4 sm:$0xff]   ;;  %v12292_v25 = vld [vmem:[%s16699_s19 + $0x724] ss:$16 sps:$4 sm:$0xff]  }
 0xcfe   :  { %8244 = vmatpush1.bf16.msra.mxu0 %v12218_v27  ;;  %8408 = vmatpush1.bf16.msra.mxu1 %v12221_v41  ;;  %v12295_v27 = vld [vmem:[%s16699_s19 + $0x72c] ss:$16 sps:$4 sm:$0xff]   ;;  %v12290_v41 = vld [vmem:[%s16699_s19 + $0x720] ss:$16 sps:$4 sm:$0xff]   ;;  %v12293_v28 = vld [vmem:[%s16699_s19 + $0x728] ss:$16 sps:$4 sm:$0xff]  }
 0xcff   :  { %8245 = vmatprep.subr.bf16.mxu0 %v12226_v32  ;;  %8409 = vmatprep.subr.bf16.mxu1 %v12229_v43  ;;  %v12298_v29 = vld [vmem:[%s16699_s19 + $0x744] ss:$16 sps:$4 sm:$0xff]   ;;  %v12301_v32 = vld [vmem:[%s16699_s19 + $0x74c] ss:$16 sps:$4 sm:$0xff]   ;;  %v12296_v43 = vld [vmem:[%s16699_s19 + $0x740] ss:$16 sps:$4 sm:$0xff]  }
 0xd00   :  { %v12299_v59 = vld [vmem:[%s16699_s19 + $0x748] ss:$16 sps:$4 sm:$0xff]  }
 0xd02   :  { %8246 = vmatpush1.bf16.msra.mxu0 %v12224_v33  ;;  %8410 = vmatpush1.bf16.msra.mxu1 %v12227_v37  ;;  %v12304_v33 = vld [vmem:[%s16699_s19 + $0x764] ss:$16 sps:$4 sm:$0xff]   ;;  %v12307_v37 = vld [vmem:[%s16699_s19 + $0x76c] ss:$16 sps:$4 sm:$0xff]  }
 0xd03   :  { %v12459_v50 = vpop.eup %12458  ;;  %8247 = vmatprep.subr.bf16.mxu0 %v12232_v7  ;;  %8411 = vmatprep.subr.bf16.mxu1 %v12235_v24  ;;  %v12302_v7 = vld [vmem:[%s16699_s19 + $0x760] ss:$16 sps:$4 sm:$0xff]   ;;  %v12305_v24 = vld [vmem:[%s16699_s19 + $0x768] ss:$16 sps:$4 sm:$0xff]  }
 0xd04   :  { %v16018_v56 = vpop.eup %12460  ;;  %v6851_v63 = vpack.c.bf16 %v12459_v50, %v12459_v50 }
 0xd05   :  { %v12463_v34 = vpop.eup %12462 }
 0xd06   :  { %v12465_v57 = vpop.eup %12464  ;;  %v6570_v12 = vcombine.low %v12459_v50, %v12463_v34  ;;  %8248 = vmatpush1.bf16.msra.mxu0 %v12230_v45  ;;  %8412 = vmatpush1.bf16.msra.mxu1 %v12233_v21  ;;  %v6852_v17 = vpack.c.bf16 %v12463_v34, %v12463_v34  ;;  %v12310_v45 = vld [vmem:[%s16699_s19 + $0x784] ss:$16 sps:$4 sm:$0xff]   ;;  %v12313_v21 = vld [vmem:[%s16699_s19 + $0x78c] ss:$16 sps:$4 sm:$0xff]   ;;  %v12308_v50 = vld [vmem:[%s16699_s19 + $0x780] ss:$16 sps:$4 sm:$0xff]  }
 0xd07   :  { %v6571_v54 = vcombine.low %v16018_v56, %v12465_v57  ;;  %8258 = vmatprep.subr.bf16.mxu0 %v12238_v51  ;;  %8422 = vmatprep.subr.bf16.mxu1 %v12241_v22  ;;  %v6854_v14 = vpack.c.bf16 %v12465_v57, %v12465_v57  ;;  %v12311_v51 = vld [vmem:[%s16699_s19 + $0x788] ss:$16 sps:$4 sm:$0xff]   ;;  %v12316_v22 = vld [vmem:[%s16699_s19 + $0x7a4] ss:$16 sps:$4 sm:$0xff]   ;;  %v12319_v34 = vld [vmem:[%s16699_s19 + $0x7ac] ss:$16 sps:$4 sm:$0xff]  }
 0xd08   :  { %v6578_v42 = vrot.slane %v6570_v12, %v12801_v49  ;;  %8249 = vmatprep.mubr.bf16.mxu0 %v6852_v17  ;;  %8413 = vmatprep.mubr.bf16.mxu1 %v6852_v17  ;;  %v12314_v57 = vld [vmem:[%s16699_s19 + $0x7a0] ss:$16 sps:$4 sm:$0xff]   ;;  %v12317_v12 = vld [vmem:[%s16699_s19 + $0x7a8] ss:$16 sps:$4 sm:$0xff]   ;;  %v12322_v17 = vld [vmem:[%s16699_s19 + $0x7c4] ss:$16 sps:$4 sm:$0xff]  }
 0xd09   :  { %v6585_v31 = vrot.slane %v6571_v54, %v12801_v49  ;;  %8250 = vmatmul.mubr.bf16.vlgmr.msra.gmra.mrb[28].mxu0 %v6851_v63  ;;  %8414 = vmatmul.mubr.bf16.vlgmr.msra.gmra.mrb[52].mxu1 %v6851_v63  ;;  %v12250_v49 = vld [vmem:[%s16699_s19 + $0x644] ss:$16 sps:$4 sm:$0xff]   ;;  %v12323_v54 = vld [vmem:[%s16699_s19 + $0x7c8] ss:$16 sps:$4 sm:$0xff]  }
 0xd0a   :  { %8259 = vmatpush1.bf16.msra.mxu0 %v12236_v18  ;;  %8423 = vmatpush1.bf16.msra.mxu1 %v12239_v9  ;;  %v12325_v18 = vld [vmem:[%s16699_s19 + $0x7cc] ss:$16 sps:$4 sm:$0xff]   ;;  %v12320_v9 = vld [vmem:[%s16699_s19 + $0x7c0] ss:$16 sps:$4 sm:$0xff]   ;;  %v12328_v63 = vld [vmem:[%s16699_s19 + $0x7e4] ss:$16 sps:$4 sm:$0xff]  }
 0xd0b   :  { %v6586_v38 = vcombine.low %v6578_v42, %v6585_v31  ;;  %8290 = vmatprep.mubr.bf16.mxu0 %v6854_v14  ;;  %8454 = vmatprep.mubr.bf16.mxu1 %v6854_v14  ;;  %v12331_v42 = vld [vmem:[%s16699_s19 + $0x7ec] ss:$16 sps:$4 sm:$0xff]   ;;  %v12332_v14 = vld [vmem:[%s16700_s20] ss:$8 sps:$4 sm:$0xff]  }
 0xd0c   :  { %8260 = vmatprep.subr.bf16.mxu0 %v12244_v0  ;;  %8424 = vmatprep.subr.bf16.mxu1 %v12247_v23  ;;  %v12326_v0 = vld [vmem:[%s16699_s19 + $0x7e0] ss:$16 sps:$4 sm:$0xff]   ;;  %v12329_v23 = vld [vmem:[%s16699_s19 + $0x7e8] ss:$16 sps:$4 sm:$0xff]   ;;  %v12334_v31 = vld [vmem:[%s16700_s20 + $0x4] ss:$8 sps:$4 sm:$0xff]  }
 0xd0d   :  { %6590 = vst [vmem:[%s16707_s27 + $0x8] sm:$0xff] %v6586_v38  ;;  %v12335_v38 = vld [vmem:[%s16700_s20 + $0x10] ss:$8 sps:$4 sm:$0xff]  }
 0xd0e   :  { %8261 = vmatpush1.bf16.msra.mxu0 %v12242_v15  ;;  %8425 = vmatpush1.bf16.msra.mxu1 %v12245_v35  ;;  %v6853_v15 = vpack.c.bf16 %v16018_v56, %v16018_v56  ;;  %v12337_v35 = vld [vmem:[%s16700_s20 + $0x14] ss:$8 sps:$4 sm:$0xff]   ;;  %v12338_v56 = vld [vmem:[%s16700_s20 + $0x20] ss:$8 sps:$4 sm:$0xff]  }
 0xd0f   :  { %8262 = vmatprep.subr.bf16.mxu0 %v12250_v49  ;;  %8426 = vmatprep.subr.bf16.mxu1 %v12253_v39  ;;  %v12340_v49 = vld [vmem:[%s16700_s20 + $0x24] ss:$8 sps:$4 sm:$0xff]   ;;  %v12343_v39 = vld [vmem:[%s16700_s20 + $0x34] ss:$8 sps:$4 sm:$0xff]  }
 0xd12   :  { %8263 = vmatpush1.bf16.msra.mxu0 %v12248_v53  ;;  %8427 = vmatpush1.bf16.msra.mxu1 %v12251_v55  ;;  %v12341_v53 = vld [vmem:[%s16700_s20 + $0x30] ss:$8 sps:$4 sm:$0xff]   ;;  %v12346_v55 = vld [vmem:[%s16700_s20 + $0x44] ss:$8 sps:$4 sm:$0xff]  }
 0xd13   :  { %8264 = vmatprep.subr.bf16.mxu0 %v12256_v61  ;;  %8428 = vmatprep.subr.bf16.mxu1 %v12259_v62  ;;  %v12344_v61 = vld [vmem:[%s16700_s20 + $0x40] ss:$8 sps:$4 sm:$0xff]   ;;  %v12349_v62 = vld [vmem:[%s16700_s20 + $0x54] ss:$8 sps:$4 sm:$0xff]  }
 0xd16   :  { %8265 = vmatpush1.bf16.msra.mxu0 %v12254_v36  ;;  %8429 = vmatpush1.bf16.msra.mxu1 %v12257_v40  ;;  %v12347_v36 = vld [vmem:[%s16700_s20 + $0x50] ss:$8 sps:$4 sm:$0xff]   ;;  %v12352_v40 = vld [vmem:[%s16700_s20 + $0x64] ss:$8 sps:$4 sm:$0xff]  }
 0xd17   :  { %8266 = vmatprep.subr.bf16.mxu0 %v12262_v47  ;;  %8430 = vmatprep.subr.bf16.mxu1 %v12265_v44  ;;  %v12350_v47 = vld [vmem:[%s16700_s20 + $0x60] ss:$8 sps:$4 sm:$0xff]   ;;  %v12355_v44 = vld [vmem:[%s16700_s20 + $0x74] ss:$8 sps:$4 sm:$0xff]  }
 0xd1a   :  { %8267 = vmatpush1.bf16.msra.mxu0 %v12260_v58  ;;  %8431 = vmatpush1.bf16.msra.mxu1 %v12263_v2  ;;  %v12353_v58 = vld [vmem:[%s16700_s20 + $0x70] ss:$8 sps:$4 sm:$0xff]   ;;  %v12358_v2 = vld [vmem:[%s16700_s20 + $0x84] ss:$8 sps:$4 sm:$0xff]  }
 0xd1b   :  { %8268 = vmatprep.subr.bf16.mxu0 %v12268_v3  ;;  %8432 = vmatprep.subr.bf16.mxu1 %v12271_v1  ;;  %v12356_v3 = vld [vmem:[%s16700_s20 + $0x80] ss:$8 sps:$4 sm:$0xff]   ;;  %v12361_v1 = vld [vmem:[%s16700_s20 + $0x94] ss:$8 sps:$4 sm:$0xff]  }
 0xd1e   :  { %8269 = vmatpush1.bf16.msra.mxu0 %v12266_v4  ;;  %8433 = vmatpush1.bf16.msra.mxu1 %v12269_v48  ;;  %v12359_v4 = vld [vmem:[%s16700_s20 + $0x90] ss:$8 sps:$4 sm:$0xff]   ;;  %v12364_v48 = vld [vmem:[%s16700_s20 + $0xa4] ss:$8 sps:$4 sm:$0xff]  }
 0xd1f   :  { %8270 = vmatprep.subr.bf16.mxu0 %v12274_v52  ;;  %8434 = vmatprep.subr.bf16.mxu1 %v12277_v6  ;;  %v12362_v52 = vld [vmem:[%s16700_s20 + $0xa0] ss:$8 sps:$4 sm:$0xff]   ;;  %v12367_v6 = vld [vmem:[%s16700_s20 + $0xb4] ss:$8 sps:$4 sm:$0xff]  }
 0xd22   :  { %8271 = vmatpush1.bf16.msra.mxu0 %v12272_v8  ;;  %8435 = vmatpush1.bf16.msra.mxu1 %v12275_v10  ;;  %v12365_v8 = vld [vmem:[%s16700_s20 + $0xb0] ss:$8 sps:$4 sm:$0xff]   ;;  %v12370_v10 = vld [vmem:[%s16700_s20 + $0xc4] ss:$8 sps:$4 sm:$0xff]  }
 0xd23   :  { %8272 = vmatprep.subr.bf16.mxu0 %v12280_v46  ;;  %8436 = vmatprep.subr.bf16.mxu1 %v12283_v5  ;;  %v12368_v46 = vld [vmem:[%s16700_s20 + $0xc0] ss:$8 sps:$4 sm:$0xff]   ;;  %v12373_v5 = vld [vmem:[%s16700_s20 + $0xd4] ss:$8 sps:$4 sm:$0xff]  }
 0xd26   :  { %8273 = vmatpush1.bf16.msra.mxu0 %v12278_v11  ;;  %8437 = vmatpush1.bf16.msra.mxu1 %v12281_v13  ;;  %v12371_v11 = vld [vmem:[%s16700_s20 + $0xd0] ss:$8 sps:$4 sm:$0xff]   ;;  %v12376_v13 = vld [vmem:[%s16700_s20 + $0xe4] ss:$8 sps:$4 sm:$0xff]  }
 0xd27   :  { %8274 = vmatprep.subr.bf16.mxu0 %v12286_v16  ;;  %8438 = vmatprep.subr.bf16.mxu1 %v12289_v19  ;;  %v12374_v16 = vld [vmem:[%s16700_s20 + $0xe0] ss:$8 sps:$4 sm:$0xff]   ;;  %v12379_v19 = vld [vmem:[%s16700_s20 + $0xf4] ss:$8 sps:$4 sm:$0xff]  }
 0xd2a   :  { %8275 = vmatpush1.bf16.msra.mxu0 %v12284_v20  ;;  %8439 = vmatpush1.bf16.msra.mxu1 %v12287_v26  ;;  %v12377_v20 = vld [vmem:[%s16700_s20 + $0xf0] ss:$8 sps:$4 sm:$0xff]   ;;  %v12382_v26 = vld [vmem:[%s16700_s20 + $0x104] ss:$8 sps:$4 sm:$0xff]  }
 0xd2b   :  { %8276 = vmatprep.subr.bf16.mxu0 %v12292_v25  ;;  %8440 = vmatprep.subr.bf16.mxu1 %v12295_v27  ;;  %v8963_v25 = vld [vmem:[%s16703_s23 + $0x80] sm:$0xff]  ;;  %v8964_v27 = vld [vmem:[%s16703_s23 + $0x88] sm:$0xff] }
 0xd2e   :  { %8277 = vmatpush1.bf16.msra.mxu0 %v12290_v41  ;;  %8441 = vmatpush1.bf16.msra.mxu1 %v12293_v28  ;;  %v8947_v41 = vld [vmem:[%s16703_s23] sm:$0xff]  ;;  %v11199_v28 = vpack.c.bf16 %v8964_v27, %v8963_v25 }
 0xd2f   :  { %8278 = vmatprep.subr.bf16.mxu0 %v12298_v29  ;;  %8442 = vmatprep.subr.bf16.mxu1 %v12301_v32  ;;  %v8948_v29 = vld [vmem:[%s16703_s23 + $0x8] sm:$0xff]  ;;  %v8965_v32 = vld [vmem:[%s16703_s23 + $0x90] sm:$0xff] }
 0xd30   :  { %v12380_v27 = vld [vmem:[%s16700_s20 + $0x100] ss:$8 sps:$4 sm:$0xff]  }
 0xd32   :  { %8279 = vmatpush1.bf16.msra.mxu0 %v12296_v43  ;;  %8443 = vmatpush1.bf16.msra.mxu1 %v12299_v59  ;;  %v8966_v43 = vld [vmem:[%s16703_s23 + $0x98] sm:$0xff]  ;;  %v16331_v59 = vpack.c.bf16 %v8948_v29, %v8947_v41 }
 0xd33   :  { %8280 = vmatprep.subr.bf16.mxu0 %v12304_v33  ;;  %8444 = vmatprep.subr.bf16.mxu1 %v12307_v37  ;;  %v16333_v33 = vpack.c.bf16 %v8966_v43, %v8965_v32  ;;  %v8949_v37 = vld [vmem:[%s16703_s23 + $0x10] sm:$0xff]  ;;  %v12388_v43 = vld [vmem:[%s16700_s20 + $0x124] ss:$8 sps:$4 sm:$0xff]  }
 0xd34   :  { %v12383_v32 = vld [vmem:[%s16700_s20 + $0x110] ss:$8 sps:$4 sm:$0xff]  }
 0xd36   :  { %8281 = vmatpush1.bf16.msra.mxu0 %v12302_v7  ;;  %8445 = vmatpush1.bf16.msra.mxu1 %v12305_v24  ;;  %v8950_v7 = vld [vmem:[%s16703_s23 + $0x18] sm:$0xff]  ;;  %v8967_v24 = vld [vmem:[%s16703_s23 + $0xa0] sm:$0xff] }
 0xd37   :  { %8282 = vmatprep.subr.bf16.mxu0 %v12310_v45  ;;  %8446 = vmatprep.subr.bf16.mxu1 %v12313_v21  ;;  %v8968_v45 = vld [vmem:[%s16703_s23 + $0xa8] sm:$0xff]  ;;  %v16348_v21 = vpack.c.bf16 %v8950_v7, %v8949_v37  ;;  %v12391_v7 = vld [vmem:[%s16700_s20 + $0x134] ss:$8 sps:$4 sm:$0xff]  }
 0xd38   :  { %v12386_v37 = vld [vmem:[%s16700_s20 + $0x120] ss:$8 sps:$4 sm:$0xff]  }
 0xd3a   :  { %8283 = vmatpush1.bf16.msra.mxu0 %v12308_v50  ;;  %8447 = vmatpush1.bf16.msra.mxu1 %v12311_v51  ;;  %v16351_v50 = vpack.c.bf16 %v8968_v45, %v8967_v24  ;;  %v8951_v51 = vld [vmem:[%s16703_s23 + $0x20] sm:$0xff]  ;;  %v12389_v24 = vld [vmem:[%s16700_s20 + $0x130] ss:$8 sps:$4 sm:$0xff]  }
 0xd3b   :  { %8284 = vmatprep.subr.bf16.mxu0 %v12316_v22  ;;  %8448 = vmatprep.subr.bf16.mxu1 %v12319_v34  ;;  %v8952_v22 = vld [vmem:[%s16703_s23 + $0x28] sm:$0xff]  ;;  %v8969_v34 = vld [vmem:[%s16703_s23 + $0xb0] sm:$0xff] }
 0xd3c   :  { %v12394_v45 = vld [vmem:[%s16700_s20 + $0x144] ss:$8 sps:$4 sm:$0xff]  }
 0xd3e   :  { %8285 = vmatpush1.bf16.msra.mxu0 %v12314_v57  ;;  %8449 = vmatpush1.bf16.msra.mxu1 %v12317_v12  ;;  %v8970_v57 = vld [vmem:[%s16703_s23 + $0xb8] sm:$0xff]  ;;  %v16366_v12 = vpack.c.bf16 %v8952_v22, %v8951_v51  ;;  %v12392_v51 = vld [vmem:[%s16700_s20 + $0x140] ss:$8 sps:$4 sm:$0xff]  }
 0xd3f   :  { %8286 = vmatprep.subr.bf16.mxu0 %v12322_v17  ;;  %8450 = vmatprep.subr.bf16.mxu1 %v12325_v18  ;;  %v16369_v17 = vpack.c.bf16 %v8970_v57, %v8969_v34  ;;  %v8953_v18 = vld [vmem:[%s16703_s23 + $0x30] sm:$0xff]  ;;  %v12400_v57 = vld [vmem:[%s16700_s20 + $0x164] ss:$8 sps:$4 sm:$0xff]  }
 0xd40   :  { %v12397_v22 = vld [vmem:[%s16700_s20 + $0x154] ss:$8 sps:$4 sm:$0xff]   ;;  %v12395_v34 = vld [vmem:[%s16700_s20 + $0x150] ss:$8 sps:$4 sm:$0xff]  }
 0xd42   :  { %8287 = vmatpush1.bf16.msra.mxu0 %v12320_v9  ;;  %8451 = vmatpush1.bf16.msra.mxu1 %v12323_v54  ;;  %v8954_v9 = vld [vmem:[%s16703_s23 + $0x38] sm:$0xff]  ;;  %v8971_v54 = vld [vmem:[%s16703_s23 + $0xc0] sm:$0xff] }
 0xd43   :  { %8288 = vmatprep.subr.bf16.mxu0 %v12328_v63  ;;  %8452 = vmatprep.subr.bf16.mxu1 %v12331_v42  ;;  %v8972_v63 = vld [vmem:[%s16703_s23 + $0xc8] sm:$0xff]  ;;  %v16384_v42 = vpack.c.bf16 %v8954_v9, %v8953_v18  ;;  %v12403_v9 = vld [vmem:[%s16700_s20 + $0x174] ss:$8 sps:$4 sm:$0xff]  }
 0xd44   :  { %v12398_v18 = vld [vmem:[%s16700_s20 + $0x160] ss:$8 sps:$4 sm:$0xff]  }
 0xd46   :  { %8289 = vmatpush1.bf16.msra.mxu0 %v12326_v0  ;;  %8453 = vmatpush1.bf16.msra.mxu1 %v12329_v23  ;;  %v16387_v0 = vpack.c.bf16 %v8972_v63, %v8971_v54  ;;  %v8955_v23 = vld [vmem:[%s16703_s23 + $0x40] sm:$0xff]  ;;  %v12401_v54 = vld [vmem:[%s16700_s20 + $0x170] ss:$8 sps:$4 sm:$0xff]  }
 0xd47   :  { %8863 = vmatprep.subr.bf16.mxu0 %v12334_v31  ;;  %11200 = vmatprep.subr.bf16.mxu1 %v11199_v28  ;;  %v8956_v31 = vld [vmem:[%s16703_s23 + $0x48] sm:$0xff] }
 0xd48   :  { %v12406_v63 = vld [vmem:[%s16700_s20 + $0x184] ss:$8 sps:$4 sm:$0xff]  }
 0xd49   :  { %8291 = vmatmul.mubr.bf16.vlgmr.msra.gmra.mrb[28].mxu0 %v6853_v15  ;;  %8455 = vmatmul.mubr.bf16.vlgmr.msra.gmra.mrb[52].mxu1 %v6853_v15  ;;  %v8974_v15 = vld [vmem:[%s16703_s23 + $0xd8] sm:$0xff] }
 0xd4a   :  { %8864 = vmatpush1.bf16.msra.mxu0 %v12332_v14  ;;  %11202 = vmatpush3.bf16.msra.mxu1 %v16331_v59  ;;  %v8973_v14 = vld [vmem:[%s16703_s23 + $0xd0] sm:$0xff] }
 0xd4b   :  { %8865 = vmatprep.subr.bf16.mxu0 %v12337_v35  ;;  %11204 = vmatprep.subr.bf16.mxu1 %v16333_v33  ;;  %v16402_v35 = vpack.c.bf16 %v8956_v31, %v8955_v23  ;;  %v12404_v23 = vld [vmem:[%s16700_s20 + $0x180] ss:$8 sps:$4 sm:$0xff]   ;;  %v12409_v31 = vld [vmem:[%s16700_s20 + $0x194] ss:$8 sps:$4 sm:$0xff]  }
 0xd4e   :  { %8866 = vmatpush1.bf16.msra.mxu0 %v12335_v38  ;;  %11206 = vmatpush3.bf16.msra.mxu1 %v16348_v21  ;;  %v16405_v38 = vpack.c.bf16 %v8974_v15, %v8973_v14  ;;  %v12407_v14 = vld [vmem:[%s16700_s20 + $0x190] ss:$8 sps:$4 sm:$0xff]   ;;  %v12412_v15 = vld [vmem:[%s16700_s20 + $0x1a4] ss:$8 sps:$4 sm:$0xff]  }
 0xd4f   :  { %8867 = vmatprep.subr.bf16.mxu0 %v12340_v49  ;;  %11208 = vmatprep.subr.bf16.mxu1 %v16351_v50  ;;  %v8957_v49 = vld [vmem:[%s16703_s23 + $0x50] sm:$0xff] }
 0xd52   :  { %8868 = vmatpush1.bf16.msra.mxu0 %v12338_v56  ;;  %11210 = vmatpush3.bf16.msra.mxu1 %v16366_v12  ;;  %v8958_v56 = vld [vmem:[%s16703_s23 + $0x58] sm:$0xff] }
 0xd53   :  { %8869 = vmatprep.subr.bf16.mxu0 %v12343_v39  ;;  %11212 = vmatprep.subr.bf16.mxu1 %v16369_v17  ;;  %v8975_v39 = vld [vmem:[%s16703_s23 + $0xe0] sm:$0xff] }
 0xd56   :  { %8870 = vmatpush1.bf16.msra.mxu0 %v12341_v53  ;;  %11214 = vmatpush3.bf16.msra.mxu1 %v16384_v42  ;;  %v8976_v53 = vld [vmem:[%s16703_s23 + $0xe8] sm:$0xff] }
 0xd57   :  { %8871 = vmatprep.subr.bf16.mxu0 %v12346_v55  ;;  %11216 = vmatprep.subr.bf16.mxu1 %v16387_v0  ;;  %v16420_v55 = vpack.c.bf16 %v8958_v56, %v8957_v49  ;;  %v12410_v49 = vld [vmem:[%s16700_s20 + $0x1a0] ss:$8 sps:$4 sm:$0xff]   ;;  %v12415_v56 = vld [vmem:[%s16700_s20 + $0x1b4] ss:$8 sps:$4 sm:$0xff]  }
 0xd5a   :  { %8872 = vmatpush1.bf16.msra.mxu0 %v12344_v61  ;;  %11218 = vmatpush3.bf16.msra.mxu1 %v16402_v35  ;;  %v16423_v61 = vpack.c.bf16 %v8976_v53, %v8975_v39  ;;  %v12413_v39 = vld [vmem:[%s16700_s20 + $0x1b0] ss:$8 sps:$4 sm:$0xff]   ;;  %v12418_v53 = vld [vmem:[%s16700_s20 + $0x1c4] ss:$8 sps:$4 sm:$0xff]  }
 0xd5b   :  { %8873 = vmatprep.subr.bf16.mxu0 %v12349_v62  ;;  %11220 = vmatprep.subr.bf16.mxu1 %v16405_v38  ;;  %v8959_v62 = vld [vmem:[%s16703_s23 + $0x60] sm:$0xff] }
 0xd5e   :  { %8874 = vmatpush1.bf16.msra.mxu0 %v12347_v36  ;;  %v8960_v36 = vld [vmem:[%s16703_s23 + $0x68] sm:$0xff]  ;;  %11222 = vmatpush3.bf16.msra.mxu1 %v16420_v55 }
 0xd5f   :  { %8875 = vmatprep.subr.bf16.mxu0 %v12352_v40  ;;  %v8977_v40 = vld [vmem:[%s16703_s23 + $0xf0] sm:$0xff]  ;;  %11224 = vmatprep.subr.bf16.mxu1 %v16423_v61 }
 0xd62   :  { %8876 = vmatpush1.bf16.msra.mxu0 %v12350_v47  ;;  %v8978_v47 = vld [vmem:[%s16703_s23 + $0xf8] sm:$0xff] }
 0xd63   :  { %8877 = vmatprep.subr.bf16.mxu0 %v12355_v44  ;;  %v16438_v44 = vpack.c.bf16 %v8960_v36, %v8959_v62  ;;  %v12416_v62 = vld [vmem:[%s16700_s20 + $0x1c0] ss:$8 sps:$4 sm:$0xff]   ;;  %v12421_v36 = vld [vmem:[%s16700_s20 + $0x1d4] ss:$8 sps:$4 sm:$0xff]  }
 0xd65   :  { %11226 = vmatpush3.bf16.msra.mxu1 %v16438_v44 }
 0xd66   :  { %8878 = vmatpush1.bf16.msra.mxu0 %v12353_v58  ;;  %v16441_v58 = vpack.c.bf16 %v8978_v47, %v8977_v40  ;;  %v12419_v40 = vld [vmem:[%s16700_s20 + $0x1d0] ss:$8 sps:$4 sm:$0xff]   ;;  %v12424_v47 = vld [vmem:[%s16700_s20 + $0x1e4] ss:$8 sps:$4 sm:$0xff]  }
 0xd67   :  { %8879 = vmatprep.subr.bf16.mxu0 %v12358_v2  ;;  %v8961_v2 = vld [vmem:[%s16703_s23 + $0x70] sm:$0xff] }
 0xd68   :  { %11228 = vmatprep.subr.bf16.mxu1 %v16441_v58 }
 0xd6a   :  { %8880 = vmatpush1.bf16.msra.mxu0 %v12356_v3  ;;  %v8962_v3 = vld [vmem:[%s16703_s23 + $0x78] sm:$0xff] }
 0xd6b   :  { %8881 = vmatprep.subr.bf16.mxu0 %v12361_v1  ;;  %v16450_v1 = vpack.c.bf16 %v8962_v3, %v8961_v2  ;;  %v12422_v2 = vld [vmem:[%s16700_s20 + $0x1e0] ss:$8 sps:$4 sm:$0xff]   ;;  %v12427_v3 = vld [vmem:[%s16700_s20 + $0x1f4] ss:$8 sps:$4 sm:$0xff]  }
 0xd6d   :  { %11230 = vmatpush3.bf16.msra.mxu1 %v16450_v1 }
 0xd6e   :  { %8882 = vmatpush1.bf16.msra.mxu0 %v12359_v4  ;;  %11232 = vmatprep.subr.bf16.mxu1 %v11199_v28  ;;  %v12385_v28 = vld [vmem:[%s16700_s20 + $0x114] ss:$8 sps:$4 sm:$0xff]  }
 0xd6f   :  { %8883 = vmatprep.subr.bf16.mxu0 %v12364_v48 }
 0xd72   :  { %8884 = vmatpush1.bf16.msra.mxu0 %v12362_v52 }
 0xd73   :  { %8885 = vmatprep.subr.bf16.mxu0 %v12367_v6 }
 0xd76   :  { %8886 = vmatpush1.bf16.msra.mxu0 %v12365_v8 }
 0xd77   :  { %8887 = vmatprep.subr.bf16.mxu0 %v12370_v10 }
 0xd7a   :  { %8888 = vmatpush1.bf16.msra.mxu0 %v12368_v46 }
 0xd7b   :  { %8889 = vmatprep.subr.bf16.mxu0 %v12373_v5 }
 0xd7e   :  { %8890 = vmatpush1.bf16.msra.mxu0 %v12371_v11 }
 0xd7f   :  { %8891 = vmatprep.subr.bf16.mxu0 %v12376_v13 }
 0xd82   :  { %8892 = vmatpush1.bf16.msra.mxu0 %v12374_v16 }
 0xd83   :  { %8893 = vmatprep.subr.bf16.mxu0 %v12379_v19 }
 0xd86   :  { %8894 = vmatpush1.bf16.msra.mxu0 %v12377_v20 }
 0xd87   :  { %8904 = vmatprep.subr.bf16.mxu0 %v12382_v26 }
 0xe1c   :  { %v8292_v4 = vpop.f32.mrb[28].mxu0  ;;  %v16454_v48 = vpop.f32.mrb[52].mxu1 }
 0xe1d   :  { %vm8463_vm12 = vcmp.ge.f32.partialorder %v8292_v4, 0.0  ;;  %v8467_v52 = vmul.f32 0.2, %v8292_v4  ;;  %v8294_v6 = vpop.f32.mrb[29].mxu0  ;;  %v8458_v8 = vpop.f32.mrb[53].mxu1  ;;  %vm8465_vm15 = vcmp.ge.f32.partialorder %v16454_v48, 0.0 }
 0xe1e   :  { %vm8464_vm13 = vcmp.ge.f32.partialorder %v8294_v6, 0.0  ;;  %v8468_v10 = vmul.f32 0.2, %v8294_v6  ;;  %v8296_v46 = vpop.f32.mrb[30].mxu0  ;;  %v8460_v5 = vpop.f32.mrb[54].mxu1  ;;  %vm8466_vm14 = vcmp.ge.f32.partialorder %v8458_v8, 0.0 }
 0xe1f   :  { %v8471_v11 = vsel %vm8463_vm12, %v8292_v4, %v8467_v52  ;;  %v8470_v13 = vmul.f32 0.2, %v8458_v8  ;;  %v8297_v16 = vpop.f32.mrb[31].mxu0  ;;  %v8461_v19 = vpop.f32.mrb[55].mxu1  ;;  %v8469_v4 = vmul.f32 0.2, %v16454_v48 }
 0xe20   :  { %v8472_v20 = vsel %vm8464_vm13, %v8294_v6, %v8468_v10  ;;  %v8539_v41 = vpack.c.bf16 %v8471_v11, %v8471_v11  ;;  %v12425_v52 = vld [vmem:[%s16700_s20 + $0x1f0] ss:$8 sps:$4 sm:$0xff]  }
 0xe21   :  { %v8540_v26 = vpack.c.bf16 %v8472_v20, %v8472_v20  ;;  %v8474_v25 = vsel %vm8466_vm14, %v8458_v8, %v8470_v13  ;;  %v8473_v6 = vsel %vm8465_vm15, %v16454_v48, %v8469_v4  ;;  %v12443_v4 = vld [vmem:[%s16705_s25 + $0x38] sm:$0xff]  }
 0xe22   :  { %v8542_v29 = vpack.c.bf16 %v8474_v25, %v8474_v25  ;;  %v8541_v8 = vpack.c.bf16 %v8473_v6, %v8473_v6 }
 0xe23   :  { %8895 = vmatprep.mubr.bf16.mxu0 %v8540_v26 }
 0xe24   :  { %8896 = vmatmul.mubr.bf16.vlgmr.msra.gmra.mrb[32].mxu0 %v8539_v41 }
 0xe25   :  { %8905 = vmatpush1.bf16.msra.mxu0 %v12380_v27  ;;  %8936 = vmatprep.mubr.bf16.mxu0 %v8542_v29 }
 0xe26   :  { %8906 = vmatprep.subr.bf16.mxu0 %v12385_v28 }
 0xe29   :  { %8907 = vmatpush1.bf16.msra.mxu0 %v12383_v32 }
 0xe2a   :  { %8908 = vmatprep.subr.bf16.mxu0 %v12388_v43 }
 0xe2d   :  { %8909 = vmatpush1.bf16.msra.mxu0 %v12386_v37 }
 0xe2e   :  { %8910 = vmatprep.subr.bf16.mxu0 %v12391_v7 }
 0xe31   :  { %8911 = vmatpush1.bf16.msra.mxu0 %v12389_v24 }
 0xe32   :  { %8912 = vmatprep.subr.bf16.mxu0 %v12394_v45 }
 0xe35   :  { %8913 = vmatpush1.bf16.msra.mxu0 %v12392_v51 }
 0xe36   :  { %8914 = vmatprep.subr.bf16.mxu0 %v12397_v22 }
 0xe39   :  { %8915 = vmatpush1.bf16.msra.mxu0 %v12395_v34  ;;  %v8945_v34 = vld [vmem:[%s16701_s21] sm:$0x1] }
 0xe3a   :  { %8916 = vmatprep.subr.bf16.mxu0 %v12400_v57 }
 0xe3d   :  { %8917 = vmatpush1.bf16.msra.mxu0 %v12398_v18 }
 0xe3e   :  { %8918 = vmatprep.subr.bf16.mxu0 %v12403_v9  ;;  %v12428_v9 = vld [vmem:[%s16705_s25 + $0x40] sm:$0xff]  }
 0xe41   :  { %8919 = vmatpush1.bf16.msra.mxu0 %v12401_v54  ;;  %v8946_v54 = vld [vmem:[%s16702_s22] sm:$0x1] }
 0xe42   :  { %8920 = vmatprep.subr.bf16.mxu0 %v12406_v63 }
 0xe45   :  { %8921 = vmatpush1.bf16.msra.mxu0 %v12404_v23  ;;  %v12429_v23 = vld [vmem:[%s16705_s25] sm:$0xff]  }
 0xe46   :  { %8922 = vmatprep.subr.bf16.mxu0 %v12409_v31 }
 0xe49   :  { %8923 = vmatpush1.bf16.msra.mxu0 %v12407_v14  ;;  %v12430_v14 = vld [vmem:[%s16705_s25 + $0x48] sm:$0xff]  }
 0xe4a   :  { %8924 = vmatprep.subr.bf16.mxu0 %v12412_v15  ;;  %v12431_v15 = vld [vmem:[%s16705_s25 + $0x8] sm:$0xff]  }
 0xe4d   :  { %8925 = vmatpush1.bf16.msra.mxu0 %v12410_v49  ;;  %v12433_v49 = vld [vmem:[%s16705_s25 + $0x10] sm:$0xff]  }
 0xe4e   :  { %8926 = vmatprep.subr.bf16.mxu0 %v12415_v56  ;;  %v12434_v56 = vld [vmem:[%s16705_s25 + $0x58] sm:$0xff]  }
 0xe51   :  { %8927 = vmatpush1.bf16.msra.mxu0 %v12413_v39  ;;  %v12435_v39 = vld [vmem:[%s16705_s25 + $0x18] sm:$0xff]  }
 0xe52   :  { %8928 = vmatprep.subr.bf16.mxu0 %v12418_v53  ;;  %v12436_v53 = vld [vmem:[%s16705_s25 + $0x60] sm:$0xff]  }
 0xe55   :  { %8929 = vmatpush1.bf16.msra.mxu0 %v12416_v62  ;;  %v12437_v62 = vld [vmem:[%s16705_s25 + $0x20] sm:$0xff]  }
 0xe56   :  { %8930 = vmatprep.subr.bf16.mxu0 %v12421_v36  ;;  %v12438_v36 = vld [vmem:[%s16705_s25 + $0x68] sm:$0xff]  }
 0xe59   :  { %8931 = vmatpush1.bf16.msra.mxu0 %v12419_v40  ;;  %v12439_v40 = vld [vmem:[%s16705_s25 + $0x28] sm:$0xff]  }
 0xe5a   :  { %8932 = vmatprep.subr.bf16.mxu0 %v12424_v47  ;;  %v12440_v47 = vld [vmem:[%s16705_s25 + $0x70] sm:$0xff]  }
 0xe5d   :  { %8933 = vmatpush1.bf16.msra.mxu0 %v12422_v2  ;;  %v12441_v2 = vld [vmem:[%s16705_s25 + $0x30] sm:$0xff]  }
 0xe5e   :  { %8934 = vmatprep.subr.bf16.mxu0 %v12427_v3  ;;  %v12442_v3 = vld [vmem:[%s16705_s25 + $0x78] sm:$0xff]  }
 0xe61   :  { %8935 = vmatpush1.bf16.msra.mxu0 %v12425_v52 }
 0xe64   :  { %8937 = vmatmul.mubr.bf16.vlgmr.msra.gmra.mrb[32].mxu0 %v8541_v8 }
 0xf37   :  { %v16552_v10 = vpop.f32.mrb[32].mxu0 }
 0xf38   :  { %v16554_v46 = vpop.f32.mrb[33].mxu0 }
 0xf39   :  { %v9061_v5 = vmul.f32 %v16554_v46, %v16554_v46  ;;  %v8942_v11 = vpop.f32.mrb[34].mxu0  ;;  %9047 = vmatprep.mubr.f32.mxu1 %v16554_v46 }
 0xf3a   :  { %v8943_v13 = vpop.f32.mrb[35].mxu0  ;;  %9048 = vmatmul.mubr.f32.vlgmr.msra.gmra.mrb[42].mxu1 %v16552_v10 }
 0xf3b   :  { %11234 = vmatpush3.bf16.msra.mxu1 %v16331_v59  ;;  %9126 = vmatprep.mubr.f32.mxu1 %v9061_v5  ;;  %v9060_v59 = vmul.f32 %v16552_v10, %v16552_v10 }
 0xf3c   :  { %11236 = vmatprep.subr.bf16.mxu1 %v16333_v33  ;;  %v8980_v33 = vld [vmem:[%s16704_s24 + $0x8] sm:$0xff] }
 0xf3f   :  { %11238 = vmatpush3.bf16.msra.mxu1 %v16348_v21  ;;  %v8982_v21 = vld [vmem:[%s16704_s24 + $0x18] sm:$0xff] }
 0xf40   :  { %11240 = vmatprep.subr.bf16.mxu1 %v16351_v50  ;;  %v8979_v50 = vld [vmem:[%s16704_s24] sm:$0xff] }
 0xf43   :  { %11242 = vmatpush3.bf16.msra.mxu1 %v16366_v12  ;;  %v11263_v12 = vpack.c.bf16 %v8982_v21, %v8980_v33 }
 0xf44   :  { %11244 = vmatprep.subr.bf16.mxu1 %v16369_v17  ;;  %v8981_v17 = vld [vmem:[%s16704_s24 + $0x10] sm:$0xff] }
 0xf47   :  { %11246 = vmatpush3.bf16.msra.mxu1 %v16384_v42  ;;  %v11265_v42 = vpack.c.bf16 %v8981_v17, %v8979_v50 }
 0xf48   :  { %11248 = vmatprep.subr.bf16.mxu1 %v16387_v0 }
 0xf4b   :  { %11250 = vmatpush3.bf16.msra.mxu1 %v16402_v35 }
 0xf4c   :  { %11252 = vmatprep.subr.bf16.mxu1 %v16405_v38 }
 0xf4f   :  { %11254 = vmatpush3.bf16.msra.mxu1 %v16420_v55 }
 0xf50   :  { %11256 = vmatprep.subr.bf16.mxu1 %v16423_v61 }
 0xf53   :  { %11258 = vmatpush3.bf16.msra.mxu1 %v16438_v44 }
 0xf54   :  { %11260 = vmatprep.subr.bf16.mxu1 %v16441_v58 }
 0xf57   :  { %11262 = vmatpush3.bf16.msra.mxu1 %v16450_v1 }
 0xf58   :  { %11264 = vmatprep.subr.bf16.mxu1 %v11263_v12 }
 0xf5a   :  { %9127 = vmatmul.mubr.f32.vlgmr.msra.gmra.mrb[56].mxu1 %v9060_v59 }
 0xf5b   :  { %9216 = vmatprep.mubr.f32.mxu1 %v12517_v30  ;;  %11266 = vmatpush1.bf16.msra.mxu1 %v11265_v42 }
 0xf5c   :  { %11268 = vmatprep.subr.bf16.mxu1 %v11263_v12 }
0x100d   :  { %v10867_v0 = vpop.f32.mrb[42].mxu1 }
0x100e   :  { %v10868_v35 = vpop.f32.mrb[43].mxu1 }
0x100f   :  { %v10869_v38 = vadd.f32 %v10868_v35, %v10867_v0 }
0x1011   :  { %v9053_v55 = vsel %vm2597_vm4, %v10869_v38, 0.0 }
0x1012   :  { %v9054_v61 = vrot.slane %v9053_v55, 4 }
0x1014   :  { %v9055_v44 = vadd.f32 %v9054_v61, %v9053_v55 }
0x1016   :  { %v9056_v58 = vrot.slane %v9055_v44, 2 }
0x1018   :  { %v9057_v48 = vadd.f32 %v9056_v58, %v9055_v44 }
0x101a   :  { %v9058_v26 = vrot.slane %v9057_v48, 1 }
0x101c   :  { %v9059_v41 = vadd.f32 %v9058_v26, %v9057_v48 }
0x101e   :  { %v9139_v32 = vmul.f32 0.03125, %v9059_v41 }
0x1020   :  { %v9141_v7 = vmul.f32 %v9139_v32, %v9139_v32 }
0x102d   :  { %v10902_v1 = vpop.f32.mrb[56].mxu1 }
0x102e   :  { %v10903_v16 = vpop.f32.mrb[57].mxu1 }
0x102f   :  { %v10904_v19 = vadd.f32 %v10903_v16, %v10902_v1 }
0x1031   :  { %v9132_v20 = vsel %vm2597_vm4, %v10904_v19, 0.0 }
0x1032   :  { %v9133_v25 = vrot.slane %v9132_v20, 4 }
0x1034   :  { %v9134_v27 = vadd.f32 %v9133_v25, %v9132_v20 }
0x1036   :  { %v9135_v28 = vrot.slane %v9134_v27, 2 }
0x1038   :  { %v9136_v29 = vadd.f32 %v9135_v28, %v9134_v27 }
0x103a   :  { %v9137_v43 = vrot.slane %v9136_v29, 1 }
0x103c   :  { %v9138_v37 = vadd.f32 %v9137_v43, %v9136_v29 }
0x103e   :  { %v9140_v24 = vmul.f32 0.03125, %v9138_v37 }
0x1040   :  { %v9142_v45 = vsub.f32 %v9140_v24, %v9141_v7 }
0x1042   :  { %v9143_v51 = vmax.f32 %v9142_v45, 0.0 }
0x1044   :  { %v9144_v22 = vadd.f32 1e-05, %v9143_v51 }
0x1046   :  { %12466 = vrsqrt.f32 %v9144_v22 }
0x1050   :  { %v12467_v57 = vpop.eup %12466 }
0x1051   :  { %v9146_v18 = vmul.f32 %v12467_v57, %v8945_v34 }
0x1053   :  { %10515 = vmatmul.mubr.msk.f32.vlgmr.msra.gmra.mrb[58].mxu1 %vm2695_vm5, %v9146_v18  ;;  %v9147_v63 = vmul.f32 %v9146_v18, %v9139_v32 }
0x1054   :  { %11270 = vmatpush1.bf16.msra.mxu1 %v11265_v42  ;;  %9290 = vmatprep.mubr.f32.mxu1 %v12517_v30  ;;  %v12432_v30 = vld [vmem:[%s16705_s25 + $0x50] sm:$0xff]   ;;  %s12519_s25 = smov [#allocation2]  }
0x1055   :  { %v9148_v31 = vsub.f32 %v8946_v54, %v9147_v63  ;;  %10905 = vmatprep.subr.bf16.mxu1 %v12428_v9  ;;  %s9500_s21 = sshll.u32 %s12519_s25, 4  ;;  %s9501_s21 = int_to_ptr.vmem [resolvable:$true] %s9500_s21 }
0x1056   :  { %s12468_s2 = scalar_lea.vmem %s9501_s21, 32  ;;  %p12473_p1 = scmp.lt.s32.totalorder %s9501_s21, %s9501_s21 }
0x1057   :  { %10516 = vmatmul.mubr.msk.f32.vlgmr.msra.gmra.mrb[60].mxu1 %vm2695_vm5, %v9148_v31  ;;  %p12469_p0 = scmp.ne.s32.totalorder %s9501_s21, %s12468_s2  ;;  %p12474_p2 = scmp.lt.s32.totalorder %s12468_s2, %s12468_s2 }
0x1058   :  { %10906 = vmatpush3.bf16.msra.mxu1 %v12429_v23 }
0x1059   :  { %10907 = vmatprep.subr.bf16.mxu1 %v12430_v14  ;;  %p12475_p3 = por %p12474_p2, %p12473_p1 }
0x105b   :  { %p12476_p4 = pnand %p12475_p3, %p12469_p0 }
0x105c   :  { %10908 = vmatpush3.bf16.msra.mxu1 %v12431_v15 }
0x105d   :  { %10909 = vmatprep.subr.bf16.mxu1 %v12432_v30 }
0x1060   :  { %10910 = vmatpush3.bf16.msra.mxu1 %v12433_v49 }
0x1061   :  { %10911 = vmatprep.subr.bf16.mxu1 %v12434_v56 }
0x1064   :  { %10912 = vmatpush3.bf16.msra.mxu1 %v12435_v39 }
0x1065   :  { %10913 = vmatprep.subr.bf16.mxu1 %v12436_v53 }
0x1068   :  { %10914 = vmatpush3.bf16.msra.mxu1 %v12437_v62 }
0x1069   :  { %10915 = vmatprep.subr.bf16.mxu1 %v12438_v36 }
0x106c   :  { %10916 = vmatpush3.bf16.msra.mxu1 %v12439_v40 }
0x106d   :  { %10917 = vmatprep.subr.bf16.mxu1 %v12440_v47 }
0x1070   :  { %10918 = vmatpush3.bf16.msra.mxu1 %v12441_v2 }
0x1071   :  { %10919 = vmatprep.subr.bf16.mxu1 %v12442_v3 }
0x1074   :  { %10920 = vmatpush3.bf16.msra.mxu1 %v12443_v4 }
0x1126   :  { %v9218_v52 = vpop.f32.mrb[58].mxu1 }
0x1127   :  { %v9300_v6 = vrot.slane %v9218_v52, %v13911_v60  ;;  %v9220_v8 = vpop.f32.mrb[59].mxu1 }
0x1128   :  { %v9304_v5 = vrot.slane %v9220_v8, %v13911_v60 }
0x1129   :  { %v9305_v11 = vmul.f32 %v9300_v6, %v16552_v10 }
0x112a   :  { %v9306_v13 = vmul.f32 %v9304_v5, %v16554_v46  ;;  %v9292_v59 = vpop.f32.mrb[60].mxu1 }
0x112b   :  { %v9310_v33 = vrot.slane %v9292_v59, %v13911_v60  ;;  %v9294_v21 = vpop.f32.mrb[61].mxu1 }
0x112c   :  { %v9314_v50 = vrot.slane %v9294_v21, %v13911_v60 }
0x112d   :  { %v9315_v12 = vadd.f32 %v9310_v33, %v9305_v11 }
0x112e   :  { %v9316_v17 = vadd.f32 %v9314_v50, %v9306_v13 }
0x112f   :  { %vm9317_vm0 = vcmp.ge.f32.partialorder %v9315_v12, 0.0  ;;  %v9319_v42 = vmul.f32 0.2, %v9315_v12 }
0x1130   :  { %v9320_v0 = vmul.f32 0.2, %v9316_v17  ;;  %vm9318_vm1 = vcmp.ge.f32.partialorder %v9316_v17, 0.0 }
0x1131   :  { %v9321_v35 = vsel %vm9317_vm0, %v9315_v12, %v9319_v42 }
0x1132   :  { %v9322_v38 = vsel %vm9318_vm1, %v9316_v17, %v9320_v0  ;;  %v9355_v61 = vpack.c.bf16 %v9321_v35, %v9321_v35 }
0x1133   :  { %v9356_v55 = vpack.c.bf16 %v9322_v38, %v9322_v38 }
0x1135   :  { %9485 = vmatprep.mubr.bf16.mxu1 %v9356_v55 }
0x1136   :  { %9486 = vmatmul.mubr.bf16.vlgmr.msra.gmra.mrb[64].mxu1 %v9355_v61 }
0x1137   :  { %12479 = shalt.err (!%p12476_p4)
}
0x1138   :  { %s12480_s0 = scalar_lea.hbm %s16706_s26, 32 }
0x1139   :  { %p12481_p5 = scmp.ne.s32.totalorder %s16706_s26, %s12480_s0  ;;  %p12484_p6 = scmp.lt.u32.totalorder %s12480_s0, %s16706_s26 }
0x113b   :  { %p12486_p7 = pnand %p12484_p6, %p12481_p5 }
0x113d   :  { %12489 = shalt.err (!%p12486_p7)
}
0x113e   :  { %9503 = dma.vmem_to_hbm [thread:$0]  %s9501_s21, 32, %s16706_s26, [#allocation3]  }
0x113f   :  { %s12520_s30 = smov [#allocation4]  }
0x1140   :  { %s9512_s20 = sshll.u32 %s12520_s30, 4  ;;  %s9513_s20 = int_to_ptr.vmem [resolvable:$true] %s9512_s20 }
0x1141   :  { %s12490_s3 = scalar_lea.vmem %s9513_s20, 32  ;;  %p12495_p9 = scmp.lt.s32.totalorder %s9513_s20, %s9513_s20 }
0x1142   :  { %p12491_p8 = scmp.ne.s32.totalorder %s9513_s20, %s12490_s3  ;;  %p12496_p10 = scmp.lt.s32.totalorder %s12490_s3, %s12490_s3 }
0x1144   :  { %p12497_p11 = por %p12496_p10, %p12495_p9 }
0x1146   :  { %p12498_p12 = pnand %p12497_p11, %p12491_p8 }
0x1209   :  { %v10921_v60 = vpop.f32.mrb[64].mxu1 }
0x120a   :  { %v10922_v10 = vpop.f32.mrb[65].mxu1 }
0x120b   :  { %v10923_v46 = vadd.f32 %v10922_v10, %v10921_v60  ;;  %v10924_v44 = vpop.f32.mrb[66].mxu1 }
0x120c   :  { %v10925_v58 = vpop.f32.mrb[67].mxu1 }
0x120d   :  { %9493 = vst.msk [vmem:[#allocation4] sm:$0x3] %vm3040_vm8, %v10923_v46 }
0x120e   :  { %12501 = shalt.err (!%p12498_p12)
}
0x120f   :  { %s12502_s26 = scalar_lea.hbm %s16708_s28, 32 }
0x1210   :  { %p12503_p13 = scmp.ne.s32.totalorder %s16708_s28, %s12502_s26  ;;  %p12506_p0 = scmp.lt.u32.totalorder %s12502_s26, %s16708_s28 }
0x1212   :  { %p12508_p1 = pnand %p12506_p0, %p12503_p13 }
0x1214   :  { %12511 = shalt.err (!%p12508_p1)
}
0x1215   :  { %9515 = dma.vmem_to_hbm [thread:$0]  %s9513_s20, 32, %s16708_s28, [#allocation5]  }
0x1216   :  { %12512 = dma.done.wait [#allocation3], 32  }
0x1217   :  { %12513 = vsyncadd [#allocation3], 4294967264 }
0x1218   :  { %12514 = dma.done.wait [#allocation5], 32  }
0x1219   :  { %12515 = vsyncadd [#allocation5], 4294967264 }
0x121a   :  { %9524 = vsyncpa [#allocation3], 1 }
0x121b   :  { %9525 = vsyncpa [#allocation5], 1 }

</bundles_post_ra>
